<compile_context>
chip_gen: v6e
topology: v6e:2x2x1
jax: 0.10.0
libtpu: 0.0.40
codegen_flags: <defaults>
</compile_context>

<pallas_src>
import functools

import jax
import jax.numpy as jnp
from jax.experimental import pallas as pl
from jax.experimental.pallas import tpu as pltpu


# ----------------------------- fused Pallas kernel -----------------------------

def _fused_hfeb_kernel(p0_ref, w0_ref, b0_ref, w1_ref, b1_ref, w2_ref, b2_ref,
                       o_ref, h_ref, *, H, W, nf):
    # p0_ref : (P, 27)          bf16  im2col patches of the (pooled+upsampled) 3-ch input
    # w0_ref : (27, nf)         bf16
    # w1_ref : (3, 3*nf, nf)    bf16  per-dy weight slabs, inner K order = (dx, cin)
    # w2_ref : (3, 3*nf, nf_p)  bf16  final layer, output channels zero-padded to 128-mult
    # b0/b1  : (1, nf) f32 ; b2 : (1, nf_p) f32
    # o_ref  : (nf, P)          f32   lane-dense NCHW output slab
    # h_ref  : (P, nf)          f32   VMEM-resident intermediate activation
    P = H * W

    # dx boundary masks (dy boundaries are handled with sublane-aligned slices below).
    pidx = jax.lax.broadcasted_iota(jnp.int32, (P, 1), 0)
    xcoord = pidx % W
    x_has_left = xcoord >= 1          # input pixel (y, x-1) exists
    x_has_right = xcoord <= W - 2     # input pixel (y, x+1) exists

    # ---------------- conv0: one (P, 27) @ (27, nf) matmul (taps folded into K) ----------
    h_ref[...] = (jnp.dot(p0_ref[...], w0_ref[...],
                          preferred_element_type=jnp.float32)
                  + b0_ref[...])

    def conv3x3(w_ref, b_ref):
        # 3x3 conv (stride 1, pad 1) on the VMEM-resident activation h_ref (P, nf).
        nout = w_ref.shape[-1]
        X = h_ref[...]                                                 # (P, nf) f32
        # dx taps: small f32 sublane rolls + f32 selects (v5e-friendly), then a single
        # bf16 cast of the folded-K operand (K = 3*nf) right before the MXU.
        left = jnp.where(x_has_left, pltpu.roll(X, 1, 0), 0.0)         # input (y, x-1)
        right = jnp.where(x_has_right, pltpu.roll(X, P - 1, 0), 0.0)   # input (y, x+1)
        xcat = jnp.concatenate([left, X, right], axis=-1).astype(jnp.bfloat16)  # (P, 3nf)

        # dy taps via sublane-aligned static slices (W % 8 == 0) -- no rolls, no masks.
        # Value-resident accumulation (no acc scratch, no per-dot VMEM round trips).
        center = jnp.dot(xcat, w_ref[1], preferred_element_type=jnp.float32)        # (P, nout)
        up = jnp.dot(xcat[:P - W], w_ref[0], preferred_element_type=jnp.float32)    # rows W:
        down = jnp.dot(xcat[W:], w_ref[2], preferred_element_type=jnp.float32)      # rows :P-W
        zrow = jnp.zeros((W, nout), jnp.float32)
        acc = (center
               + jnp.concatenate([zrow, up], axis=0)
               + jnp.concatenate([down, zrow], axis=0))
        return acc + b_ref[...]

    # res[0] conv + ReLU (stays in VMEM), then res[2] conv (lane-padded output channels).
    h_ref[...] = jnp.maximum(conv3x3(w1_ref, b1_ref), 0.0)
    res = conv3x3(w2_ref, b2_ref)                                      # (P, nf_pad) f32

    # Emit NCHW directly: 128-aligned in-VMEM transpose, slice off the zero-padded
    # channels, lane-dense (P multiple of 128) unmasked store.
    o_ref[...] = res.T[:nf, :]


def fused_convs(y_nhwc, params):
    """conv3x3(3->nf) -> conv3x3(nf->nf)+ReLU -> conv3x3(nf->nf), fused in one pallas_call.

    Returns the result directly in NCHW: (B, nf, H, W).
    """
    B, H, W, Cin = y_nhwc.shape
    nf = params["w0"].shape[-1]
    P = H * W
    assert H >= 2 and W >= 2 and W % 8 == 0, "kernel assumes W % 8 == 0 and H, W >= 2"
    assert P % 128 == 0, "kernel assumes H*W is a multiple of 128 (lane-dense NCHW store)"
    assert nf % 8 == 0
    nf_pad = -(-nf // 128) * 128   # final-layer output channels, lane-padded to 128-mult

    # Wrapper-side im2col of the tiny 3-channel input: (B, P, 9*Cin=27), bf16 operand.
    yp = jnp.pad(y_nhwc, ((0, 0), (1, 1), (1, 1), (0, 0)))
    taps = [yp[:, dy:dy + H, dx:dx + W, :] for dy in range(3) for dx in range(3)]
    p0 = jnp.concatenate(taps, axis=-1).reshape(B, P, 9 * Cin).astype(jnp.bfloat16)

    # Weight prep (bf16 matmul operands, f32 biases). K ordering matches the kernel:
    #   w0: (dy, dx, cin) flattened;  w1/w2: per-dy slabs with inner order (dx, cin).
    # w2/b2 output channels are zero-padded to nf_pad so the final transpose/store is
    # fully (8,128)-aligned without any in-kernel lane concat.
    w0 = params["w0"].reshape(9 * Cin, nf).astype(jnp.bfloat16)
    w1 = params["w1"].reshape(3, 3 * nf, nf).astype(jnp.bfloat16)
    w2 = jnp.pad(params["w2"].reshape(3, 3 * nf, nf).astype(jnp.bfloat16),
                 ((0, 0), (0, 0), (0, nf_pad - nf)))
    b0 = params["b0"].reshape(1, nf).astype(jnp.float32)
    b1 = params["b1"].reshape(1, nf).astype(jnp.float32)
    b2 = jnp.pad(params["b2"].reshape(1, nf).astype(jnp.float32),
                 ((0, 0), (0, nf_pad - nf)))

    kernel = functools.partial(_fused_hfeb_kernel, H=H, W=W, nf=nf)
    out = pl.pallas_call(
        kernel,
        out_shape=jax.ShapeDtypeStruct((B, nf, P), jnp.float32),
        grid=(B,),
        in_specs=[
            pl.BlockSpec((None, P, 9 * Cin), lambda i: (i, 0, 0)),
            pl.BlockSpec((9 * Cin, nf), lambda i: (0, 0)),
            pl.BlockSpec((1, nf), lambda i: (0, 0)),
            pl.BlockSpec((3, 3 * nf, nf), lambda i: (0, 0, 0)),
            pl.BlockSpec((1, nf), lambda i: (0, 0)),
            pl.BlockSpec((3, 3 * nf, nf_pad), lambda i: (0, 0, 0)),
            pl.BlockSpec((1, nf_pad), lambda i: (0, 0)),
        ],
        out_specs=pl.BlockSpec((None, nf, P), lambda i: (i, 0, 0)),
        scratch_shapes=[
            pltpu.VMEM((P, nf), jnp.float32),   # intermediate activation h
        ],
        compiler_params=pltpu.CompilerParams(
            dimension_semantics=("parallel",)),
    )(p0, w0, b0, w1, b1, w2, b2)
    return out.reshape(B, nf, H, W)


# ----------------------------- glue (pool / resize) -----------------------------

def avg_pool_3x3_s2_p1(x_nhwc):
    # nn.AvgPool2d(3, stride=2, padding=1), count_include_pad=True: zero-pad, sum 3x3, /9.
    s = jax.lax.reduce_window(
        x_nhwc, 0.0, jax.lax.add,
        window_dimensions=(1, 3, 3, 1),
        window_strides=(1, 2, 2, 1),
        padding=((0, 0), (1, 1), (1, 1), (0, 0)))
    return s / 9.0


def nearest_resize(y_nhwc, h, w):
    # F.interpolate(mode='nearest', size=(h, w)): src_idx = floor(dst_idx * src / dst)
    B, Hs, Ws, C = y_nhwc.shape
    rows = (jnp.arange(h) * Hs) // h
    cols = (jnp.arange(w) * Ws) // w
    return y_nhwc[:, rows][:, :, cols]


# ----------------------------- module forward -----------------------------

def init_params(key, nf=64):
    k0, k1, k2, k3, k4, k5 = jax.random.split(key, 6)
    return {
        "w0": jax.random.normal(k0, (3, 3, 3, nf), jnp.float32) * 0.1,    # self.conv
        "b0": jax.random.normal(k1, (nf,), jnp.float32) * 0.01,
        "w1": jax.random.normal(k2, (3, 3, nf, nf), jnp.float32) * 0.05,  # res[0]
        "b1": jax.random.normal(k3, (nf,), jnp.float32) * 0.01,
        "w2": jax.random.normal(k4, (3, 3, nf, nf), jnp.float32) * 0.05,  # res[2]
        "b2": jax.random.normal(k5, (nf,), jnp.float32) * 0.01,
    }


def high_frequency_extraction_block11(x_nchw, params):
    """Forward of HighFrequencyExtractionBlock11. NCHW (b,3,h,w) -> NCHW (b,nf,h,w)."""
    x = jnp.transpose(x_nchw, (0, 2, 3, 1))        # NCHW -> NHWC (only 3 channels: tiny)
    b, h, w, c = x.shape
    y = avg_pool_3x3_s2_p1(x)
    y = avg_pool_3x3_s2_p1(y)
    y = nearest_resize(y, h, w)
    return fused_convs(y, params)                  # kernel emits NCHW directly


# ----------------------------- pure-JAX reference -----------------------------

def _conv_ref(x, w, b, relu=False):
    y = jax.lax.conv_general_dilated(
        x, w, window_strides=(1, 1), padding=((1, 1), (1, 1)),
        dimension_numbers=("NHWC", "HWIO", "NHWC"),
        precision=jax.lax.Precision.HIGHEST)
    y = y + b
    return jnp.maximum(y, 0.0) if relu else y


def reference_forward(x_nchw, params):
    x = jnp.transpose(x_nchw, (0, 2, 3, 1))
    b, h, w, c = x.shape
    y = avg_pool_3x3_s2_p1(x)
    y = avg_pool_3x3_s2_p1(y)
    y = nearest_resize(y, h, w)
    out = _conv_ref(y, params["w0"], params["b0"])
    out = _conv_ref(out, params["w1"], params["b1"], relu=True)
    out = _conv_ref(out, params["w2"], params["b2"])
    return jnp.transpose(out, (0, 3, 1, 2))


# ----------------------------- main -----------------------------

if __name__ == "__main__":
    key = jax.random.PRNGKey(0)
    kx, kp = jax.random.split(key)

    B, C, H, W = 2, 3, 16, 16   # conv in-channels are hardcoded to 3 in the PyTorch module
    NF = 64

    x = jax.random.normal(kx, (B, C, H, W), jnp.float32)
    params = init_params(kp, nf=NF)

    out = jax.block_until_ready(high_frequency_extraction_block11(x, params))
    assert out.shape == (B, NF, H, W), out.shape

    ref = jax.block_until_ready(reference_forward(x, params))
    # bf16 MXU operands (f32 accumulate) vs f32 reference: ~1e-3 abs error expected.
    assert jnp.allclose(out, ref, rtol=2e-2, atol=2e-2), float(jnp.max(jnp.abs(out - ref)))

    print("KERNEL_OK")
</pallas_src>

<mosaic_0001>
module attributes {stable_mosaic.version = 11 : i64} {
  func.func @_fused_hfeb_kernel(%arg0: i32, %arg1: memref<1x256x27xbf16, #tpu.memory_space<vmem>>, %arg2: memref<27x64xbf16, #tpu.memory_space<vmem>>, %arg3: memref<1x64xf32, #tpu.memory_space<vmem>>, %arg4: memref<3x192x64xbf16, #tpu.memory_space<vmem>>, %arg5: memref<1x64xf32, #tpu.memory_space<vmem>>, %arg6: memref<3x192x128xbf16, #tpu.memory_space<vmem>>, %arg7: memref<1x128xf32, #tpu.memory_space<vmem>>, %arg8: memref<1x64x256xf32, #tpu.memory_space<vmem>>, %arg9: memref<256x64xf32, #tpu.memory_space<vmem>>) attributes {dimension_semantics = [#tpu.dimension_semantics<parallel>], iteration_bounds = array<i64: 2>, scalar_prefetch = 0 : i64, scratch_operands = 1 : i64, tpu.core_type = #tpu.core_type<tc>, window_params = [{transform_indices = @transform_0, window_bounds = array<i64: 1, 256, 27>}, {pipeline_mode = #tpu.pipeline_mode<synchronous>, transform_indices = @transform_1, window_bounds = array<i64: 27, 64>}, {pipeline_mode = #tpu.pipeline_mode<synchronous>, transform_indices = @transform_2, window_bounds = array<i64: 1, 64>}, {pipeline_mode = #tpu.pipeline_mode<synchronous>, transform_indices = @transform_3, window_bounds = array<i64: 3, 192, 64>}, {pipeline_mode = #tpu.pipeline_mode<synchronous>, transform_indices = @transform_4, window_bounds = array<i64: 1, 64>}, {pipeline_mode = #tpu.pipeline_mode<synchronous>, transform_indices = @transform_5, window_bounds = array<i64: 3, 192, 128>}, {pipeline_mode = #tpu.pipeline_mode<synchronous>, transform_indices = @transform_6, window_bounds = array<i64: 1, 128>}, {transform_indices = @transform_7, window_bounds = array<i64: 1, 64, 256>}]} {
    %0 = tpu.iota {dimensions = array<i32: 0>} : vector<256x1xi32>
    %c16_i32 = arith.constant 16 : i32
    %c0_i32 = arith.constant 0 : i32
    %1 = arith.cmpi eq, %c16_i32, %c0_i32 : i32
    %c1_i32 = arith.constant 1 : i32
    %2 = arith.select %1, %c1_i32, %c16_i32 : i32
    %3 = vector.broadcast %2 : i32 to vector<256x1xi32>
    %4 = arith.remsi %0, %3 : vector<256x1xi32>
    %c0_i32_0 = arith.constant 0 : i32
    %5 = vector.broadcast %c0_i32_0 : i32 to vector<256x1xi32>
    %6 = arith.cmpi ne, %4, %5 : vector<256x1xi32>
    %c0_i32_1 = arith.constant 0 : i32
    %7 = vector.broadcast %c0_i32_1 : i32 to vector<256x1xi32>
    %8 = arith.cmpi slt, %4, %7 : vector<256x1xi32>
    %c0_i32_2 = arith.constant 0 : i32
    %9 = arith.cmpi slt, %2, %c0_i32_2 : i32
    %10 = vector.broadcast %9 : i1 to vector<256x1xi1>
    %11 = vector.broadcast %10 : vector<256x1xi1> to vector<256x1xi1>
    %12 = arith.xori %8, %11 : vector<256x1xi1>
    %13 = arith.andi %12, %6 : vector<256x1xi1>
    %14 = vector.broadcast %2 : i32 to vector<256x1xi32>
    %15 = arith.addi %4, %14 : vector<256x1xi32>
    %16 = arith.select %13, %15, %4 : vector<256x1xi1>, vector<256x1xi32>
    %c1_i32_3 = arith.constant 1 : i32
    %17 = vector.broadcast %c1_i32_3 : i32 to vector<256x1xi32>
    %18 = arith.cmpi sge, %16, %17 : vector<256x1xi32>
    %c14_i32 = arith.constant 14 : i32
    %19 = vector.broadcast %c14_i32 : i32 to vector<256x1xi32>
    %20 = arith.cmpi sle, %16, %19 : vector<256x1xi32>
    %c0 = arith.constant 0 : index
    %c0_4 = arith.constant 0 : index
    %c0_5 = arith.constant 0 : index
    %21 = vector.load %arg1[%c0, %c0_4, %c0_5] : memref<1x256x27xbf16, #tpu.memory_space<vmem>>, vector<1x256x27xbf16>
    %22 = vector.shape_cast %21 : vector<1x256x27xbf16> to vector<256x27xbf16>
    %c0_6 = arith.constant 0 : index
    %c0_7 = arith.constant 0 : index
    %23 = vector.load %arg2[%c0_6, %c0_7] : memref<27x64xbf16, #tpu.memory_space<vmem>>, vector<27x64xbf16>
    %cst = arith.constant dense<0.000000e+00> : vector<256x64xf32>
    %24 = tpu.matmul %22, %23, %cst {dimension_numbers = #tpu.dot_dimension_numbers<[1], [0], [0], [1], [0, 0, 1, 1], [], []>} : vector<256x27xbf16>, vector<27x64xbf16>, vector<256x64xf32> -> vector<256x64xf32>
    %c0_8 = arith.constant 0 : index
    %c0_9 = arith.constant 0 : index
    %25 = vector.load %arg3[%c0_8, %c0_9] : memref<1x64xf32, #tpu.memory_space<vmem>>, vector<1x64xf32>
    %26 = vector.broadcast %25 : vector<1x64xf32> to vector<256x64xf32>
    %27 = arith.addf %24, %26 : vector<256x64xf32>
    %c0_10 = arith.constant 0 : index
    %c0_11 = arith.constant 0 : index
    %28 = vector.load %arg9[%c0_10, %c0_11] : memref<256x64xf32, #tpu.memory_space<vmem>>, vector<256x64xf32>
    tpu.vector_store %arg9[%c0_10, %c0_11], %27 {strides = array<i32>} : memref<256x64xf32, #tpu.memory_space<vmem>>, vector<256x64xf32>,
    %c0_12 = arith.constant 0 : index
    %c0_13 = arith.constant 0 : index
    %29 = vector.load %arg9[%c0_12, %c0_13] : memref<256x64xf32, #tpu.memory_space<vmem>>, vector<256x64xf32>
    %c1_i32_14 = arith.constant 1 : i32
    %30 = tpu.dynamic_rotate %29 by %c1_i32_14 dim 0 : vector<256x64xf32>, i32 -> vector<256x64xf32>
    %cst_15 = arith.constant 0.000000e+00 : f32
    %31 = vector.shape_cast %18 : vector<256x1xi1> to vector<256x1xi1>
    %32 = vector.broadcast %31 : vector<256x1xi1> to vector<256x64xi1>
    %33 = vector.broadcast %cst_15 : f32 to vector<256x64xf32>
    %34 = arith.select %32, %30, %33 : vector<256x64xi1>, vector<256x64xf32>
    %c255_i32 = arith.constant 255 : i32
    %35 = tpu.dynamic_rotate %29 by %c255_i32 dim 0 : vector<256x64xf32>, i32 -> vector<256x64xf32>
    %cst_16 = arith.constant 0.000000e+00 : f32
    %36 = vector.shape_cast %20 : vector<256x1xi1> to vector<256x1xi1>
    %37 = vector.broadcast %36 : vector<256x1xi1> to vector<256x64xi1>
    %38 = vector.broadcast %cst_16 : f32 to vector<256x64xf32>
    %39 = arith.select %37, %35, %38 : vector<256x64xi1>, vector<256x64xf32>
    %40 = tpu.concatenate %34, %29, %39 in 1 : vector<256x64xf32>, vector<256x64xf32>, vector<256x64xf32> -> vector<256x192xf32>
    %41 = arith.truncf %40 : vector<256x192xf32> to vector<256x192xbf16>
    %c1 = arith.constant 1 : index
    %c0_17 = arith.constant 0 : index
    %c0_18 = arith.constant 0 : index
    %42 = vector.load %arg4[%c1, %c0_17, %c0_18] : memref<3x192x64xbf16, #tpu.memory_space<vmem>>, vector<1x192x64xbf16>
    %43 = vector.shape_cast %42 : vector<1x192x64xbf16> to vector<192x64xbf16>
    %cst_19 = arith.constant dense<0.000000e+00> : vector<256x64xf32>
    %44 = tpu.matmul %41, %43, %cst_19 {dimension_numbers = #tpu.dot_dimension_numbers<[1], [0], [0], [1], [0, 0, 1, 1], [], []>} : vector<256x192xbf16>, vector<192x64xbf16>, vector<256x64xf32> -> vector<256x64xf32>
    %45 = vector.extract_strided_slice %41 {offsets = [0, 0], sizes = [240, 192], strides = [1, 1]} : vector<256x192xbf16> to vector<240x192xbf16>
    %c0_20 = arith.constant 0 : index
    %c0_21 = arith.constant 0 : index
    %c0_22 = arith.constant 0 : index
    %46 = vector.load %arg4[%c0_20, %c0_21, %c0_22] : memref<3x192x64xbf16, #tpu.memory_space<vmem>>, vector<1x192x64xbf16>
    %47 = vector.shape_cast %46 : vector<1x192x64xbf16> to vector<192x64xbf16>
    %cst_23 = arith.constant dense<0.000000e+00> : vector<240x64xf32>
    %48 = tpu.matmul %45, %47, %cst_23 {dimension_numbers = #tpu.dot_dimension_numbers<[1], [0], [0], [1], [0, 0, 1, 1], [], []>} : vector<240x192xbf16>, vector<192x64xbf16>, vector<240x64xf32> -> vector<240x64xf32>
    %49 = vector.extract_strided_slice %41 {offsets = [16, 0], sizes = [240, 192], strides = [1, 1]} : vector<256x192xbf16> to vector<240x192xbf16>
    %c2 = arith.constant 2 : index
    %c0_24 = arith.constant 0 : index
    %c0_25 = arith.constant 0 : index
    %50 = vector.load %arg4[%c2, %c0_24, %c0_25] : memref<3x192x64xbf16, #tpu.memory_space<vmem>>, vector<1x192x64xbf16>
    %51 = vector.shape_cast %50 : vector<1x192x64xbf16> to vector<192x64xbf16>
    %cst_26 = arith.constant dense<0.000000e+00> : vector<240x64xf32>
    %52 = tpu.matmul %49, %51, %cst_26 {dimension_numbers = #tpu.dot_dimension_numbers<[1], [0], [0], [1], [0, 0, 1, 1], [], []>} : vector<240x192xbf16>, vector<192x64xbf16>, vector<240x64xf32> -> vector<240x64xf32>
    %cst_27 = arith.constant 0.000000e+00 : f32
    %53 = vector.broadcast %cst_27 : f32 to vector<16x64xf32>
    %54 = tpu.concatenate %53, %48 in 0 : vector<16x64xf32>, vector<240x64xf32> -> vector<256x64xf32>
    %55 = arith.addf %44, %54 : vector<256x64xf32>
    %56 = tpu.concatenate %52, %53 in 0 : vector<240x64xf32>, vector<16x64xf32> -> vector<256x64xf32>
    %57 = arith.addf %55, %56 : vector<256x64xf32>
    %c0_28 = arith.constant 0 : index
    %c0_29 = arith.constant 0 : index
    %58 = vector.load %arg5[%c0_28, %c0_29] : memref<1x64xf32, #tpu.memory_space<vmem>>, vector<1x64xf32>
    %59 = vector.broadcast %58 : vector<1x64xf32> to vector<256x64xf32>
    %60 = arith.addf %57, %59 : vector<256x64xf32>
    %cst_30 = arith.constant 0.000000e+00 : f32
    %61 = vector.broadcast %cst_30 : f32 to vector<256x64xf32>
    %62 = arith.maximumf %60, %61 : vector<256x64xf32>
    %c0_31 = arith.constant 0 : index
    %c0_32 = arith.constant 0 : index
    %63 = vector.load %arg9[%c0_31, %c0_32] : memref<256x64xf32, #tpu.memory_space<vmem>>, vector<256x64xf32>
    tpu.vector_store %arg9[%c0_31, %c0_32], %62 {strides = array<i32>} : memref<256x64xf32, #tpu.memory_space<vmem>>, vector<256x64xf32>,
    %c0_33 = arith.constant 0 : index
    %c0_34 = arith.constant 0 : index
    %64 = vector.load %arg9[%c0_33, %c0_34] : memref<256x64xf32, #tpu.memory_space<vmem>>, vector<256x64xf32>
    %c1_i32_35 = arith.constant 1 : i32
    %65 = tpu.dynamic_rotate %64 by %c1_i32_35 dim 0 : vector<256x64xf32>, i32 -> vector<256x64xf32>
    %cst_36 = arith.constant 0.000000e+00 : f32
    %66 = vector.shape_cast %18 : vector<256x1xi1> to vector<256x1xi1>
    %67 = vector.broadcast %66 : vector<256x1xi1> to vector<256x64xi1>
    %68 = vector.broadcast %cst_36 : f32 to vector<256x64xf32>
    %69 = arith.select %67, %65, %68 : vector<256x64xi1>, vector<256x64xf32>
    %c255_i32_37 = arith.constant 255 : i32
    %70 = tpu.dynamic_rotate %64 by %c255_i32_37 dim 0 : vector<256x64xf32>, i32 -> vector<256x64xf32>
    %cst_38 = arith.constant 0.000000e+00 : f32
    %71 = vector.shape_cast %20 : vector<256x1xi1> to vector<256x1xi1>
    %72 = vector.broadcast %71 : vector<256x1xi1> to vector<256x64xi1>
    %73 = vector.broadcast %cst_38 : f32 to vector<256x64xf32>
    %74 = arith.select %72, %70, %73 : vector<256x64xi1>, vector<256x64xf32>
    %75 = tpu.concatenate %69, %64, %74 in 1 : vector<256x64xf32>, vector<256x64xf32>, vector<256x64xf32> -> vector<256x192xf32>
    %76 = arith.truncf %75 : vector<256x192xf32> to vector<256x192xbf16>
    %c1_39 = arith.constant 1 : index
    %c0_40 = arith.constant 0 : index
    %c0_41 = arith.constant 0 : index
    %77 = vector.load %arg6[%c1_39, %c0_40, %c0_41] : memref<3x192x128xbf16, #tpu.memory_space<vmem>>, vector<1x192x128xbf16>
    %78 = vector.shape_cast %77 : vector<1x192x128xbf16> to vector<192x128xbf16>
    %cst_42 = arith.constant dense<0.000000e+00> : vector<256x128xf32>
    %79 = tpu.matmul %76, %78, %cst_42 {dimension_numbers = #tpu.dot_dimension_numbers<[1], [0], [0], [1], [0, 0, 1, 1], [], []>} : vector<256x192xbf16>, vector<192x128xbf16>, vector<256x128xf32> -> vector<256x128xf32>
    %80 = vector.extract_strided_slice %76 {offsets = [0, 0], sizes = [240, 192], strides = [1, 1]} : vector<256x192xbf16> to vector<240x192xbf16>
    %c0_43 = arith.constant 0 : index
    %c0_44 = arith.constant 0 : index
    %c0_45 = arith.constant 0 : index
    %81 = vector.load %arg6[%c0_43, %c0_44, %c0_45] : memref<3x192x128xbf16, #tpu.memory_space<vmem>>, vector<1x192x128xbf16>
    %82 = vector.shape_cast %81 : vector<1x192x128xbf16> to vector<192x128xbf16>
    %cst_46 = arith.constant dense<0.000000e+00> : vector<240x128xf32>
    %83 = tpu.matmul %80, %82, %cst_46 {dimension_numbers = #tpu.dot_dimension_numbers<[1], [0], [0], [1], [0, 0, 1, 1], [], []>} : vector<240x192xbf16>, vector<192x128xbf16>, vector<240x128xf32> -> vector<240x128xf32>
    %84 = vector.extract_strided_slice %76 {offsets = [16, 0], sizes = [240, 192], strides = [1, 1]} : vector<256x192xbf16> to vector<240x192xbf16>
    %c2_47 = arith.constant 2 : index
    %c0_48 = arith.constant 0 : index
    %c0_49 = arith.constant 0 : index
    %85 = vector.load %arg6[%c2_47, %c0_48, %c0_49] : memref<3x192x128xbf16, #tpu.memory_space<vmem>>, vector<1x192x128xbf16>
    %86 = vector.shape_cast %85 : vector<1x192x128xbf16> to vector<192x128xbf16>
    %cst_50 = arith.constant dense<0.000000e+00> : vector<240x128xf32>
    %87 = tpu.matmul %84, %86, %cst_50 {dimension_numbers = #tpu.dot_dimension_numbers<[1], [0], [0], [1], [0, 0, 1, 1], [], []>} : vector<240x192xbf16>, vector<192x128xbf16>, vector<240x128xf32> -> vector<240x128xf32>
    %cst_51 = arith.constant 0.000000e+00 : f32
    %88 = vector.broadcast %cst_51 : f32 to vector<16x128xf32>
    %89 = tpu.concatenate %88, %83 in 0 : vector<16x128xf32>, vector<240x128xf32> -> vector<256x128xf32>
    %90 = arith.addf %79, %89 : vector<256x128xf32>
    %91 = tpu.concatenate %87, %88 in 0 : vector<240x128xf32>, vector<16x128xf32> -> vector<256x128xf32>
    %92 = arith.addf %90, %91 : vector<256x128xf32>
    %c0_52 = arith.constant 0 : index
    %c0_53 = arith.constant 0 : index
    %93 = vector.load %arg7[%c0_52, %c0_53] : memref<1x128xf32, #tpu.memory_space<vmem>>, vector<1x128xf32>
    %94 = vector.broadcast %93 : vector<1x128xf32> to vector<256x128xf32>
    %95 = arith.addf %92, %94 : vector<256x128xf32>
    %96 = tpu.transpose %95, [1, 0] : vector<256x128xf32> -> vector<128x256xf32>
    %97 = vector.extract_strided_slice %96 {offsets = [0, 0], sizes = [64, 256], strides = [1, 1]} : vector<128x256xf32> to vector<64x256xf32>
    %c0_54 = arith.constant 0 : index
    %c0_55 = arith.constant 0 : index
    %c0_56 = arith.constant 0 : index
    %98 = vector.load %arg8[%c0_54, %c0_55, %c0_56] : memref<1x64x256xf32, #tpu.memory_space<vmem>>, vector<1x64x256xf32>
    %99 = vector.shape_cast %98 : vector<1x64x256xf32> to vector<64x256xf32>
    %100 = vector.shape_cast %97 : vector<64x256xf32> to vector<1x64x256xf32>
    tpu.vector_store %arg8[%c0_54, %c0_55, %c0_56], %100 {strides = array<i32>} : memref<1x64x256xf32, #tpu.memory_space<vmem>>, vector<1x64x256xf32>,
    return
  }
  func.func @transform_0(%arg0: i32) -> (i32, i32, i32) {
    %c0_i32 = arith.constant 0 : i32
    %c0_i32_0 = arith.constant 0 : i32
    %c0_i32_1 = arith.constant 0 : i32
    return %arg0, %c0_i32, %c0_i32_0 : i32, i32, i32
  }
  func.func @transform_1(%arg0: i32) -> (i32, i32) {
    %c0_i32 = arith.constant 0 : i32
    %c0_i32_0 = arith.constant 0 : i32
    %c0_i32_1 = arith.constant 0 : i32
    return %c0_i32, %c0_i32_0 : i32, i32
  }
  func.func @transform_2(%arg0: i32) -> (i32, i32) {
    %c0_i32 = arith.constant 0 : i32
    %c0_i32_0 = arith.constant 0 : i32
    %c0_i32_1 = arith.constant 0 : i32
    return %c0_i32, %c0_i32_0 : i32, i32
  }
  func.func @transform_3(%arg0: i32) -> (i32, i32, i32) {
    %c0_i32 = arith.constant 0 : i32
    %c0_i32_0 = arith.constant 0 : i32
    %c0_i32_1 = arith.constant 0 : i32
    %c0_i32_2 = arith.constant 0 : i32
    return %c0_i32, %c0_i32_0, %c0_i32_1 : i32, i32, i32
  }
  func.func @transform_4(%arg0: i32) -> (i32, i32) {
    %c0_i32 = arith.constant 0 : i32
    %c0_i32_0 = arith.constant 0 : i32
    %c0_i32_1 = arith.constant 0 : i32
    return %c0_i32, %c0_i32_0 : i32, i32
  }
  func.func @transform_5(%arg0: i32) -> (i32, i32, i32) {
    %c0_i32 = arith.constant 0 : i32
    %c0_i32_0 = arith.constant 0 : i32
    %c0_i32_1 = arith.constant 0 : i32
    %c0_i32_2 = arith.constant 0 : i32
    return %c0_i32, %c0_i32_0, %c0_i32_1 : i32, i32, i32
  }
  func.func @transform_6(%arg0: i32) -> (i32, i32) {
    %c0_i32 = arith.constant 0 : i32
    %c0_i32_0 = arith.constant 0 : i32
    %c0_i32_1 = arith.constant 0 : i32
    return %c0_i32, %c0_i32_0 : i32, i32
  }
  func.func @transform_7(%arg0: i32) -> (i32, i32, i32) {
    %c0_i32 = arith.constant 0 : i32
    %c0_i32_0 = arith.constant 0 : i32
    %c0_i32_1 = arith.constant 0 : i32
    return %arg0, %c0_i32, %c0_i32_0 : i32, i32, i32
  }
}

</mosaic_0001>

<bundles_post_ra>
// kernel: tpu_custom_call.1
= control target key start
LH: loop header
LB: loop body
LE: loop exit
PB: predicated region body
PF: predicated region fallthrough
CT: control target
= control target key end

     0   :  { %12 = vsyncpa [#allocation4], 0  ;;  %s7186_s0 = inlined_call_operand.vmem [shape: bf16[2,256,27], index: 0, kind: input, shape index: {}]   ;;  %s7187_s1 = inlined_call_operand.vmem [shape: bf16[27,64], index: 1, kind: input, shape index: {}]   ;;  %s7188_s2 = inlined_call_operand.vmem [shape: f32[1,64], index: 2, kind: input, shape index: {}]   ;;  %s7189_s3 = inlined_call_operand.vmem [shape: bf16[3,192,64], index: 3, kind: input, shape index: {}]   ;;  %s7190_s4 = inlined_call_operand.vmem [shape: f32[1,64], index: 4, kind: input, shape index: {}]   ;;  %s7191_s5 = inlined_call_operand.vmem [shape: bf16[3,192,128], index: 5, kind: input, shape index: {}]   ;;  %s7192_s6 = inlined_call_operand.vmem [shape: f32[1,128], index: 6, kind: input, shape index: {}]   ;;  %s7193_s7 = inlined_call_operand.hbm [shape: f32[2,64,256], index: 7, kind: output, shape index: {}]  }
   0x1   :  { %14 = vsyncpa [#allocation4 + $0x1], 0  ;;  %s4848_s24 = smov 0   ;;  %s4850_s25 = smov 0  }
   0x2   :  { %s4852_s26 = smov 0   ;;  %s4854_s27 = smov 0  }
   0x3 LB: > { %s4869_s28 = sadd.s32 4294967295, %s4800_s27   ;;  %s4077_s29 = sadd.s32 4294967294, %s4800_s27   ;;  %s4800_s27 = sphi %s4854_s27, %s7665_s27   ;;  %s4796_s26 = sphi %s4852_s26, %s7664_s26   ;;  %s4792_s25 = sphi %s4850_s25, %s7663_s25   ;;  %s4788_s24 = sphi %s4848_s24, %s7662_s24  }
   0x4   : > { %s4873_s30 = sadd.s32 1, %s4800_s27   ;;  %s179_s8 = sadd.s32 1, %s4796_s26 }
   0x5   : > { %s176_s9 = ssub.s32 %s4800_s27, %s4873_s30  ;;  %p189_p0 = scmp.ne.s32.totalorder %s4796_s26, %s4792_s25 }
   0x6   : > { %p177_p1 = scmp.eq.s32.totalorder %s176_s9, 0  ;;  %p190_p2 = scmp.eq.s32.totalorder %s4869_s28, 1 }
   0x7   : > { %p195_p3 = scmp.ne.s32.totalorder %s4792_s25, %s4788_s24  ;;  %p196_p4 = scmp.eq.s32.totalorder %s4077_s29, 1 }
   0x8   : > { %s4884_s10 = scalar_select %p177_p1, %s4796_s26, %s179_s8  }
   0x9   : > { %p4886_p5 = por %p190_p2, %p189_p0  ;;  %p4890_p6 = por %p196_p4, %p195_p3 }
   0xa   : > { %p4080_p7 = scmp.ge.s32.totalorder %s4800_s27, 1  ;;  %p240_p8 = scmp.lt.s32.totalorder %s4800_s27, 3 }
   0xc   : > { %p241_p9 = pnand %p4080_p7, %p240_p8 }
   0xe   : > { %244 = sbr.rel (%p241_p9) target bundleno = 1371 (0x55b), region = 48 }
  0x13   : > { %v4650_v0 = vld [vmem:[%s7187_s1 + $0x8] sm:$0x3f]   ;;  %vm942_vm0 = vcmask 1044480   ;;  %vm943_vm1 = vcmask 1045504   ;;  %v4802_v1 = vmov 65535   ;;  %p272_p10 = scmp.lt.s32.totalorder %s4869_s28, 1  ;;  %v278_v47 = vlaneseq }
  0x14   : > { %v944_v2 = vsel %vm942_vm0, 4294967295, %v4802_v1  ;;  %v4651_v5 = vld [vmem:[%s7187_s1] sm:$0xff]   ;;  %vm893_vm2 = vcmask 220160   ;;  %v4668_v22 = vld [vmem:[%s7189_s3 + $0x38] sm:$0xff]   ;;  %v7199_v24 = vmov 0   ;;  %v4669_v25 = vld [vmem:[%s7189_s3 + $0x30] sm:$0xff]  }
  0x15   : > { %v945_v3 = vsel %vm943_vm1, %v944_v2, 0  ;;  %s273_s17 = scalar_select %p272_p10, %s4869_s28, 1  ;;  %v4670_v23 = vld [vmem:[%s7189_s3 + $0xf8] sm:$0xff]   ;;  %v4672_v26 = vld [vmem:[%s7189_s3 + $0xf0] sm:$0xff]   ;;  %v4671_v27 = vld [vmem:[%s7189_s3 + $0x28] sm:$0xff]   ;;  %vm7235_vm3 = vcmask 523264  }
  0x16   : > { %v947_v4 = vand.u32 %v4650_v0, %v945_v3  ;;  %v4674_v28 = vld [vmem:[%s7189_s3 + $0xe8] sm:$0xff]   ;;  %v4673_v29 = vld [vmem:[%s7189_s3 + $0x20] sm:$0xff]   ;;  %v4675_v31 = vld [vmem:[%s7189_s3 + $0x18] sm:$0xff]   ;;  %v5038_v56 = vshrl.u32 %v278_v47, 7  ;;  %s4804_s16 = smov 64   ;;  %s269_s29 = sand.u32 1, %s4792_s25  }
  0x17   : > { %s4386_s18 = sshll.u32 %s273_s17, 7  ;;  %v4676_v30 = vld [vmem:[%s7189_s3 + $0xe0] sm:$0xff]   ;;  %v4678_v32 = vld [vmem:[%s7189_s3 + $0xd8] sm:$0xff]   ;;  %v4677_v33 = vld [vmem:[%s7189_s3 + $0x10] sm:$0xff]   ;;  %s4081_s8 = sshll.u32 %s269_s29, 7 }
  0x18   : > { %4406 = vmatprep.subr.bf16.mxu0 %v947_v4  ;;  %4442 = vmatprep.subr.bf16.mxu1 %v947_v4  ;;  %s4907_s21 = scalar_lea.vmem %s7186_s0, %s4386_s18  ;;  %v4680_v34 = vld [vmem:[%s7189_s3 + $0xd0] sm:$0xff]   ;;  %v4679_v35 = vld [vmem:[%s7189_s3 + $0x8] sm:$0xff]   ;;  %v4681_v37 = vld [vmem:[%s7189_s3] sm:$0xff]   ;;  %v280_v3 = vadd.s32 8, %v5038_v56  ;;  %vm7202_vm5 = vcmp.lt.s32.totalorder %v5038_v56, 7  ;;  %vm7201_vm7 = vcmp.lt.s32.totalorder %v5038_v56, 1 }
  0x19   : > { %4407 = vmatpush3.bf16.msra.mxu0 %v947_v4  ;;  %4444 = vmatpush3.bf16.msra.mxu1 %v947_v4  ;;  %v4652_v6 = vld [vmem:[%s4907_s21] sm:$0xff]   ;;  %v4654_v8 = vld [vmem:[%s4907_s21 + $0x8] sm:$0xff]   ;;  %v4656_v10 = vld [vmem:[%s4907_s21 + $0x10] sm:$0xff]   ;;  %s4387_s9 = sshll.u32 %s4869_s28, 11  ;;  %s7146_s18 = scalar_lea.sflag [#allocation4], %s269_s29 }
  0x1a   : > { %4408 = vmatprep.subr.bf16.mxu0 %v4651_v5  ;;  %4443 = vmatprep.subr.bf16.mxu1 %v4651_v5  ;;  %v4653_v7 = vld [vmem:[%s4907_s21 + $0x60] sm:$0xff]   ;;  %v4655_v9 = vld [vmem:[%s4907_s21 + $0x68] sm:$0xff]   ;;  %v4657_v11 = vld [vmem:[%s4907_s21 + $0x70] sm:$0xff]   ;;  %s7139_s17 = scalar_lea.hbm %s7193_s7, %s4387_s9  ;;  %s4805_s28 = smov [#allocation3]  }
  0x1b   : > { %4410 = vmatprep.mubr.msk.bf16.mxu0 %vm893_vm2, %v4652_v6  ;;  %4434 = vmatprep.mubr.msk.bf16.mxu1 %vm893_vm2, %v4653_v7  ;;  %v4658_v12 = vld [vmem:[%s4907_s21 + $0x18] sm:$0xff]   ;;  %v4660_v14 = vld [vmem:[%s4907_s21 + $0x20] sm:$0xff]   ;;  %v4661_v15 = vld [vmem:[%s4907_s21 + $0x28] sm:$0xff]   ;;  %s4744_s20 = sshll.u32 %s4805_s28, 4  ;;  %s4745_s20 = int_to_ptr.vmem [resolvable:$false] %s4744_s20 }
  0x1c   : > { %v4659_v13 = vld [vmem:[%s4907_s21 + $0x78] sm:$0xff]   ;;  %v4662_v16 = vld [vmem:[%s4907_s21 + $0x30] sm:$0xff]   ;;  %v4664_v18 = vld [vmem:[%s4907_s21 + $0x40] sm:$0xff]  }
  0x1d   : > { %4409 = vmatpush3.bf16.msra.mxu0 %v4651_v5  ;;  %4445 = vmatpush3.bf16.msra.mxu1 %v4651_v5  ;;  %v4663_v17 = vld [vmem:[%s4907_s21 + $0x38] sm:$0xff]   ;;  %v4665_v19 = vld [vmem:[%s4907_s21 + $0x48] sm:$0xff]   ;;  %v4666_v20 = vld [vmem:[%s4907_s21 + $0x50] sm:$0xff]  }
  0x1e   : > { %v4667_v21 = vld [vmem:[%s4907_s21 + $0x58] sm:$0xff]   ;;  %1855 = vmatprep.subr.bf16.mxu1 %v7199_v24  ;;  %2108 = vmatprep.subr.bf16.mxu0 %v7199_v24  ;;  %v4682_v36 = vld [vmem:[%s7189_s3 + $0xc8] sm:$0xff]   ;;  %v4684_v38 = vld [vmem:[%s7189_s3 + $0xc0] sm:$0xff]   ;;  %s4746_s21 = scalar_lea.vmem %s4745_s20, 4096 }
  0x1f   : > { %v4683_v39 = vld [vmem:[%s7189_s3 + $0x58] sm:$0xff]   ;;  %v4685_v41 = vld [vmem:[%s7189_s3 + $0x50] sm:$0xff]   ;;  %v4687_v43 = vld [vmem:[%s7189_s3 + $0x48] sm:$0xff]  }
  0x20   : > { %4411 = vmatmul.mubr.msk.bf16.vlgmr.msra.gmra.mxu0 %vm893_vm2, %v4654_v8  ;;  %4435 = vmatmul.mubr.msk.bf16.vlgmr.msra.gmra.mxu1 %vm893_vm2, %v4655_v9  ;;  %v4686_v40 = vld [vmem:[%s7189_s3 + $0x118] sm:$0xff]   ;;  %v4688_v42 = vld [vmem:[%s7189_s3 + $0x110] sm:$0xff]   ;;  %v5030_v44 = vld [vmem:[%s7188_s2] ss:$0 sm:$0xff] }
  0x21   : > { %4414 = vmatprep.mubr.msk.bf16.mxu0 %vm893_vm2, %v4656_v10  ;;  %4438 = vmatprep.mubr.msk.bf16.mxu1 %vm893_vm2, %v4657_v11  ;;  %v4689_v63 = vld [vmem:[%s7189_s3 + $0x40] sm:$0xff]   ;;  %v4690_v0 = vld [vmem:[%s7189_s3 + $0x108] sm:$0xff]  }
  0x22   : > { %1856 = vmatpush1.bf16.msra.mxu1 %v4668_v22  ;;  %2109 = vmatpush1.bf16.msra.mxu0 %v4670_v23 }
  0x23   : > { %1857 = vmatprep.subr.bf16.mxu1 %v7199_v24  ;;  %2110 = vmatprep.subr.bf16.mxu0 %v7199_v24 }
  0x26   : > { %1858 = vmatpush1.bf16.msra.mxu1 %v4669_v25  ;;  %2111 = vmatpush1.bf16.msra.mxu0 %v4672_v26 }
  0x27   : > { %1859 = vmatprep.subr.bf16.mxu1 %v7199_v24  ;;  %2112 = vmatprep.subr.bf16.mxu0 %v7199_v24 }
  0x28   : > { %4415 = vmatmul.mubr.msk.bf16.gmra.mxu0 %vm893_vm2, %v4658_v12  ;;  %4439 = vmatmul.mubr.msk.bf16.gmra.mxu1 %vm893_vm2, %v4659_v13  ;;  %v322_v12 = vand.u32 15, %v280_v3  ;;  %v282_v13 = vadd.s32 24, %v5038_v56 }
  0x29   : > { %4418 = vmatprep.mubr.msk.bf16.mxu0 %vm893_vm2, %v4660_v14  ;;  %v4692_v14 = vld [vmem:[%s7189_s3 + $0x100] sm:$0xff]  }
  0x2a   : > { %1860 = vmatpush1.bf16.msra.mxu1 %v4671_v27  ;;  %2113 = vmatpush1.bf16.msra.mxu0 %v4674_v28  ;;  %vm5084_vm4 = vcmp.le.s32.totalorder %v322_v12, 14  ;;  %v336_v27 = vand.u32 15, %v282_v13 }
  0x2b   : > { %1861 = vmatprep.subr.bf16.mxu1 %v7199_v24  ;;  %2114 = vmatprep.subr.bf16.mxu0 %v7199_v24 }
  0x2c   : > { %vm5114_vm6 = vcmp.le.s32.totalorder %v336_v27, 14 }
  0x2e   : > { %1862 = vmatpush1.bf16.msra.mxu1 %v4673_v29  ;;  %2115 = vmatpush1.bf16.msra.mxu0 %v4676_v30 }
  0x2f   : > { %1863 = vmatprep.subr.bf16.mxu1 %v7199_v24  ;;  %2116 = vmatprep.subr.bf16.mxu0 %v7199_v24 }
  0x30   : > { %4419 = vmatmul.mubr.msk.bf16.gmra.mxu0 %vm893_vm2, %v4661_v15 }
  0x31   : > { %4422 = vmatprep.mubr.msk.bf16.mxu0 %vm893_vm2, %v4662_v16 }
  0x32   : > { %1864 = vmatpush1.bf16.msra.mxu1 %v4675_v31  ;;  %2117 = vmatpush1.bf16.msra.mxu0 %v4678_v32 }
  0x33   : > { %1865 = vmatprep.subr.bf16.mxu1 %v7199_v24  ;;  %2118 = vmatprep.subr.bf16.mxu0 %v7199_v24 }
  0x36   : > { %1866 = vmatpush1.bf16.msra.mxu1 %v4677_v33  ;;  %2119 = vmatpush1.bf16.msra.mxu0 %v4680_v34 }
  0x37   : > { %1867 = vmatprep.subr.bf16.mxu1 %v7199_v24  ;;  %2120 = vmatprep.subr.bf16.mxu0 %v7199_v24 }
  0x38   : > { %4423 = vmatmul.mubr.msk.bf16.gmra.mxu0 %vm893_vm2, %v4663_v17 }
  0x39   : > { %4426 = vmatprep.mubr.msk.bf16.mxu0 %vm893_vm2, %v4664_v18 }
  0x3a   : > { %1868 = vmatpush1.bf16.msra.mxu1 %v4679_v35  ;;  %2121 = vmatpush1.bf16.msra.mxu0 %v4682_v36 }
  0x3b   : > { %1869 = vmatprep.subr.bf16.mxu1 %v7199_v24  ;;  %2122 = vmatprep.subr.bf16.mxu0 %v7199_v24 }
  0x3e   : > { %1870 = vmatpush1.bf16.msra.mxu1 %v4681_v37  ;;  %2123 = vmatpush1.bf16.msra.mxu0 %v4684_v38 }
  0x3f   : > { %1879 = vmatprep.subr.bf16.mxu1 %v7199_v24  ;;  %2132 = vmatprep.subr.bf16.mxu0 %v7199_v24 }
  0x40   : > { %4427 = vmatmul.mubr.msk.bf16.gmra.mxu0 %vm893_vm2, %v4665_v19 }
  0x41   : > { %4430 = vmatprep.mubr.msk.bf16.mxu0 %vm893_vm2, %v4666_v20 }
  0x42   : > { %1880 = vmatpush2.bf16.msra.mxu1 %v4683_v39  ;;  %2133 = vmatpush2.bf16.msra.mxu0 %v4686_v40 }
  0x43   : > { %1881 = vmatprep.subr.bf16.mxu1 %v7199_v24  ;;  %2134 = vmatprep.subr.bf16.mxu0 %v7199_v24 }
  0x46   : > { %1882 = vmatpush2.bf16.msra.mxu1 %v4685_v41  ;;  %2135 = vmatpush2.bf16.msra.mxu0 %v4688_v42 }
  0x47   : > { %1883 = vmatprep.subr.bf16.mxu1 %v7199_v24  ;;  %2136 = vmatprep.subr.bf16.mxu0 %v7199_v24 }
  0x48   : > { %4431 = vmatmul.mubr.msk.bf16.gmra.mxu0 %vm893_vm2, %v4667_v21 }
  0x4a   : > { %1884 = vmatpush2.bf16.msra.mxu1 %v4687_v43  ;;  %2137 = vmatpush2.bf16.msra.mxu0 %v4690_v0 }
  0x4b   : > { %1885 = vmatprep.subr.bf16.mxu1 %v7199_v24  ;;  %2138 = vmatprep.subr.bf16.mxu0 %v7199_v24 }
  0x4e   : > { %1886 = vmatpush2.bf16.msra.mxu1 %v4689_v63  ;;  %2139 = vmatpush2.bf16.msra.mxu0 %v4692_v14 }
  0x4f   : > { %2333 = vmatprep.subr.bf16.mxu1 %v7199_v24  ;;  %3211 = vmatprep.subr.bf16.mxu0 %v7199_v24 }
  0xe0   : > { %v4412_v45 = vpop.f32.mrf.mxu0  ;;  %v4436_v46 = vpop.f32.mrf.mxu1 }
  0xe1   : > { %v992_v48 = vadd.f32 %v4412_v45, %v5030_v44  ;;  %v1088_v49 = vadd.f32 %v4436_v46, %v5030_v44 }
  0xe2   : > { %v983_v50 = vpop.f32.mrf.mxu0  ;;  %v1079_v51 = vpop.f32.mrf.mxu1 }
  0xe3   : > { %1113 = vst.msk [vmem:[#allocation2 + $0x10] sm:$0xff] %vm7235_vm3, %v992_v48  ;;  %1137 = vst.msk [vmem:[#allocation2 + $0xd0] sm:$0xff] %vm7235_vm3, %v1088_v49  ;;  %v984_v52 = vadd.f32 %v5030_v44, %v983_v50  ;;  %v1080_v53 = vadd.f32 %v5030_v44, %v1079_v51 }
  0xe4   : > { %v4413_v54 = vpop.f32.mrf.mxu0  ;;  %v4437_v55 = vpop.f32.mrf.mxu1 }
  0xe5   : > { %1111 = vst.msk [vmem:[#allocation2] sm:$0xff] %vm7235_vm3, %v984_v52  ;;  %1135 = vst.msk [vmem:[#allocation2 + $0xc0] sm:$0xff] %vm7235_vm3, %v1080_v53  ;;  %v995_v57 = vadd.f32 %v4413_v54, %v5030_v44  ;;  %v1091_v58 = vadd.f32 %v4437_v55, %v5030_v44 }
  0xe6   : > { %v986_v59 = vpop.f32.mrf.mxu0  ;;  %v1082_v60 = vpop.f32.mrf.mxu1 }
  0xe7   : > { %1114 = vst.msk [vmem:[#allocation2 + $0x18] sm:$0xff] %vm7235_vm3, %v995_v57  ;;  %1138 = vst.msk [vmem:[#allocation2 + $0xd8] sm:$0xff] %vm7235_vm3, %v1091_v58  ;;  %v987_v61 = vadd.f32 %v5030_v44, %v986_v59  ;;  %v1083_v62 = vadd.f32 %v5030_v44, %v1082_v60 }
  0xe8   : > { %v4416_v1 = vpop.f32.mrf.mxu0  ;;  %v4440_v2 = vpop.f32.mrf.mxu1 }
  0xe9   : > { %1112 = vst.msk [vmem:[#allocation2 + $0x8] sm:$0xff] %vm7235_vm3, %v987_v61  ;;  %1136 = vst.msk [vmem:[#allocation2 + $0xc8] sm:$0xff] %vm7235_vm3, %v1083_v62  ;;  %v1008_v4 = vadd.f32 %v4416_v1, %v5030_v44  ;;  %v1104_v5 = vadd.f32 %v4440_v2, %v5030_v44 }
  0xea   : > { %v999_v6 = vpop.f32.mrf.mxu0  ;;  %v1095_v7 = vpop.f32.mrf.mxu1  ;;  %v5073_v17 = vld [vmem:[#allocation2 + $0x10] sm:$0xff] }
  0xeb   : > { %1117 = vst.msk [vmem:[#allocation2 + $0x30] sm:$0xff] %vm7235_vm3, %v1008_v4  ;;  %1141 = vst.msk [vmem:[#allocation2 + $0xf0] sm:$0xff] %vm7235_vm3, %v1104_v5  ;;  %v1000_v8 = vadd.f32 %v5030_v44, %v999_v6  ;;  %v1096_v9 = vadd.f32 %v5030_v44, %v1095_v7  ;;  %v1338_v25 = vrot.slane %v5073_v17, 1 }
  0xec   : > { %v4417_v10 = vpop.f32.mrf.mxu0  ;;  %v4441_v11 = vpop.f32.mrf.mxu1  ;;  %v5075_v19 = vld [vmem:[#allocation2] sm:$0xff] }
  0xed   : > { %1115 = vst.msk [vmem:[#allocation2 + $0x20] sm:$0xff] %vm7235_vm3, %v1000_v8  ;;  %1139 = vst.msk [vmem:[#allocation2 + $0xe0] sm:$0xff] %vm7235_vm3, %v1096_v9  ;;  %v1011_v15 = vadd.f32 %v4417_v10, %v5030_v44  ;;  %v1107_v16 = vadd.f32 %v4441_v11, %v5030_v44  ;;  %v7195_v32 = vrot.slane %v5075_v19, 1 }
  0xee   : > { %v1002_v18 = vpop.f32.mrf.mxu0  ;;  %v1098_v20 = vpop.f32.mrf.mxu1  ;;  %v5095_v33 = vld [vmem:[#allocation2 + $0x18] sm:$0xff] }
  0xef   : > { %1118 = vst.msk [vmem:[#allocation2 + $0x38] sm:$0xff] %vm7235_vm3, %v1011_v15  ;;  %1142 = vst.msk [vmem:[#allocation2 + $0xf8] sm:$0xff] %vm7235_vm3, %v1107_v16  ;;  %v1003_v21 = vadd.f32 %v5030_v44, %v1002_v18  ;;  %v1099_v28 = vadd.f32 %v5030_v44, %v1098_v20  ;;  %v4495_v39 = vpack.i.bf16 %v5095_v33, %v5073_v17  ;;  %v1339_v45 = vrot.slane %v5095_v33, 1 }
  0xf0   : > { %v4420_v22 = vpop.f32.mrf.mxu0  ;;  %v5081_v23 = vld [vmem:[#allocation2 + $0x8] sm:$0xff] }
  0xf1   : > { %1116 = vst.msk [vmem:[#allocation2 + $0x28] sm:$0xff] %vm7235_vm3, %v1003_v21  ;;  %v1024_v29 = vadd.f32 %v4420_v22, %v5030_v44  ;;  %v1337_v30 = vrot.slane %v5081_v23, 1  ;;  %v4490_v31 = vpack.i.bf16 %v5081_v23, %v5075_v19  ;;  %1140 = vst.msk [vmem:[#allocation2 + $0xe8] sm:$0xff] %vm7235_vm3, %v1099_v28  ;;  %v1397_v57 = vsel %vm7202_vm5, %v1338_v25, %v1339_v45 }
  0xf2   : > { %v1015_v34 = vpop.f32.mrf.mxu0  ;;  %v5145_v60 = vld [vmem:[#allocation2 + $0x30] sm:$0xff] }
  0xf3   : > { %1121 = vst.msk [vmem:[#allocation2 + $0x50] sm:$0xff] %vm7235_vm3, %v1024_v29  ;;  %v1016_v35 = vadd.f32 %v5030_v44, %v1015_v34  ;;  %4491 = vrot.lane.b32.xlu0 %v4490_v31, %s4804_s16  ;;  %v1398_v36 = vsel %vm7202_vm5, %v1337_v30, %v1338_v25  ;;  %v1399_v37 = vsel %vm7202_vm5, %v7195_v32, %v1337_v30 }
  0xf4   : > { %v4421_v38 = vpop.f32.mrf.mxu0  ;;  %v1466_v40 = vsel %vm5084_vm4, %v1398_v36, 0.0  ;;  %v5112_v41 = vld [vmem:[#allocation2 + $0x20] sm:$0xff] }
  0xf5   : > { %1119 = vst.msk [vmem:[#allocation2 + $0x40] sm:$0xff] %vm7235_vm3, %v1016_v35  ;;  %v1027_v43 = vadd.f32 %v4421_v38, %v5030_v44  ;;  %v5121_v46 = vpack.c.bf16 %v1466_v40, %v1399_v37  ;;  %v1340_v47 = vrot.slane %v5112_v41, 1 }
  0xf6   : > { %v1018_v48 = vpop.f32.mrf.mxu0  ;;  %v5147_v61 = vld [vmem:[#allocation2 + $0x38] sm:$0xff] }
  0xf7   : > { %1122 = vst.msk [vmem:[#allocation2 + $0x58] sm:$0xff] %vm7235_vm3, %v1027_v43  ;;  %v1019_v49 = vadd.f32 %v5030_v44, %v1018_v48  ;;  %4496 = vrot.lane.b32.xlu0 %v4495_v39, %s4804_s16  ;;  %4155 = vmatprep.mubr.msk.bf16.mxu1 %vm7235_vm3, %v5121_v46  ;;  %v1396_v50 = vsel %vm7202_vm5, %v1339_v45, %v1340_v47 }
  0xf8   : > { %v4424_v51 = vpop.f32.mrf.mxu0  ;;  %v5133_v52 = vld [vmem:[#allocation2 + $0x28] sm:$0xff]  ;;  %v1468_v53 = vsel %vm5114_vm6, %v1396_v50, 0.0  ;;  %v4505_v2 = vpack.i.bf16 %v5147_v61, %v5145_v60 }
  0xf9   : > { %1120 = vst.msk [vmem:[#allocation2 + $0x48] sm:$0xff] %vm7235_vm3, %v1019_v49  ;;  %v1040_v54 = vadd.f32 %v4424_v51, %v5030_v44  ;;  %v4500_v55 = vpack.i.bf16 %v5133_v52, %v5112_v41  ;;  %v5143_v59 = vpack.c.bf16 %v1468_v53, %v1397_v57  ;;  %v5222_v51 = vld [vmem:[#allocation2 + $0xd0] sm:$0xff] }
  0xfa   : > { %v1031_v58 = vpop.f32.mrf.mxu0  ;;  %v5154_v0 = vld [vmem:[#allocation2 + $0x50] sm:$0xff] }
  0xfb   : > { %1125 = vst.msk [vmem:[#allocation2 + $0x70] sm:$0xff] %vm7235_vm3, %v1040_v54  ;;  %v1032_v62 = vadd.f32 %v5030_v44, %v1031_v58  ;;  %4501 = vrot.lane.b32.xlu1 %v4500_v55, %s4804_s16  ;;  %4206 = vmatprep.mubr.msk.bf16.mxu0 %vm7235_vm3, %v5143_v59  ;;  %v5228_v54 = vld [vmem:[#allocation2 + $0xd8] sm:$0xff]  ;;  %v5234_v58 = vld [vmem:[#allocation2 + $0xc0] sm:$0xff]  ;;  %v1185_v32 = vrot.slane %v5154_v0, 7 }
  0xfc   : > { %v4425_v63 = vpop.f32.mrf.mxu0  ;;  %v5167_v8 = vld [vmem:[#allocation2 + $0x40] sm:$0xff] }
  0xfd   : > { %1123 = vst.msk [vmem:[#allocation2 + $0x60] sm:$0xff] %vm7235_vm3, %v1032_v62  ;;  %v1043_v1 = vadd.f32 %v4425_v63, %v5030_v44  ;;  %v5236_v62 = vld [vmem:[#allocation2 + $0xc8] sm:$0xff] }
  0xfe   : > { %v1034_v3 = vpop.f32.mrf.mxu0  ;;  %v5160_v4 = vld [vmem:[#allocation2 + $0x58] sm:$0xff] }
  0xff   : > { %1126 = vst.msk [vmem:[#allocation2 + $0x78] sm:$0xff] %vm7235_vm3, %v1043_v1  ;;  %v1035_v5 = vadd.f32 %v5030_v44, %v1034_v3  ;;  %4506 = vrot.lane.b32.xlu1 %v4505_v2, %s4804_s16  ;;  %v4515_v6 = vpack.i.bf16 %v5160_v4, %v5154_v0  ;;  %v4555_v1 = vpack.i.bf16 %v5228_v54, %v5222_v51  ;;  %v5246_v3 = vld [vmem:[#allocation2 + $0xf0] sm:$0xff] }
 0x100   : > { %v4428_v7 = vpop.f32.mrf.mxu0  ;;  %v5169_v9 = vld [vmem:[#allocation2 + $0x48] sm:$0xff]  ;;  %v4550_v2 = vpack.i.bf16 %v5236_v62, %v5234_v58 }
 0x101   : > { %1124 = vst.msk [vmem:[#allocation2 + $0x68] sm:$0xff] %vm7235_vm3, %v1035_v5  ;;  %v1056_v10 = vadd.f32 %v4428_v7, %v5030_v44  ;;  %v4510_v11 = vpack.i.bf16 %v5169_v9, %v5167_v8  ;;  %v5248_v5 = vld [vmem:[#allocation2 + $0xf8] sm:$0xff]  ;;  %v5252_v7 = vld [vmem:[#allocation2 + $0xe8] sm:$0xff] }
 0x102   : > { %v1047_v12 = vpop.f32.mrf.mxu0  ;;  %v5179_v15 = vld [vmem:[#allocation2 + $0x70] sm:$0xff] }
 0x103   : > { %1129 = vst.msk [vmem:[#allocation2 + $0x90] sm:$0xff] %vm7235_vm3, %v1056_v10  ;;  %v1048_v13 = vadd.f32 %v5030_v44, %v1047_v12  ;;  %4516 = vrot.lane.b32.xlu1 %v4515_v6, %s4804_s16  ;;  %4511 = vrot.lane.b32.xlu0 %v4510_v11, %s4804_s16  ;;  %v5250_v6 = vld [vmem:[#allocation2 + $0xe0] sm:$0xff]  ;;  %v4565_v10 = vpack.i.bf16 %v5248_v5, %v5246_v3  ;;  %v281_v12 = vadd.s32 16, %v5038_v56 }
 0x104   : > { %v4429_v14 = vpop.f32.mrf.mxu0  ;;  %v5185_v21 = vld [vmem:[#allocation2 + $0x60] sm:$0xff]  ;;  %v4560_v11 = vpack.i.bf16 %v5252_v7, %v5250_v6 }
 0x105   : > { %1127 = vst.msk [vmem:[#allocation2 + $0x80] sm:$0xff] %vm7235_vm3, %v1048_v13  ;;  %v1059_v16 = vadd.f32 %v4429_v14, %v5030_v44  ;;  %v284_v13 = vadd.s32 40, %v5038_v56  ;;  %v7194_v14 = vrot.slane %v5248_v5, 7 }
 0x106   : > { %v1050_v18 = vpop.f32.mrf.mxu0  ;;  %v5183_v20 = vld [vmem:[#allocation2 + $0x78] sm:$0xff] }
 0x107   : > { %1130 = vst.msk [vmem:[#allocation2 + $0x98] sm:$0xff] %vm7235_vm3, %v1059_v16  ;;  %v1051_v22 = vadd.f32 %v5030_v44, %v1050_v18  ;;  %v4525_v25 = vpack.i.bf16 %v5183_v20, %v5179_v15  ;;  %v315_v16 = vand.u32 15, %v5038_v56  ;;  %v329_v18 = vand.u32 15, %v281_v12 }
 0x108   : > { %v4432_v27 = vpop.f32.mrf.mxu0  ;;  %v5191_v28 = vld [vmem:[#allocation2 + $0x68] sm:$0xff] }
 0x109   : > { %1128 = vst.msk [vmem:[#allocation2 + $0x88] sm:$0xff] %vm7235_vm3, %v1051_v22  ;;  %v1072_v29 = vadd.f32 %v4432_v27, %v5030_v44  ;;  %4526 = vrot.lane.b32.xlu1 %v4525_v25, %s4804_s16  ;;  %v4520_v30 = vpack.i.bf16 %v5191_v28, %v5185_v21  ;;  %v283_v22 = vadd.s32 32, %v5038_v56  ;;  %v1175_v25 = vrot.slane %v5075_v19, 7 }
 0x10a   : > { %v1063_v31 = vpop.f32.mrf.mxu0  ;;  %v5201_v36 = vld [vmem:[#allocation2 + $0x90] sm:$0xff]  ;;  %v350_v27 = vand.u32 15, %v284_v13  ;;  %vm5272_vm8 = vcmp.ge.s32.totalorder %v315_v16, 1  ;;  %vm5280_vm9 = vcmp.ge.s32.totalorder %v329_v18, 1  ;;  %v4691_v13 = vld [vmem:[%s7189_s3 + $0x98] sm:$0xff]  }
 0x10b   : > { %1133 = vst.msk [vmem:[#allocation2 + $0xb0] sm:$0xff] %vm7235_vm3, %v1072_v29  ;;  %v1064_v34 = vadd.f32 %v5030_v44, %v1063_v31  ;;  %4521 = vrot.lane.b32.xlu0 %v4520_v30, %s4804_s16  ;;  %v1176_v29 = vrot.slane %v5081_v23, 7  ;;  %v1341_v30 = vrot.slane %v5133_v52, 1  ;;  %v1342_v31 = vrot.slane %v5145_v60, 1 }
 0x10c   : > { %v4433_v35 = vpop.f32.mrf.mxu0  ;;  %v5207_v40 = vld [vmem:[#allocation2 + $0x80] sm:$0xff]  ;;  %v343_v23 = vand.u32 15, %v283_v22  ;;  %vm5285_vm10 = vcmp.le.s32.totalorder %v350_v27, 14  ;;  %v1179_v22 = vrot.slane %v5112_v41, 7  ;;  %v4693_v41 = vld [vmem:[%s7189_s3 + $0x90] sm:$0xff]  }
 0x10d   : > { %1131 = vst.msk [vmem:[#allocation2 + $0xa0] sm:$0xff] %vm7235_vm3, %v1064_v34  ;;  %v1075_v37 = vadd.f32 %v4433_v35, %v5030_v44  ;;  %v7258_v34 = vmov 0  ;;  %v1239_v35 = vsel %vm7201_vm7, %v7194_v14, %v1175_v25 }
 0x10e   : > { %v1066_v38 = vpop.f32.mrf.mxu0  ;;  %v5205_v39 = vld [vmem:[#allocation2 + $0x98] sm:$0xff]  ;;  %v7259_v34 = vsel %vm5272_vm8, 4294967295, %v7258_v34  ;;  %vm5309_vm11 = vcmp.ge.s32.totalorder %v343_v23, 1  ;;  %v1344_v23 = vrot.slane %v5167_v8, 1 }
 0x10f   : > { %1134 = vst.msk [vmem:[#allocation2 + $0xb8] sm:$0xff] %vm7235_vm3, %v1075_v37  ;;  %v1067_v43 = vadd.f32 %v5030_v44, %v1066_v38  ;;  %v4535_v45 = vpack.i.bf16 %v5205_v39, %v5201_v36  ;;  %7260 = vst [vmem:[#allocation6_spill] sm:$0xff] %v7259_v34  ;;  %v7261_v38 = vmov 0 }
 0x110   : > { %v5213_v48 = vld [vmem:[#allocation2 + $0x88] sm:$0xff]  ;;  %v7262_v38 = vsel %vm5280_vm9, 4294967295, %v7261_v38 }
 0x111   : > { %1132 = vst.msk [vmem:[#allocation2 + $0xa8] sm:$0xff] %vm7235_vm3, %v1067_v43  ;;  %4536 = vrot.lane.b32.xlu1 %v4535_v45, %s4804_s16  ;;  %v4530_v49 = vpack.i.bf16 %v5213_v48, %v5207_v40  ;;  %7263 = vst [vmem:[#allocation7_spill] sm:$0xff] %v7262_v38  ;;  %v1177_v43 = vrot.slane %v5073_v17, 7 }
 0x112   : > { %v5220_v50 = vld [vmem:[#allocation2 + $0xb0] sm:$0xff] }
 0x113   : > { %4531 = vrot.lane.b32.xlu0 %v4530_v49, %s4804_s16  ;;  %v1237_v12 = vsel %vm7201_vm7, %v1176_v29, %v1177_v43 }
 0x114   : > { %v5226_v44 = vld [vmem:[#allocation2 + $0xa0] sm:$0xff] }
 0x116   : > { %v5224_v53 = vld [vmem:[#allocation2 + $0xb8] sm:$0xff] }
 0x117   : > { %v4545_v55 = vpack.i.bf16 %v5224_v53, %v5220_v50 }
 0x118   : > { %v5232_v57 = vld [vmem:[#allocation2 + $0xa8] sm:$0xff] }
 0x119   : > { %4546 = vrot.lane.b32.xlu1 %v4545_v55, %s4804_s16  ;;  %v4540_v63 = vpack.i.bf16 %v5232_v57, %v5226_v44 }
 0x11b   : > { %4541 = vrot.lane.b32.xlu0 %v4540_v63, %s4804_s16  ;;  %v1178_v63 = vrot.slane %v5095_v33, 7  ;;  %v1394_v33 = vsel %vm7202_vm5, %v1341_v30, %v1342_v31 }
 0x11d   : > { %4556 = vrot.lane.b32.xlu1 %v4555_v1, %s4804_s16  ;;  %v1238_v1 = vsel %vm7201_vm7, %v1175_v25, %v1176_v29  ;;  %v1236_v29 = vsel %vm7201_vm7, %v1177_v43, %v1178_v63 }
 0x11f   : > { %4551 = vrot.lane.b32.xlu0 %v4550_v2, %s4804_s16  ;;  %v1304_v2 = vsel %vm5272_vm8, %v1239_v35, 0.0  ;;  %v7266_v35 = vmov 0 }
 0x120   : > { %v7267_v35 = vsel %vm5309_vm11, 4294967295, %v7266_v35 }
 0x121   : > { %4566 = vrot.lane.b32.xlu1 %v4565_v10, %s4804_s16  ;;  %v286_v10 = vadd.s32 56, %v5038_v56  ;;  %7268 = vst [vmem:[#allocation8_spill] sm:$0xff] %v7267_v35 }
 0x123   : > { %4561 = vrot.lane.b32.xlu0 %v4560_v11, %s4804_s16  ;;  %v364_v43 = vand.u32 15, %v286_v10 }
 0x125   : > { %vm5345_vm12 = vcmp.le.s32.totalorder %v364_v43, 14 }
 0x165   : > { %v4492_v37 = vpop.permute.xlu0 %4491 }
 0x166   : > { %v4494_v45 = vunpack.i.h.bf16 %v4492_v37  ;;  %v4493_v49 = vunpack.i.l.bf16 %v4492_v37  ;;  %v1306_v37 = vsel %vm5280_vm9, %v1237_v12, 0.0  ;;  %v285_v12 = vadd.s32 48, %v5038_v56 }
 0x168   : > { %v1625_v11 = vsel %vm7235_vm3, %v1304_v2, %v4493_v49  ;;  %v1626_v17 = vsel %vm7235_vm3, %v1238_v1, %v4494_v45  ;;  %v1395_v45 = vsel %vm7202_vm5, %v1340_v47, %v1341_v30  ;;  %v1470_v49 = vsel %vm5285_vm10, %v1394_v33, 0.0 }
 0x169   : > { %v5306_v16 = vpack.c.bf16 %v1626_v17, %v1625_v11  ;;  %v4497_v18 = vpop.permute.xlu0 %4496  ;;  %v1180_v47 = vrot.slane %v5133_v52, 7  ;;  %v1343_v30 = vrot.slane %v5147_v61, 1 }
 0x16a   : > { %v4499_v25 = vunpack.i.h.bf16 %v4497_v18  ;;  %v4498_v27 = vunpack.i.l.bf16 %v4497_v18  ;;  %v5338_v18 = vpack.c.bf16 %v1470_v49, %v1395_v45  ;;  %v357_v45 = vand.u32 15, %v285_v12 }
 0x16b   : > { %1888 = vmatmul.mubr.bf16.vlgmr.msra.gmra.mxu1 %v5306_v16  ;;  %v1392_v10 = vsel %vm7202_vm5, %v1343_v30, %v1344_v23 }
 0x16c   : > { %v1628_v1 = vsel %vm7235_vm3, %v1236_v29, %v4499_v25  ;;  %v1627_v2 = vsel %vm7235_vm3, %v1306_v37, %v4498_v27  ;;  %2334 = vmatpush1.bf16.msra.mxu1 %v4691_v13  ;;  %4156 = vmatprep.mubr.msk.bf16.mxu1 %vm7235_vm3, %v5143_v59  ;;  %v1235_v25 = vsel %vm7201_vm7, %v1178_v63, %v1179_v22  ;;  %v4694_v27 = vld [vmem:[%s7189_s3 + $0x88] sm:$0xff]   ;;  %v288_v63 = vadd.s32 72, %v5038_v56 }
 0x16d   : > { %v5334_v11 = vpack.c.bf16 %v1628_v1, %v1627_v2  ;;  %v4502_v17 = vpop.permute.xlu1 %4501  ;;  %2335 = vmatprep.subr.bf16.mxu1 %v7199_v24  ;;  %v1234_v29 = vsel %vm7201_vm7, %v1179_v22, %v1180_v47  ;;  %v1308_v37 = vsel %vm5309_vm11, %v1235_v25, 0.0  ;;  %v1181_v2 = vrot.slane %v5145_v60, 7 }
 0x16e   : > { %v4504_v13 = vunpack.i.h.bf16 %v4502_v17  ;;  %v4503_v33 = vunpack.i.l.bf16 %v4502_v17  ;;  %v1472_v43 = vsel %vm5345_vm12, %v1392_v10, 0.0  ;;  %v1346_v22 = vrot.slane %v5154_v0, 1 }
 0x16f   : > { %2141 = vmatmul.mubr.bf16.vlgmr.msra.gmra.mxu0 %v5334_v11  ;;  %v1345_v17 = vrot.slane %v5169_v9, 1  ;;  %v378_v12 = vand.u32 15, %v288_v63  ;;  %v1393_v10 = vsel %vm7202_vm5, %v1342_v31, %v1343_v30  ;;  %vm5382_vm13 = vcmp.ge.s32.totalorder %v357_v45, 1 }
 0x170   : > { %4207 = vmatprep.mubr.msk.bf16.mxu0 %vm7235_vm3, %v5338_v18  ;;  %2336 = vmatpush1.bf16.msra.mxu1 %v4693_v41  ;;  %v1629_v49 = vsel %vm7235_vm3, %v1308_v37, %v4503_v33  ;;  %v1630_v1 = vsel %vm7235_vm3, %v1234_v29, %v4504_v13  ;;  %v287_v33 = vadd.s32 64, %v5038_v56  ;;  %v4695_v13 = vld [vmem:[%s7189_s3 + $0x80] sm:$0xff]   ;;  %v7271_v29 = vmov 0 }
 0x171   : > { %2337 = vmatprep.subr.bf16.mxu1 %v7199_v24  ;;  %v4507_v41 = vpop.permute.xlu1 %4506  ;;  %v5376_v25 = vpack.c.bf16 %v1630_v1, %v1629_v49  ;;  %v7272_v29 = vsel %vm5382_vm13, 4294967295, %v7271_v29  ;;  %v5388_v14 = vpack.c.bf16 %v1472_v43, %v1393_v10  ;;  %v1233_v49 = vsel %vm7201_vm7, %v1180_v47, %v1181_v2  ;;  %v4696_v47 = vld [vmem:[%s7189_s3 + $0x78] sm:$0xff]  }
 0x172   : > { %7273 = vst [vmem:[#allocation9_spill] sm:$0xff] %v7272_v29  ;;  %v4509_v63 = vunpack.i.h.bf16 %v4507_v41  ;;  %v4508_v37 = vunpack.i.l.bf16 %v4507_v41  ;;  %vm5395_vm14 = vcmp.le.s32.totalorder %v378_v12, 14  ;;  %v290_v31 = vadd.s32 88, %v5038_v56 }
 0x173   : > { %1896 = vmatmul.mubr.bf16.gmra.mxu1 %v5334_v11  ;;  %v1310_v45 = vsel %vm5382_vm13, %v1233_v49, 0.0  ;;  %v371_v1 = vand.u32 15, %v287_v33  ;;  %v1183_v12 = vrot.slane %v5167_v8, 7  ;;  %v1347_v33 = vrot.slane %v5160_v4, 1 }
 0x174   : > { %4157 = vmatprep.mubr.msk.bf16.mxu1 %vm7235_vm3, %v5338_v18  ;;  %2338 = vmatpush1.bf16.msra.mxu1 %v4694_v27  ;;  %v1182_v27 = vrot.slane %v5147_v61, 7  ;;  %v1390_v61 = vsel %vm7202_vm5, %v1345_v17, %v1346_v22  ;;  %v1631_v41 = vsel %vm7235_vm3, %v1310_v45, %v4508_v37  ;;  %v7196_v49 = vrot.slane %v5185_v21, 1  ;;  %v4697_v37 = vld [vmem:[%s7189_s3 + $0x70] sm:$0xff]  }
 0x175   : > { %2339 = vmatprep.subr.bf16.mxu1 %v7199_v24  ;;  %v1474_v10 = vsel %vm5395_vm14, %v1390_v61, 0.0  ;;  %vm5431_vm15 = vcmp.ge.s32.totalorder %v371_v1, 1  ;;  %v289_v61 = vadd.s32 80, %v5038_v56  ;;  %v7297_v29 = vrot.slane %v5179_v15, 1 }
 0x176   : > { %v1232_v30 = vsel %vm7201_vm7, %v1181_v2, %v1182_v27  ;;  %v1391_v2 = vsel %vm7202_vm5, %v1344_v23, %v1345_v17  ;;  %v7276_v23 = vmov 0  ;;  %v1184_v17 = vrot.slane %v5169_v9, 7 }
 0x177   : > { %2149 = vmatmul.mubr.bf16.gmra.mxu0 %v5376_v25  ;;  %v1632_v43 = vsel %vm7235_vm3, %v1232_v30, %v4509_v63  ;;  %v392_v63 = vand.u32 15, %v290_v31  ;;  %v7277_v23 = vsel %vm5431_vm15, 4294967295, %v7276_v23  ;;  %v5438_v31 = vpack.c.bf16 %v1474_v10, %v1391_v2 }
 0x178   : > { %4208 = vmatprep.mubr.msk.bf16.mxu0 %vm7235_vm3, %v5388_v14  ;;  %2340 = vmatpush1.bf16.msra.mxu1 %v4695_v13  ;;  %v4512_v13 = vpop.permute.xlu0 %4511  ;;  %v5429_v8 = vpack.c.bf16 %v1632_v43, %v1631_v41  ;;  %7278 = vst [vmem:[#allocation10_spill] sm:$0xff] %v7277_v23  ;;  %v1388_v9 = vsel %vm7202_vm5, %v1347_v33, %v7196_v49  ;;  %v292_v41 = vadd.s32 104, %v5038_v56  ;;  %v385_v2 = vand.u32 15, %v289_v61 }
 0x179   : > { %2341 = vmatprep.subr.bf16.mxu1 %v7199_v24  ;;  %v4514_v30 = vunpack.i.h.bf16 %v4512_v13  ;;  %v4513_v45 = vunpack.i.l.bf16 %v4512_v13  ;;  %vm5445_vm0 = vcmp.le.s32.totalorder %v392_v63, 14  ;;  %v1230_v43 = vsel %vm7201_vm7, %v1183_v12, %v1184_v17 }
 0x17a   : > { %v7197_v61 = vrot.slane %v5179_v15, 1  ;;  %v1349_v49 = vrot.slane %v5191_v28, 1  ;;  %vm5481_vm1 = vcmp.ge.s32.totalorder %v385_v2, 1  ;;  %v7286_v23 = vrot.slane %v5185_v21, 1 }
 0x17b   : > { %1904 = vmatmul.mubr.bf16.gmra.mxu1 %v5376_v25  ;;  %v1634_v63 = vsel %vm7235_vm3, %v1230_v43, %v4514_v30  ;;  %v406_v30 = vand.u32 15, %v292_v41  ;;  %vm7305_vm13 = vcmp.lt.s32.totalorder %v5038_v56, 7 }
 0x17c   : > { %4158 = vmatprep.mubr.msk.bf16.mxu1 %vm7235_vm3, %v5388_v14  ;;  %2342 = vmatpush1.bf16.msra.mxu1 %v4696_v47  ;;  %v1231_v47 = vsel %vm7201_vm7, %v1182_v27, %v1183_v12  ;;  %v4698_v27 = vld [vmem:[%s7189_s3 + $0x68] sm:$0xff]   ;;  %v1389_v12 = vsel %vm7202_vm5, %v1346_v22, %v1347_v33  ;;  %v7281_v22 = vmov 0  ;;  %v1186_v33 = vrot.slane %v5160_v4, 7 }
 0x17d   : > { %2343 = vmatprep.subr.bf16.mxu1 %v7199_v24  ;;  %v1312_v13 = vsel %vm5431_vm15, %v1231_v47, 0.0  ;;  %v1476_v47 = vsel %vm5445_vm0, %v1388_v9, 0.0  ;;  %v7282_v22 = vsel %vm5481_vm1, 4294967295, %v7281_v22  ;;  %v291_v9 = vadd.s32 96, %v5038_v56 }
 0x17e   : > { %v1633_v10 = vsel %vm7235_vm3, %v1312_v13, %v4513_v45  ;;  %v4699_v45 = vld [vmem:[%s7189_s3 + $0x60] sm:$0xff]   ;;  %7283 = vst [vmem:[#allocation11_spill] sm:$0xff] %v7282_v22  ;;  %v5488_v41 = vpack.c.bf16 %v1476_v47, %v1389_v12  ;;  %vm5495_vm2 = vcmp.le.s32.totalorder %v406_v30, 14  ;;  %v1386_v4 = vsel %vm7202_vm5, %v1349_v49, %v7197_v61 }
 0x17f   : > { %2157 = vmatmul.mubr.bf16.gmra.mxu0 %v5429_v8  ;;  %v5479_v0 = vpack.c.bf16 %v1634_v63, %v1633_v10  ;;  %v294_v10 = vadd.s32 120, %v5038_v56  ;;  %v1228_v63 = vsel %vm7201_vm7, %v1185_v32, %v1186_v33  ;;  %v399_v12 = vand.u32 15, %v291_v9 }
 0x180   : > { %4209 = vmatprep.mubr.msk.bf16.mxu0 %vm7235_vm3, %v5438_v31  ;;  %2344 = vmatpush1.bf16.msra.mxu1 %v4697_v37  ;;  %v4517_v37 = vpop.permute.xlu1 %4516  ;;  %v1187_v61 = vrot.slane %v5185_v21, 7  ;;  %v1351_v9 = vrot.slane %v5183_v20, 1  ;;  %vm7296_vm15 = vcmp.lt.s32.totalorder %v5038_v56, 7  ;;  %v1189_v22 = vrot.slane %v5179_v15, 7 }
 0x181   : > { %2345 = vmatprep.subr.bf16.mxu1 %v7199_v24  ;;  %v4519_v43 = vunpack.i.h.bf16 %v4517_v37  ;;  %v4518_v13 = vunpack.i.l.bf16 %v4517_v37 }
 0x183   : > { %1912 = vmatmul.mubr.bf16.gmra.mxu1 %v5429_v8  ;;  %v1636_v30 = vsel %vm7235_vm3, %v1228_v63, %v4519_v43  ;;  %v420_v43 = vand.u32 15, %v294_v10  ;;  %v7290_v63 = vmov 0  }
 0x184   : > { %4159 = vmatprep.mubr.msk.bf16.mxu1 %vm7235_vm3, %v5438_v31  ;;  %2346 = vmatpush1.bf16.msra.mxu1 %v4698_v27  ;;  %v1229_v27 = vsel %vm7201_vm7, %v1184_v17, %v1185_v32  ;;  %v4700_v17 = vld [vmem:[%s7189_s3 + $0xb8] sm:$0xff]   ;;  %v1387_v32 = vsel %vm7202_vm5, %v7286_v23, %v1349_v49  ;;  %vm5531_vm7 = vcmp.ge.s32.totalorder %v399_v12, 1  ;;  %v7287_v49 = vmov 0 }
 0x185   : > { %2347 = vmatprep.subr.bf16.mxu1 %v7199_v24  ;;  %v1314_v37 = vsel %vm5481_vm1, %v1229_v27, 0.0  ;;  %v1478_v27 = vsel %vm5495_vm2, %v1386_v4, 0.0  ;;  %v7288_v49 = vsel %vm5531_vm7, 4294967295, %v7287_v49  ;;  %v1188_v23 = vrot.slane %v5191_v28, 7 }
 0x186   : > { %v1635_v47 = vsel %vm7235_vm3, %v1314_v37, %v4518_v13  ;;  %v4701_v13 = vld [vmem:[%s7189_s3 + $0xb0] sm:$0xff]   ;;  %7289 = vst [vmem:[#allocation12_spill] sm:$0xff] %v7288_v49  ;;  %v293_v4 = vadd.s32 112, %v5038_v56  ;;  %v5538_v10 = vpack.c.bf16 %v1478_v27, %v1387_v32  ;;  %vm7291_vm5 = vcmp.lt.s32.totalorder %v5038_v56, 1 }
 0x187   : > { %2165 = vmatmul.mubr.bf16.gmra.mxu0 %v5479_v0  ;;  %v5529_v21 = vpack.c.bf16 %v1636_v30, %v1635_v47  ;;  %vm5545_vm1 = vcmp.le.s32.totalorder %v420_v43, 14  ;;  %v7292_v12 = vmov 0  ;;  %v7295_v28 = vrot.slane %v5207_v40, 1 }
 0x188   : > { %4210 = vmatprep.mubr.msk.bf16.mxu0 %vm7235_vm3, %v5488_v41  ;;  %2348 = vmatpush1.bf16.msra.mxu1 %v4699_v45  ;;  %v4522_v45 = vpop.permute.xlu0 %4521  ;;  %v7293_v12 = vsel %vm5545_vm1, 4294967295, %v7292_v12  ;;  %v296_v30 = vadd.s32 136, %v5038_v56  ;;  %v413_v27 = vand.u32 15, %v293_v4  ;;  %v1354_v4 = vrot.slane %v5201_v36, 1 }
 0x189   : > { %2357 = vmatprep.subr.bf16.mxu1 %v7199_v24  ;;  %v4524_v37 = vunpack.i.h.bf16 %v4522_v45  ;;  %v4523_v24 = vunpack.i.l.bf16 %v4522_v45  ;;  %7294 = vst [vmem:[#allocation13_spill] sm:$0xff] %v7293_v12  ;;  %v1384_v47 = vsel %vm7296_vm15, %v1351_v9, %v7295_v28  ;;  %v1226_v45 = vsel %vm7291_vm5, %v1187_v61, %v1188_v23 }
 0x18a   : > { %v1353_v49 = vrot.slane %v5213_v48, 1 }
 0x18b   : > { %1920 = vmatmul.mubr.bf16.gmra.mxu1 %v5479_v0  ;;  %v1638_v28 = vsel %vm7235_vm3, %v1226_v45, %v4524_v37  ;;  %v4703_v37 = vld [vmem:[%s7189_s3 + $0xa0] sm:$0xff]  }
 0x18c   : > { %4160 = vmatprep.mubr.msk.bf16.mxu1 %vm7235_vm3, %v5488_v41  ;;  %2358 = vmatpush2.bf16.msra.mxu1 %v4700_v17  ;;  %v1227_v17 = vsel %vm7291_vm5, %v1186_v33, %v1187_v61  ;;  %v4702_v33 = vld [vmem:[%s7189_s3 + $0xa8] sm:$0xff]   ;;  %v1385_v61 = vsel %vm7296_vm15, %v7297_v29, %v1351_v9  ;;  %vm5581_vm5 = vcmp.ge.s32.totalorder %v413_v27, 1  ;;  %v7298_v29 = vmov 0  ;;  %v4532_v35 = vpop.permute.xlu0 %4531 }
 0x18d   : > { %2359 = vmatprep.subr.bf16.mxu1 %v7290_v63  ;;  %v1316_v32 = vsel %vm5531_vm7, %v1227_v17, 0.0  ;;  %v1480_v17 = vsel %vm5545_vm1, %v1384_v47, 0.0  ;;  %v7299_v29 = vsel %vm5581_vm5, 4294967295, %v7298_v29  ;;  %v1190_v9 = vrot.slane %v5183_v20, 7 }
 0x18e   : > { %v1637_v43 = vsel %vm7235_vm3, %v1316_v32, %v4523_v24  ;;  %v434_v24 = vand.u32 15, %v296_v30  ;;  %7300 = vst [vmem:[#allocation14_spill] sm:$0xff] %v7299_v29  ;;  %v295_v47 = vadd.s32 128, %v5038_v56  ;;  %v5588_v30 = vpack.c.bf16 %v1480_v17, %v1385_v61 }
 0x18f   : > { %2173 = vmatmul.mubr.bf16.gmra.mxu0 %v5529_v21  ;;  %v5579_v15 = vpack.c.bf16 %v1638_v28, %v1637_v43  ;;  %vm7301_vm15 = vcmp.lt.s32.totalorder %v5038_v56, 1  ;;  %v7302_v27 = vmov 0  ;;  %v1382_v20 = vsel %vm7305_vm13, %v1353_v49, %v1354_v4 }
 0x190   : > { %4211 = vmatprep.mubr.msk.bf16.mxu0 %vm7235_vm3, %v5538_v10  ;;  %2360 = vmatpush2.bf16.msra.mxu1 %v4701_v13  ;;  %v4527_v13 = vpop.permute.xlu1 %4526  ;;  %vm5595_vm7 = vcmp.le.s32.totalorder %v434_v24, 14  ;;  %v298_v43 = vadd.s32 152, %v5038_v56  ;;  %vm7306_vm11 = vmmov %vm7301_vm15  ;;  %v1191_v24 = vrot.slane %v5207_v40, 7  ;;  %v1356_v29 = vrot.slane %v5226_v44, 1 }
 0x191   : > { %2361 = vmatprep.subr.bf16.mxu1 %v7290_v63  ;;  %v4529_v45 = vunpack.i.h.bf16 %v4527_v13  ;;  %v4528_v32 = vunpack.i.l.bf16 %v4527_v13  ;;  %v7303_v27 = vsel %vm5595_vm7, 4294967295, %v7302_v27  ;;  %v1224_v28 = vsel %vm7306_vm11, %v1189_v22, %v1190_v9  ;;  %vm7315_vm9 = vmmov %vm7301_vm15 }
 0x192   : > { %7304 = vst [vmem:[#allocation15_spill] sm:$0xff] %v7303_v27  ;;  %v427_v13 = vand.u32 15, %v295_v47  ;;  %v1355_v47 = vrot.slane %v5205_v39, 1  ;;  %v1223_v38 = vsel %vm7301_vm15, %v1190_v9, %v1191_v24  ;;  %vm7323_vm8 = vmmov %vm7301_vm15 }
 0x193   : > { %1928 = vmatmul.mubr.bf16.gmra.mxu1 %v5529_v21  ;;  %v1640_v17 = vsel %vm7235_vm3, %v1224_v28, %v4529_v45  ;;  %v448_v45 = vand.u32 15, %v298_v43  ;;  %v7308_v28 = vmov 0  ;;  %v7311_v43 = vmov 0 }
 0x194   : > { %4161 = vmatprep.mubr.msk.bf16.mxu1 %vm7235_vm3, %v5538_v10  ;;  %2362 = vmatpush2.bf16.msra.mxu1 %v4702_v33  ;;  %v1225_v33 = vsel %vm7301_vm15, %v1188_v23, %v1189_v22  ;;  %vm5623_vm11 = vcmp.ge.s32.totalorder %v427_v13, 1  ;;  %v300_v13 = vadd.s32 168, %v5038_v56 }
 0x195   : > { %2363 = vmatprep.subr.bf16.mxu1 %v7290_v63  ;;  %v1318_v23 = vsel %vm5581_vm5, %v1225_v33, 0.0  ;;  %v1482_v33 = vsel %vm5595_vm7, %v1382_v20, 0.0  ;;  %v7309_v28 = vsel %vm5623_vm11, 4294967295, %v7308_v28  ;;  %v4533_v20 = vunpack.i.l.bf16 %v4532_v35 }
 0x196   : > { %v1639_v61 = vsel %vm7235_vm3, %v1318_v23, %v4528_v32  ;;  %7310 = vst [vmem:[#allocation16_spill] sm:$0xff] %v7309_v28  ;;  %v4534_v23 = vunpack.i.h.bf16 %v4532_v35  ;;  %vm7314_vm5 = vcmp.lt.s32.totalorder %v5038_v56, 7  ;;  %v1320_v9 = vsel %vm5623_vm11, %v1223_v38, 0.0 }
 0x197   : > { %2181 = vmatmul.mubr.bf16.gmra.mxu0 %v5579_v15  ;;  %v5621_v32 = vpack.c.bf16 %v1640_v17, %v1639_v61  ;;  %v1641_v17 = vsel %vm7235_vm3, %v1320_v9, %v4533_v20  ;;  %v1381_v34 = vsel %vm7314_vm5, %v1354_v4, %v1355_v47  ;;  %v1357_v38 = vrot.slane %v5232_v57, 1 }
 0x198   : > { %4212 = vmatprep.mubr.msk.bf16.mxu0 %vm7235_vm3, %v5588_v30  ;;  %2364 = vmatpush2.bf16.msra.mxu1 %v4703_v37  ;;  %v7307_v37 = vrot.slane %v5207_v40, 1  ;;  %v1192_v40 = vrot.slane %v5213_v48, 7  ;;  %v1380_v48 = vsel %vm7314_vm5, %v1355_v47, %v1356_v29  ;;  %v1194_v20 = vrot.slane %v5205_v39, 7 }
 0x199   : > { %3464 = vmatprep.subr.bf16.mxu1 %v7290_v63  ;;  %v299_v4 = vadd.s32 160, %v5038_v56  ;;  %vm7322_vm11 = vcmp.lt.s32.totalorder %v5038_v56, 7 }
 0x19a   : > { %v1383_v22 = vsel %vm7305_vm13, %v7307_v37, %v1353_v49  ;;  %v297_v49 = vadd.s32 144, %v5038_v56  ;;  %vm5636_vm13 = vcmp.le.s32.totalorder %v448_v45, 14  ;;  %v1222_v35 = vsel %vm7315_vm9, %v1191_v24, %v1192_v40  ;;  %v4537_v45 = vpop.permute.xlu1 %4536 }
 0x19b   : > { %1936 = vmatmul.mubr.bf16.gmra.mxu1 %v5579_v15  ;;  %v5629_v37 = vpack.c.bf16 %v1482_v33, %v1383_v22  ;;  %v7312_v43 = vsel %vm5636_vm13, 4294967295, %v7311_v43  ;;  %v1642_v22 = vsel %vm7235_vm3, %v1222_v35, %v4534_v23  ;;  %v1193_v33 = vrot.slane %v5201_v36, 7 }
 0x19c   : > { %4162 = vmatprep.mubr.msk.bf16.mxu1 %vm7235_vm3, %v5588_v30  ;;  %7313 = vst [vmem:[#allocation17_spill] sm:$0xff] %v7312_v43  ;;  %v441_v61 = vand.u32 15, %v297_v49  ;;  %v1484_v27 = vsel %vm5636_vm13, %v1380_v48, 0.0  ;;  %v1358_v24 = vrot.slane %v5220_v50, 1  ;;  %v462_v49 = vand.u32 15, %v300_v13 }
 0x19d   : > { %v5659_v23 = vpack.c.bf16 %v1642_v22, %v1641_v17  ;;  %v7316_v36 = vmov 0  ;;  %v4539_v47 = vunpack.i.h.bf16 %v4537_v45  ;;  %v4538_v48 = vunpack.i.l.bf16 %v4537_v45 }
 0x19e   : > { %vm5661_vm9 = vcmp.ge.s32.totalorder %v441_v61, 1  ;;  %v5667_v35 = vpack.c.bf16 %v1484_v27, %v1381_v34  ;;  %v1221_v9 = vsel %vm7301_vm15, %v1192_v40, %v1193_v33  ;;  %vm5674_vm5 = vcmp.le.s32.totalorder %v462_v49, 14  ;;  %v4542_v49 = vpop.permute.xlu0 %4541 }
 0x19f   : > { %2189 = vmatmul.mubr.bf16.gmra.mxu0 %v5621_v32  ;;  %v7317_v36 = vsel %vm5661_vm9, 4294967295, %v7316_v36  ;;  %v7319_v13 = vmov 0  ;;  %v1378_v39 = vsel %vm7322_vm11, %v1357_v38, %v1358_v24  ;;  %v302_v61 = vadd.s32 184, %v5038_v56 }
 0x1a0   : > { %4213 = vmatprep.mubr.msk.bf16.mxu0 %vm7235_vm3, %v5629_v37  ;;  %7318 = vst [vmem:[#allocation18_spill] sm:$0xff] %v7317_v36  ;;  %v7320_v13 = vsel %vm5674_vm5, 4294967295, %v7319_v13  ;;  %v1220_v34 = vsel %vm7323_vm8, %v1193_v33, %v1194_v20  ;;  %v1322_v27 = vsel %vm5661_vm9, %v1221_v9, 0.0  ;;  %v455_v40 = vand.u32 15, %v299_v4 }
 0x1a1   : > { %7321 = vst [vmem:[#allocation19_spill] sm:$0xff] %v7320_v13  ;;  %v1643_v17 = vsel %vm7235_vm3, %v1322_v27, %v4538_v48  ;;  %v1644_v22 = vsel %vm7235_vm3, %v1220_v34, %v4539_v47  ;;  %v1195_v45 = vrot.slane %v5226_v44, 7  ;;  %v1379_v28 = vsel %vm7322_vm11, %v1356_v29, %v1357_v38 }
 0x1a2   : > { %v1486_v43 = vsel %vm5674_vm5, %v1378_v39, 0.0  ;;  %v1359_v33 = vrot.slane %v5224_v53, 1  ;;  %v1360_v9 = vrot.slane %v5234_v58, 1  ;;  %v476_v4 = vand.u32 15, %v302_v61  ;;  %vm7331_vm5 = vmmov %vm7301_vm15 }
 0x1a3   : > { %1944 = vmatmul.mubr.bf16.gmra.mxu1 %v5621_v32  ;;  %v5697_v47 = vpack.c.bf16 %v1644_v22, %v1643_v17  ;;  %vm5699_vm8 = vcmp.ge.s32.totalorder %v455_v40, 1  ;;  %v7324_v44 = vmov 0  ;;  %v1196_v48 = vrot.slane %v5232_v57, 7 }
 0x1a4   : > { %4163 = vmatprep.mubr.msk.bf16.mxu1 %vm7235_vm3, %v5629_v37  ;;  %v7325_v44 = vsel %vm5699_vm8, 4294967295, %v7324_v44  ;;  %v301_v29 = vadd.s32 176, %v5038_v56  ;;  %v4544_v38 = vunpack.i.h.bf16 %v4542_v49  ;;  %v4543_v39 = vunpack.i.l.bf16 %v4542_v49 }
 0x1a5   : > { %7326 = vst [vmem:[#allocation20_spill] sm:$0xff] %v7325_v44  ;;  %v5705_v34 = vpack.c.bf16 %v1486_v43, %v1379_v28  ;;  %v1219_v27 = vsel %vm7301_vm15, %v1194_v20, %v1195_v45  ;;  %vm5712_vm11 = vcmp.le.s32.totalorder %v476_v4, 14  ;;  %v7327_v61 = vmov 0  ;;  %v4547_v4 = vpop.permute.xlu1 %4546 }
 0x1a6   : > { %v7328_v61 = vsel %vm5712_vm11, 4294967295, %v7327_v61  ;;  %vm7330_vm9 = vcmp.lt.s32.totalorder %v5038_v56, 7  ;;  %v304_v40 = vadd.s32 200, %v5038_v56  ;;  %v1218_v28 = vsel %vm7331_vm5, %v1195_v45, %v1196_v48 }
 0x1a7   : > { %2197 = vmatmul.mubr.bf16.gmra.mxu0 %v5659_v23  ;;  %7329 = vst [vmem:[#allocation21_spill] sm:$0xff] %v7328_v61  ;;  %v1376_v57 = vsel %vm7330_vm9, %v1359_v33, %v1360_v9  ;;  %v1324_v43 = vsel %vm5699_vm8, %v1219_v27, 0.0  ;;  %v469_v20 = vand.u32 15, %v301_v29  ;;  %v1646_v22 = vsel %vm7235_vm3, %v1218_v28, %v4544_v38 }
 0x1a8   : > { %4214 = vmatprep.mubr.msk.bf16.mxu0 %vm7235_vm3, %v5667_v35  ;;  %v1645_v17 = vsel %vm7235_vm3, %v1324_v43, %v4543_v39  ;;  %v1197_v49 = vrot.slane %v5220_v50, 7  ;;  %v1377_v36 = vsel %vm7330_vm9, %v1358_v24, %v1359_v33  ;;  %v1488_v13 = vsel %vm5712_vm11, %v1376_v57, 0.0  ;;  %vm7339_vm11 = vmmov %vm7301_vm15 }
 0x1a9   : > { %v1362_v45 = vrot.slane %v5222_v51, 1  ;;  %v1361_v27 = vrot.slane %v5236_v62, 1  ;;  %v490_v29 = vand.u32 15, %v304_v40  ;;  %v5735_v38 = vpack.c.bf16 %v1646_v22, %v1645_v17 }
 0x1aa   : > { %vm5737_vm5 = vcmp.ge.s32.totalorder %v469_v20, 1  ;;  %v7332_v50 = vmov 0  ;;  %v1198_v39 = vrot.slane %v5224_v53, 7  ;;  %v303_v24 = vadd.s32 192, %v5038_v56 }
 0x1ab   : > { %1952 = vmatmul.mubr.bf16.gmra.mxu1 %v5659_v23  ;;  %v7333_v50 = vsel %vm5737_vm5, 4294967295, %v7332_v50  ;;  %v4549_v33 = vunpack.i.h.bf16 %v4547_v4  ;;  %v4548_v57 = vunpack.i.l.bf16 %v4547_v4  ;;  %v5743_v28 = vpack.c.bf16 %v1488_v13, %v1377_v36 }
 0x1ac   : > { %4164 = vmatprep.mubr.msk.bf16.mxu1 %vm7235_vm3, %v5667_v35  ;;  %7334 = vst [vmem:[#allocation22_spill] sm:$0xff] %v7333_v50  ;;  %v1217_v43 = vsel %vm7301_vm15, %v1196_v48, %v1197_v49  ;;  %vm5750_vm9 = vcmp.le.s32.totalorder %v490_v29, 14  ;;  %v7335_v40 = vmov 0  ;;  %vm7338_vm8 = vcmp.lt.s32.totalorder %v5038_v56, 7  ;;  %v4552_v29 = vpop.permute.xlu0 %4551  ;;  %v4557_v50 = vpop.permute.xlu1 %4556 }
 0x1ad   : > { %v7336_v40 = vsel %vm5750_vm9, 4294967295, %v7335_v40  ;;  %v1374_v53 = vsel %vm7338_vm8, %v1361_v27, %v1362_v45  ;;  %v306_v20 = vadd.s32 216, %v5038_v56  ;;  %v1216_v36 = vsel %vm7339_vm11, %v1197_v49, %v1198_v39 }
 0x1ae   : > { %7337 = vst [vmem:[#allocation23_spill] sm:$0xff] %v7336_v40  ;;  %v1326_v13 = vsel %vm5737_vm5, %v1217_v43, 0.0  ;;  %v483_v48 = vand.u32 15, %v303_v24  ;;  %v1648_v22 = vsel %vm7235_vm3, %v1216_v36, %v4549_v33  ;;  %v1199_v4 = vrot.slane %v5234_v58, 7 }
 0x1af   : > { %2205 = vmatmul.mubr.bf16.gmra.mxu0 %v5697_v47  ;;  %v1647_v17 = vsel %vm7235_vm3, %v1326_v13, %v4548_v57  ;;  %v1375_v44 = vsel %vm7338_vm8, %v1360_v9, %v1361_v27  ;;  %v1490_v61 = vsel %vm5750_vm9, %v1374_v53, 0.0  ;;  %v1363_v49 = vrot.slane %v5228_v54, 1  ;;  %vm7347_vm9 = vmmov %vm7301_vm15 }
 0x1b0   : > { %4215 = vmatprep.mubr.msk.bf16.mxu0 %vm7235_vm3, %v5705_v34  ;;  %v1364_v43 = vrot.slane %v5250_v6, 1  ;;  %v504_v24 = vand.u32 15, %v306_v20  ;;  %v5773_v33 = vpack.c.bf16 %v1648_v22, %v1647_v17  ;;  %vm5775_vm11 = vcmp.ge.s32.totalorder %v483_v48, 1  ;;  %v4562_v12 = vpop.permute.xlu0 %4561 }
 0x1b1   : > { %v7340_v58 = vmov 0  ;;  %v1200_v57 = vrot.slane %v5236_v62, 7  ;;  %v305_v9 = vadd.s32 208, %v5038_v56  ;;  %v4554_v27 = vunpack.i.h.bf16 %v4552_v29 }
 0x1b2   : > { %v7341_v58 = vsel %vm5775_vm11, 4294967295, %v7340_v58  ;;  %v4553_v53 = vunpack.i.l.bf16 %v4552_v29  ;;  %v5781_v36 = vpack.c.bf16 %v1490_v61, %v1375_v44  ;;  %v1215_v13 = vsel %vm7301_vm15, %v1198_v39, %v1199_v4 }
 0x1b3   : > { %1960 = vmatmul.mubr.bf16.gmra.mxu1 %v5697_v47  ;;  %7342 = vst [vmem:[#allocation24_spill] sm:$0xff] %v7341_v58  ;;  %v308_v20 = vadd.s32 232, %v5038_v56  ;;  %vm5789_vm8 = vcmp.le.s32.totalorder %v504_v24, 14  ;;  %v7343_v48 = vmov 0  ;;  %vm7346_vm5 = vcmp.lt.s32.totalorder %v5038_v56, 7 }
 0x1b4   : > { %4165 = vmatprep.mubr.msk.bf16.mxu1 %vm7235_vm3, %v5705_v34  ;;  %v7344_v48 = vsel %vm5789_vm8, 4294967295, %v7343_v48  ;;  %v1372_v62 = vsel %vm7346_vm5, %v1363_v49, %v1364_v43  ;;  %v1214_v44 = vsel %vm7347_vm9, %v1199_v4, %v1200_v57  ;;  %v1328_v61 = vsel %vm5775_vm11, %v1215_v13, 0.0 }
 0x1b5   : > { %7345 = vst [vmem:[#allocation25_spill] sm:$0xff] %v7344_v48  ;;  %v497_v39 = vand.u32 15, %v305_v9  ;;  %v1649_v17 = vsel %vm7235_vm3, %v1328_v61, %v4553_v53  ;;  %v1650_v22 = vsel %vm7235_vm3, %v1214_v44, %v4554_v27  ;;  %v1201_v29 = vrot.slane %v5222_v51, 7 }
 0x1b6   : > { %v1365_v24 = vrot.slane %v5252_v7, 1  ;;  %v1373_v40 = vsel %vm7346_vm5, %v1362_v45, %v1363_v49  ;;  %v1492_v4 = vsel %vm5789_vm8, %v1372_v62, 0.0  ;;  %v518_v58 = vand.u32 15, %v308_v20  ;;  %vm7356_vm8 = vmmov %vm7301_vm15 }
 0x1b7   : > { %2213 = vmatmul.mubr.bf16.gmra.mxu0 %v5735_v38  ;;  %v307_v9 = vadd.s32 224, %v5038_v56  ;;  %v1366_v27 = vrot.slane %v5246_v3, 1  ;;  %v5812_v51 = vpack.c.bf16 %v1650_v22, %v1649_v17  ;;  %vm5814_vm9 = vcmp.ge.s32.totalorder %v497_v39, 1 }
 0x1b8   : > { %4216 = vmatprep.mubr.msk.bf16.mxu0 %vm7235_vm3, %v5743_v28  ;;  %v7348_v53 = vmov 0  ;;  %v1202_v13 = vrot.slane %v5228_v54, 7  ;;  %v4559_v45 = vunpack.i.h.bf16 %v4557_v50  ;;  %v4558_v49 = vunpack.i.l.bf16 %v4557_v50 }
 0x1b9   : > { %v7349_v53 = vsel %vm5814_vm9, 4294967295, %v7348_v53  ;;  %v5819_v44 = vpack.c.bf16 %v1492_v4, %v1373_v40  ;;  %v1213_v20 = vsel %vm7301_vm15, %v1200_v57, %v1201_v29  ;;  %vm5824_vm5 = vcmp.le.s32.totalorder %v518_v58, 14 }
 0x1ba   : > { %7350 = vst [vmem:[#allocation26_spill] sm:$0xff] %v7349_v53  ;;  %v7351_v62 = vmov 0  ;;  %v310_v39 = vadd.s32 248, %v5038_v56  ;;  %vm7355_vm11 = vcmask 523264   ;;  %v1212_v54 = vsel %vm7356_vm8, %v1201_v29, %v1202_v13 }
 0x1bb   : > { %1968 = vmatmul.mubr.bf16.gmra.mxu1 %v5735_v38  ;;  %v7352_v62 = vsel %vm5824_vm5, 4294967295, %v7351_v62  ;;  %v1330_v50 = vsel %vm5814_vm9, %v1213_v20, 0.0  ;;  %v511_v58 = vand.u32 15, %v307_v9  ;;  %vm7358_vm13 = vmmov %vm7355_vm11  ;;  %v1203_v4 = vrot.slane %v5250_v6, 7 }
 0x1bc   : > { %4166 = vmatprep.mubr.msk.bf16.mxu1 %vm7235_vm3, %v5743_v28  ;;  %7353 = vst [vmem:[#allocation27_spill] sm:$0xff] %v7352_v62  ;;  %v1651_v57 = vsel %vm7358_vm13, %v1330_v50, %v4558_v49  ;;  %vm7359_vm7 = vmmov %vm7355_vm11  ;;  %v1367_v48 = vrot.slane %v5248_v5, 1  ;;  %v532_v29 = vand.u32 15, %v310_v39  ;;  %v7361_v9 = vmov 0 }
 0x1bd   : > { %v1652_v17 = vsel %vm7359_vm7, %v1212_v54, %v4559_v45  ;;  %vm5852_vm13 = vcmp.ge.s32.totalorder %v511_v58, 1  ;;  %v1204_v45 = vrot.slane %v5252_v7, 7  ;;  %v4564_v6 = vunpack.i.h.bf16 %v4562_v12 }
 0x1be   : > { %v7362_v9 = vsel %vm5852_vm13, 4294967295, %v7361_v9  ;;  %v4563_v49 = vunpack.i.l.bf16 %v4562_v12  ;;  %v7365_v39 = vmov 0  ;;  %v7368_v54 = vrot.slane %v5075_v19, 1 }
 0x1bf   : > { %2221 = vmatmul.mubr.bf16.gmra.mxu0 %v5773_v33  ;;  %7363 = vst [vmem:[#allocation28_spill] sm:$0xff] %v7362_v9 }
 0x1c0   : > { %4217 = vmatprep.mubr.msk.bf16.mxu0 %vm7235_vm3, %v5781_v36 }
 0x1c3   : > { %1976 = vmatmul.mubr.bf16.gmra.mxu1 %v5773_v33 }
 0x1c4   : > { %4167 = vmatprep.mubr.msk.bf16.mxu1 %vm7235_vm3, %v5781_v36  ;;  %vm7354_vm3 = vcmp.lt.s32.totalorder %v5038_v56, 7 }
 0x1c5   : > { %v1370_v61 = vsel %vm7354_vm3, %v1365_v24, %v1366_v27  ;;  %vm7357_vm15 = vmmov %vm7354_vm3 }
 0x1c6   : > { %v1371_v40 = vsel %vm7357_vm15, %v1364_v43, %v1365_v24  ;;  %v1494_v22 = vsel %vm5824_vm5, %v1370_v61, 0.0  ;;  %vm7360_vm3 = vmmov %vm7359_vm7  ;;  %v5848_v43 = vpack.c.bf16 %v1652_v17, %v1651_v57  ;;  %v309_v61 = vadd.s32 240, %v5038_v56 }
 0x1c7   : > { %2229 = vmatmul.mubr.bf16.gmra.mxu0 %v5812_v51  ;;  %v5850_v24 = vpack.c.bf16 %v1494_v22, %v1371_v40  ;;  %vm7364_vm7 = vmmov %vm7356_vm8  ;;  %v1205_v40 = vrot.slane %v5246_v3, 7  ;;  %v4567_v22 = vpop.permute.xlu1 %4566 }
 0x1c8   : > { %4218 = vmatprep.mubr.msk.bf16.mxu0 %vm7355_vm11, %v5819_v44  ;;  %v1211_v20 = vsel %vm7364_vm7, %v1202_v13, %v1203_v4  ;;  %vm5861_vm11 = vcmp.le.s32.totalorder %v532_v29, 14  ;;  %vm7369_vm8 = vmmov %vm7357_vm15  ;;  %v525_v17 = vand.u32 15, %v309_v61  ;;  %v4568_v3 = vunpack.i.l.bf16 %v4567_v22 }
 0x1c9   : > { %v7366_v39 = vsel %vm5861_vm11, 4294967295, %v7365_v39  ;;  %v1400_v50 = vsel %vm7369_vm8, %v1367_v48, %v7368_v54  ;;  %vm7370_vm15 = vmmov %vm7360_vm3  ;;  %v1332_v12 = vsel %vm5852_vm13, %v1211_v20, 0.0 }
 0x1ca   : > { %7367 = vst [vmem:[#allocation29_spill] sm:$0xff] %v7366_v39  ;;  %vm7373_vm9 = vmmov %vm7370_vm15  ;;  %v1496_v57 = vsel %vm5861_vm11, %v1400_v50, 0.0 }
 0x1cb   : > { %1984 = vmatmul.mubr.bf16.gmra.mxu1 %v5812_v51  ;;  %v1653_v58 = vsel %vm7373_vm9, %v1332_v12, %v4563_v49  ;;  %vm7374_vm5 = vmmov %vm7373_vm9  ;;  %v7380_v49 = vrot.slane %v5248_v5, 7 }
 0x1cc   : > { %4168 = vmatprep.mubr.msk.bf16.mxu1 %vm7360_vm3, %v5819_v44  ;;  %vm7371_vm3 = vmmov %vm7364_vm7 }
 0x1cd   : > { %v1210_v7 = vsel %vm7371_vm3, %v1203_v4, %v1204_v45  ;;  %vm7372_vm7 = vmmov %vm7369_vm8  ;;  %v1208_v20 = vsel %vm7371_vm3, %v1205_v40, %v7380_v49 }
 0x1ce   : > { %v1369_v13 = vsel %vm7372_vm7, %v1366_v27, %v1367_v48  ;;  %v1654_v19 = vsel %vm7374_vm5, %v1210_v7, %v4564_v6  ;;  %vm7375_vm8 = vmmov %vm7374_vm5  ;;  %v4569_v48 = vunpack.i.h.bf16 %v4567_v22  ;;  %v7376_v27 = vmov 0 }
 0x1cf   : > { %2237 = vmatmul.mubr.bf16.gmra.mxu0 %v5848_v43  ;;  %v5885_v4 = vpack.c.bf16 %v1654_v19, %v1653_v58  ;;  %v5887_v29 = vpack.c.bf16 %v1496_v57, %v1369_v13  ;;  %vm7379_vm9 = vmmov %vm7371_vm3 }
 0x1d0   : > { %4219 = vmatprep.mubr.msk.bf16.mxu0 %vm7370_vm15, %v5850_v24  ;;  %vm5889_vm15 = vcmp.ge.s32.totalorder %v525_v17, 1  ;;  %v1209_v6 = vsel %vm7379_vm9, %v1204_v45, %v1205_v40  ;;  %vm7381_vm7 = vmmov %vm7374_vm5 }
 0x1d1   : > { %v7377_v27 = vsel %vm5889_vm15, 4294967295, %v7376_v27  ;;  %v1334_v61 = vsel %vm5889_vm15, %v1209_v6, 0.0  ;;  %vm7383_vm9 = vmmov %vm7374_vm5 }
 0x1d2   : > { %7378 = vst [vmem:[#allocation30_spill] sm:$0xff] %v7377_v27  ;;  %v1655_v54 = vsel %vm7381_vm7, %v1334_v61, %v4568_v3  ;;  %vm7384_vm3 = vmmov %vm7374_vm5 }
 0x1d3   : > { %1992 = vmatmul.mubr.bf16.gmra.mxu1 %v5848_v43  ;;  %vm7385_vm7 = vmmov %vm7384_vm3 }
 0x1d4   : > { %4169 = vmatprep.mubr.msk.bf16.mxu1 %vm7375_vm8, %v5850_v24  ;;  %vm7382_vm8 = vmmov %vm7374_vm5 }
 0x1d5   : > { %v1656_v50 = vsel %vm7382_vm8, %v1208_v20, %v4569_v48  ;;  %vm7386_vm8 = vmmov %vm7384_vm3  ;;  %v4705_v48 = vld [vmem:[%s7191_s5 + $0x30] sm:$0xff]  }
 0x1d6   : > { %v5909_v45 = vpack.c.bf16 %v1656_v50, %v1655_v54  ;;  %v4706_v50 = vld [vmem:[%s7191_s5 + $0x28] sm:$0xff]  }
 0x1d7   : > { %2245 = vmatmul.mubr.bf16.gmra.mxu0 %v5885_v4 }
 0x1d8   : > { %4220 = vmatprep.mubr.msk.bf16.mxu0 %vm7374_vm5, %v5887_v29 }
 0x1db   : > { %2000 = vmatmul.mubr.bf16.gmra.mxu1 %v5885_v4 }
 0x1dc   : > { %4233 = vmatprep.mubr.msk.bf16.mxu1 %vm7383_vm9, %v5121_v46  ;;  %vm7387_vm9 = vmmov %vm7384_vm3 }
 0x1df   : > { %2253 = vmatmul.mubr.bf16.gmra.mxu0 %v5909_v45 }
 0x1e3   : > { %2366 = vmatmul.mubr.bf16.vlgmr.msra.gmra.mxu1 %v5306_v16 }
 0x1e4   : > { %4234 = vmatprep.mubr.msk.bf16.mxu1 %vm7374_vm5, %v5143_v59  ;;  %vm7388_vm5 = vmmov %vm7384_vm3 }
 0x1eb   : > { %2374 = vmatmul.mubr.bf16.gmra.mxu1 %v5334_v11 }
 0x1ec   : > { %4235 = vmatprep.mubr.msk.bf16.mxu1 %vm7384_vm3, %v5338_v18 }
 0x1f3   : > { %2382 = vmatmul.mubr.bf16.gmra.mxu1 %v5376_v25 }
 0x1f4   : > { %4236 = vmatprep.mubr.msk.bf16.mxu1 %vm7385_vm7, %v5388_v14  ;;  %vm7389_vm7 = vmmov %vm7384_vm3 }
 0x1fb   : > { %2390 = vmatmul.mubr.bf16.gmra.mxu1 %v5429_v8 }
 0x1fc   : > { %4237 = vmatprep.mubr.msk.bf16.mxu1 %vm7386_vm8, %v5438_v31  ;;  %vm7390_vm8 = vmmov %vm7384_vm3 }
 0x203   : > { %2398 = vmatmul.mubr.bf16.gmra.mxu1 %v5479_v0 }
 0x204   : > { %4238 = vmatprep.mubr.msk.bf16.mxu1 %vm7387_vm9, %v5488_v41  ;;  %vm7391_vm9 = vmmov %vm7384_vm3 }
 0x20b   : > { %2406 = vmatmul.mubr.bf16.gmra.mxu1 %v5529_v21 }
 0x20c   : > { %4239 = vmatprep.mubr.msk.bf16.mxu1 %vm7388_vm5, %v5538_v10  ;;  %vm7392_vm5 = vmmov %vm7384_vm3 }
 0x213   : > { %2414 = vmatmul.mubr.bf16.gmra.mxu1 %v5579_v15 }
 0x214   : > { %4240 = vmatprep.mubr.msk.bf16.mxu1 %vm7384_vm3, %v5588_v30 }
 0x21b   : > { %2422 = vmatmul.mubr.bf16.gmra.mxu1 %v5621_v32 }
 0x21c   : > { %4241 = vmatprep.mubr.msk.bf16.mxu1 %vm7389_vm7, %v5629_v37  ;;  %vm7393_vm7 = vmmov %vm7384_vm3 }
 0x223   : > { %2430 = vmatmul.mubr.bf16.gmra.mxu1 %v5659_v23 }
 0x224   : > { %4242 = vmatprep.mubr.msk.bf16.mxu1 %vm7390_vm8, %v5667_v35  ;;  %vm7394_vm8 = vmmov %vm7384_vm3 }
 0x22b   : > { %v5939_v46 = vpop.f32.mrf.mxu1  ;;  %2438 = vmatmul.mubr.bf16.gmra.mxu1 %v5697_v47 }
 0x22c   : > { %4243 = vmatprep.mubr.msk.bf16.mxu1 %vm7391_vm9, %v5705_v34  ;;  %vm7395_vm9 = vmmov %vm7384_vm3 }
 0x22d   : > { %v1891_v59 = vpop.f32.mrf.mxu1 }
 0x22f   : > { %v5944_v5 = vpop.f32.mrf.mxu1  ;;  %v5946_v14 = vpop.f32.mrf.mxu0 }
 0x231   : > { %v1894_v16 = vpop.f32.mrf.mxu1  ;;  %v2144_v11 = vpop.f32.mrf.mxu0 }
 0x233   : > { %v5948_v18 = vpop.f32.mrf.mxu1  ;;  %v5950_v25 = vpop.f32.mrf.mxu0  ;;  %2446 = vmatmul.mubr.bf16.gmra.mxu1 %v5735_v38 }
 0x234   : > { %4244 = vmatprep.mubr.msk.bf16.mxu1 %vm7392_vm5, %v5743_v28  ;;  %vm7413_vm5 = vmmov %vm7384_vm3 }
 0x235   : > { %v1899_v8 = vpop.f32.mrf.mxu1  ;;  %v2147_v31 = vpop.f32.mrf.mxu0 }
 0x237   : > { %v5955_v0 = vpop.f32.mrf.mxu1  ;;  %v5957_v41 = vpop.f32.mrf.mxu0 }
 0x239   : > { %v1902_v21 = vpop.f32.mrf.mxu1  ;;  %v2152_v10 = vpop.f32.mrf.mxu0 }
 0x23b   : > { %v5959_v15 = vpop.f32.mrf.mxu1  ;;  %v5961_v30 = vpop.f32.mrf.mxu0  ;;  %2454 = vmatmul.mubr.bf16.gmra.mxu1 %v5773_v33  ;;  %v4704_v33 = vld [vmem:[%s7191_s5 + $0x38] sm:$0xff]  }
 0x23c   : > { %4245 = vmatprep.mubr.msk.bf16.mxu1 %vm7384_vm3, %v5781_v36  ;;  %3212 = vmatpush1.bf16.msra.mxu0 %v4704_v33 }
 0x23d   : > { %v1907_v32 = vpop.f32.mrf.mxu1  ;;  %v2155_v37 = vpop.f32.mrf.mxu0  ;;  %3213 = vmatprep.subr.bf16.mxu0 %v7290_v63 }
 0x23f   : > { %v5966_v23 = vpop.f32.mrf.mxu1  ;;  %v5968_v35 = vpop.f32.mrf.mxu0 }
 0x240   : > { %3214 = vmatpush1.bf16.msra.mxu0 %v4705_v48  ;;  %v4708_v48 = vld [vmem:[%s7191_s5 + $0x18] sm:$0xff]  }
 0x241   : > { %v1910_v47 = vpop.f32.mrf.mxu1  ;;  %v2160_v34 = vpop.f32.mrf.mxu0  ;;  %3215 = vmatprep.subr.bf16.mxu0 %v7290_v63 }
 0x242   : > { %v4707_v34 = vld [vmem:[%s7191_s5 + $0x20] sm:$0xff]  }
 0x243   : > { %v5970_v38 = vpop.f32.mrf.mxu1  ;;  %v5972_v28 = vpop.f32.mrf.mxu0  ;;  %2462 = vmatmul.mubr.bf16.gmra.mxu1 %v5812_v51 }
 0x244   : > { %4246 = vmatprep.mubr.msk.bf16.mxu1 %vm7393_vm7, %v5819_v44  ;;  %3216 = vmatpush1.bf16.msra.mxu0 %v4706_v50  ;;  %vm7414_vm7 = vmmov %vm7384_vm3 }
 0x245   : > { %v1915_v36 = vpop.f32.mrf.mxu1  ;;  %v2163_v7 = vpop.f32.mrf.mxu0  ;;  %3217 = vmatprep.subr.bf16.mxu0 %v7290_v63 }
 0x247   : > { %v5980_v12 = vpop.f32.mrf.mxu1  ;;  %v5982_v13 = vpop.f32.mrf.mxu0 }
 0x248   : > { %3218 = vmatpush1.bf16.msra.mxu0 %v4707_v34 }
 0x249   : > { %v1918_v40 = vpop.f32.mrf.mxu1  ;;  %v2168_v58 = vpop.f32.mrf.mxu0  ;;  %3219 = vmatprep.subr.bf16.mxu0 %v7290_v63 }
 0x24b   : > { %v5985_v19 = vpop.f32.mrf.mxu1  ;;  %v5987_v51 = vpop.f32.mrf.mxu0  ;;  %2470 = vmatmul.mubr.bf16.gmra.mxu1 %v5848_v43 }
 0x24c   : > { %4247 = vmatprep.mubr.msk.bf16.mxu1 %vm7394_vm8, %v5850_v24  ;;  %3220 = vmatpush1.bf16.msra.mxu0 %v4708_v48  ;;  %vm7415_vm8 = vmmov %vm7384_vm3 }
 0x24d   : > { %v1923_v44 = vpop.f32.mrf.mxu1  ;;  %v2171_v57 = vpop.f32.mrf.mxu0  ;;  %3221 = vmatprep.subr.bf16.mxu0 %v7290_v63 }
 0x24f   : > { %v5992_v17 = vpop.f32.mrf.mxu1  ;;  %v5994_v22 = vpop.f32.mrf.mxu0 }
 0x251   : > { %v1926_v3 = vpop.f32.mrf.mxu1  ;;  %v2176_v6 = vpop.f32.mrf.mxu0 }
 0x253   : > { %v5999_v49 = vpop.f32.mrf.mxu1  ;;  %v6001_v20 = vpop.f32.mrf.mxu0  ;;  %2478 = vmatmul.mubr.bf16.gmra.mxu1 %v5885_v4 }
 0x254   : > { %4248 = vmatprep.mubr.msk.bf16.mxu1 %vm7395_vm9, %v5887_v29  ;;  %vm7416_vm9 = vcmp.lt.s32.totalorder %v5038_v56, 1 }
 0x255   : > { %v1931_v43 = vpop.f32.mrf.mxu1  ;;  %v2179_v24 = vpop.f32.mrf.mxu0 }
 0x257   : > { %v6007_v61 = vpop.f32.mrf.mxu1  ;;  %v6009_v54 = vpop.f32.mrf.mxu0 }
 0x259   : > { %v1934_v59 = vpop.f32.mrf.mxu1  ;;  %v2184_v16 = vpop.f32.mrf.mxu0 }
 0x25b   : > { %v6014_v11 = vpop.f32.mrf.mxu1  ;;  %v6016_v4 = vpop.f32.mrf.mxu0  ;;  %2486 = vmatmul.mubr.bf16.gmra.mxu1 %v5909_v45 }
 0x25d   : > { %v1939_v29 = vpop.f32.mrf.mxu1  ;;  %v2187_v8 = vpop.f32.mrf.mxu0 }
 0x25f   : > { %v6020_v31 = vpop.f32.mrf.mxu1  ;;  %v6022_v21 = vpop.f32.mrf.mxu0 }
 0x261   : > { %v1942_v10 = vpop.f32.mrf.mxu1  ;;  %v2192_v32 = vpop.f32.mrf.mxu0 }
 0x263   : > { %v6024_v37 = vpop.f32.mrf.mxu1  ;;  %v6026_v47 = vpop.f32.mrf.mxu0 }
 0x265   : > { %v1947_v33 = vpop.f32.mrf.mxu1  ;;  %v2195_v45 = vpop.f32.mrf.mxu0 }
 0x266   : > { %v4709_v33 = vld [vmem:[%s7191_s5 + $0x10] sm:$0xff]  }
 0x267   : > { %v6031_v36 = vpop.f32.mrf.mxu1  ;;  %v6033_v7 = vpop.f32.mrf.mxu0  ;;  %3222 = vmatpush1.bf16.msra.mxu0 %v4709_v33 }
 0x268   : > { %3223 = vmatprep.subr.bf16.mxu0 %v7290_v63 }
 0x269   : > { %v1950_v40 = vpop.f32.mrf.mxu1  ;;  %v2200_v58 = vpop.f32.mrf.mxu0 }
 0x26b   : > { %v6036_v44 = vpop.f32.mrf.mxu1  ;;  %v6038_v57 = vpop.f32.mrf.mxu0 }
 0x26d   : > { %v1955_v3 = vpop.f32.mrf.mxu1  ;;  %v2203_v6 = vpop.f32.mrf.mxu0 }
 0x26f   : > { %v6043_v43 = vpop.f32.mrf.mxu1  ;;  %v6045_v24 = vpop.f32.mrf.mxu0 }
 0x271   : > { %v1958_v50 = vpop.f32.mrf.mxu1  ;;  %v2208_v59 = vpop.f32.mrf.mxu0 }
 0x273   : > { %v6048_v16 = vpop.f32.mrf.mxu1  ;;  %v6050_v29 = vpop.f32.mrf.mxu0 }
 0x275   : > { %v1963_v8 = vpop.f32.mrf.mxu1  ;;  %v2211_v10 = vpop.f32.mrf.mxu0 }
 0x276   : > { %v4710_v8 = vld [vmem:[%s7191_s5 + $0x8] sm:$0xff]  }
 0x277   : > { %v6052_v32 = vpop.f32.mrf.mxu1  ;;  %v6054_v34 = vpop.f32.mrf.mxu0  ;;  %3224 = vmatpush1.bf16.msra.mxu0 %v4710_v8  ;;  %v4711_v8 = vld [vmem:[%s7191_s5] sm:$0xff]  }
 0x278   : > { %3225 = vmatprep.subr.bf16.mxu0 %v7290_v63 }
 0x279   : > { %v1966_v45 = vpop.f32.mrf.mxu1  ;;  %v2216_v40 = vpop.f32.mrf.mxu0 }
 0x27b   : > { %v6059_v58 = vpop.f32.mrf.mxu1  ;;  %v6061_v48 = vpop.f32.mrf.mxu0  ;;  %3226 = vmatpush1.bf16.msra.mxu0 %v4711_v8  ;;  %v4713_v8 = vld [vmem:[%s7191_s5 + $0x58] sm:$0xff]  }
 0x27c   : > { %3235 = vmatprep.subr.bf16.mxu0 %v7290_v63 }
 0x27d   : > { %v1971_v3 = vpop.f32.mrf.mxu1  ;;  %v2219_v6 = vpop.f32.mrf.mxu0 }
 0x27f   : > { %v6064_v50 = vpop.f32.mrf.mxu1  ;;  %v6066_v59 = vpop.f32.mrf.mxu0  ;;  %3236 = vmatpush2.bf16.msra.mxu0 %v4713_v8 }
 0x280   : > { %7396 = vst [vmem:[#allocation31_spill] sm:$0xff] %v6064_v50  ;;  %3237 = vmatprep.subr.bf16.mxu0 %v7290_v63 }
 0x281   : > { %v1974_v10 = vpop.f32.mrf.mxu1  ;;  %v2224_v45 = vpop.f32.mrf.mxu0 }
 0x283   : > { %v6071_v33 = vpop.f32.mrf.mxu1  ;;  %v6073_v40 = vpop.f32.mrf.mxu0 }
 0x284   : > { %7397 = vst [vmem:[#allocation32_spill] sm:$0xff] %v6071_v33 }
 0x285   : > { %v1979_v27 = vpop.f32.mrf.mxu1  ;;  %v2227_v3 = vpop.f32.mrf.mxu0 }
 0x287   : > { %v6076_v6 = vpop.f32.mrf.mxu1  ;;  %v6078_v9 = vpop.f32.mrf.mxu0 }
 0x288   : > { %7398 = vst [vmem:[#allocation33_spill] sm:$0xff] %v6076_v6  ;;  %7399 = vst [vmem:[#allocation34_spill] sm:$0xff] %v6078_v9  ;;  %v4712_v6 = vld [vmem:[%s7191_s5 + $0xf8] sm:$0xff]  }
 0x289   : > { %v1982_v53 = vpop.f32.mrf.mxu1  ;;  %v2232_v39 = vpop.f32.mrf.mxu0  ;;  %3465 = vmatpush1.bf16.msra.mxu1 %v4712_v6  ;;  %v4715_v6 = vld [vmem:[%s7191_s5 + $0xe8] sm:$0xff]  }
 0x28a   : > { %3466 = vmatprep.subr.bf16.mxu1 %v7290_v63 }
 0x28b   : > { %v6080_v62 = vpop.f32.mrf.mxu1  ;;  %v6082_v50 = vpop.f32.mrf.mxu0 }
 0x28c   : > { %7400 = vst [vmem:[#allocation35_spill] sm:$0xff] %v6080_v62  ;;  %7401 = vst [vmem:[#allocation36_spill] sm:$0xff] %v6082_v50 }
 0x28d   : > { %v1987_v10 = vpop.f32.mrf.mxu1  ;;  %v2235_v45 = vpop.f32.mrf.mxu0 }
 0x28f   : > { %v6087_v33 = vpop.f32.mrf.mxu1  ;;  %v6089_v27 = vpop.f32.mrf.mxu0 }
 0x290   : > { %7402 = vst [vmem:[#allocation37_spill] sm:$0xff] %v6087_v33  ;;  %7403 = vst [vmem:[#allocation38_spill] sm:$0xff] %v6089_v27 }
 0x291   : > { %v1990_v3 = vpop.f32.mrf.mxu1  ;;  %v2240_v53 = vpop.f32.mrf.mxu0 }
 0x292   : > { %v4714_v53 = vld [vmem:[%s7191_s5 + $0xf0] sm:$0xff]  }
 0x293   : > { %v6092_v39 = vpop.f32.mrf.mxu1  ;;  %v6094_v62 = vpop.f32.mrf.mxu0  ;;  %3467 = vmatpush1.bf16.msra.mxu1 %v4714_v53 }
 0x294   : > { %7404 = vst [vmem:[#allocation39_spill] sm:$0xff] %v6092_v39  ;;  %7405 = vst [vmem:[#allocation40_spill] sm:$0xff] %v6094_v62  ;;  %3468 = vmatprep.subr.bf16.mxu1 %v7290_v63 }
 0x295   : > { %v1995_v10 = vpop.f32.mrf.mxu1  ;;  %v2243_v45 = vpop.f32.mrf.mxu0 }
 0x297   : > { %v6102_v33 = vpop.f32.mrf.mxu1  ;;  %v6104_v3 = vpop.f32.mrf.mxu0  ;;  %3469 = vmatpush1.bf16.msra.mxu1 %v4715_v6  ;;  %v4718_v6 = vld [vmem:[%s7191_s5 + $0xd8] sm:$0xff]  }
 0x298   : > { %7406 = vst [vmem:[#allocation41_spill] sm:$0xff] %v6102_v33  ;;  %7407 = vst [vmem:[#allocation42_spill] sm:$0xff] %v6104_v3  ;;  %3470 = vmatprep.subr.bf16.mxu1 %v7290_v63 }
 0x299   : > { %v1998_v39 = vpop.f32.mrf.mxu1  ;;  %v2248_v62 = vpop.f32.mrf.mxu0 }
 0x29a   : > { %v4716_v62 = vld [vmem:[%s7191_s5 + $0x50] sm:$0xff]   ;;  %v4717_v39 = vld [vmem:[%s7191_s5 + $0xe0] sm:$0xff]  }
 0x29b   : > { %v6111_v27 = vpop.f32.mrf.mxu1  ;;  %v6113_v10 = vpop.f32.mrf.mxu0  ;;  %3238 = vmatpush2.bf16.msra.mxu0 %v4716_v62  ;;  %3471 = vmatpush1.bf16.msra.mxu1 %v4717_v39 }
 0x29c   : > { %7408 = vst [vmem:[#allocation43_spill] sm:$0xff] %v6111_v27  ;;  %7409 = vst [vmem:[#allocation44_spill] sm:$0xff] %v6113_v10  ;;  %3472 = vmatprep.subr.bf16.mxu1 %v7290_v63  ;;  %3239 = vmatprep.subr.bf16.mxu0 %v7290_v63 }
 0x29d   : > { %v2003_v8 = vpop.f32.mrf.mxu1  ;;  %v2251_v45 = vpop.f32.mrf.mxu0 }
 0x29f   : > { %v6119_v33 = vpop.f32.mrf.mxu1  ;;  %v6121_v3 = vpop.f32.mrf.mxu0  ;;  %3473 = vmatpush1.bf16.msra.mxu1 %v4718_v6 }
 0x2a0   : > { %7410 = vst [vmem:[#allocation45_spill] sm:$0xff] %v6119_v33  ;;  %7411 = vst [vmem:[#allocation46_spill] sm:$0xff] %v6121_v3  ;;  %v6138_v33 = vld [vmem:[%s7190_s4] ss:$0 sm:$0xff]  ;;  %v4720_v3 = vld [vmem:[%s7191_s5 + $0x48] sm:$0xff]   ;;  %3474 = vmatprep.subr.bf16.mxu1 %v7290_v63 }
 0x2a1   : > { %v2006_v53 = vpop.f32.mrf.mxu1  ;;  %v2256_v27 = vpop.f32.mrf.mxu0  ;;  %3240 = vmatpush2.bf16.msra.mxu0 %v4720_v3 }
 0x2a2   : > { %3241 = vmatprep.subr.bf16.mxu0 %v7290_v63 }
 0x2a3   : > { %v6133_v8 = vpop.f32.mrf.mxu0  ;;  %v2367_v45 = vpop.f32.mrf.mxu1 }
 0x2a4   : > { %7412 = vst [vmem:[#allocation47_spill] sm:$0xff] %v6133_v8  ;;  %v2494_v27 = vadd.f32 %v2367_v45, %v5946_v14  ;;  %v4719_v8 = vld [vmem:[%s7191_s5 + $0xd0] sm:$0xff]   ;;  %v4721_v45 = vld [vmem:[%s7191_s5 + $0xc8] sm:$0xff]  }
 0x2a5   : > { %v2259_v62 = vpop.f32.mrf.mxu0  ;;  %v2369_v39 = vpop.f32.mrf.mxu1  ;;  %3475 = vmatpush1.bf16.msra.mxu1 %v4719_v8 }
 0x2a6   : > { %v2533_v53 = vadd.f32 %v6138_v33, %v2494_v27  ;;  %3476 = vmatprep.subr.bf16.mxu1 %v7290_v63 }
 0x2a7   : > { %v2370_v10 = vpop.f32.mrf.mxu1 }
 0x2a8   : > { %v2565_v50 = vmax.f32 %v2533_v53, 0.0  ;;  %v2495_v9 = vadd.f32 %v2370_v10, %v5950_v25 }
 0x2a9   : > { %v2372_v14 = vpop.f32.mrf.mxu1  ;;  %3477 = vmatpush1.bf16.msra.mxu1 %v4721_v45  ;;  %v4723_v45 = vld [vmem:[%s7191_s5 + $0x40] sm:$0xff]  }
 0x2aa   : > { %2597 = vst.msk [vmem:[#allocation2] sm:$0xff] %vm7413_vm5, %v2565_v50  ;;  %v2534_v6 = vadd.f32 %v6138_v33, %v2495_v9  ;;  %v4722_v9 = vld [vmem:[%s7191_s5 + $0xc0] sm:$0xff]   ;;  %3478 = vmatprep.subr.bf16.mxu1 %v7290_v63  ;;  %3242 = vmatpush2.bf16.msra.mxu0 %v4723_v45  ;;  %vm7417_vm5 = vmmov %vm7384_vm3 }
 0x2ab   : > { %v2375_v27 = vpop.f32.mrf.mxu1  ;;  %3689 = vmatprep.subr.bf16.mxu0 %v7290_v63 }
 0x2ac   : > { %v2566_v62 = vmax.f32 %v2534_v6, 0.0  ;;  %v2376_v39 = vadd.f32 %v2375_v27, %v5939_v46  ;;  %v4724_v27 = vld [vmem:[%s7191_s5 + $0x118] sm:$0xff]  }
 0x2ad   : > { %v2377_v25 = vpop.f32.mrf.mxu1  ;;  %3479 = vmatpush1.bf16.msra.mxu1 %v4722_v9 }
 0x2ae   : > { %2598 = vst.msk [vmem:[#allocation2 + $0x8] sm:$0xff] %vm7384_vm3, %v2566_v62  ;;  %v2496_v3 = vadd.f32 %v2376_v39, %v5957_v41  ;;  %3488 = vmatprep.subr.bf16.mxu1 %v7290_v63  ;;  %vm7418_vm3 = vcmp.lt.s32.totalorder %v5038_v56, 7 }
 0x2af   : > { %v2378_v50 = vpop.f32.mrf.mxu1 }
 0x2b0   : > { %v2535_v10 = vadd.f32 %v6138_v33, %v2496_v3  ;;  %v2379_v8 = vadd.f32 %v2378_v50, %v5944_v5 }
 0x2b1   : > { %v2380_v53 = vpop.f32.mrf.mxu1  ;;  %v6169_v6 = vld [vmem:[#allocation2] sm:$0xff]  ;;  %3489 = vmatpush2.bf16.msra.mxu1 %v4724_v27  ;;  %v4726_v27 = vld [vmem:[%s7191_s5 + $0x108] sm:$0xff]  }
 0x2b2   : > { %v2567_v14 = vmax.f32 %v2535_v10, 0.0  ;;  %v2497_v46 = vadd.f32 %v2379_v8, %v5961_v30  ;;  %v7250_v25 = vrot.slane %v6169_v6, 7  ;;  %v4725_v8 = vld [vmem:[%s7191_s5 + $0x110] sm:$0xff]   ;;  %3490 = vmatprep.subr.bf16.mxu1 %v7290_v63 }
 0x2b3   : > { %v2383_v41 = vpop.f32.mrf.mxu1 }
 0x2b4   : > { %2599 = vst.msk [vmem:[#allocation2 + $0x10] sm:$0xff] %vm7414_vm7, %v2567_v14  ;;  %v2536_v5 = vadd.f32 %v6138_v33, %v2497_v46  ;;  %v2384_v30 = vadd.f32 %v2383_v41, %v5948_v18  ;;  %vm7419_vm7 = vmmov %vm7416_vm9 }
 0x2b5   : > { %v2385_v62 = vpop.f32.mrf.mxu1  ;;  %v2630_v39 = vld [vmem:[#allocation2 + $0x8] sm:$0xff]  ;;  %3491 = vmatpush2.bf16.msra.mxu1 %v4725_v8 }
 0x2b6   : > { %v2568_v3 = vmax.f32 %v2536_v5, 0.0  ;;  %v2498_v9 = vadd.f32 %v2384_v30, %v5968_v35  ;;  %v4570_v50 = vpack.i.bf16 %v2630_v39, %v6169_v6  ;;  %v2662_v10 = vrot.slane %v2630_v39, 7  ;;  %3492 = vmatprep.subr.bf16.mxu1 %v7290_v63 }
 0x2b7   : > { %v2386_v53 = vpop.f32.mrf.mxu1  ;;  %v2758_v5 = vrot.slane %v2630_v39, 1 }
 0x2b8   : > { %2600 = vst.msk [vmem:[#allocation2 + $0x18] sm:$0xff] %vm7415_vm8, %v2568_v3  ;;  %v2537_v18 = vadd.f32 %v6138_v33, %v2498_v9  ;;  %v2387_v14 = vadd.f32 %v2386_v53, %v5955_v0  ;;  %4571 = vrot.lane.b32.xlu0 %v4570_v50, %s4804_s16  ;;  %v6197_v35 = vsel %vm7416_vm9, %v7250_v25, %v2662_v10  ;;  %vm7420_vm8 = vmmov %vm7417_vm5 }
 0x2b9   : > { %v2388_v46 = vpop.f32.mrf.mxu1  ;;  %3493 = vmatpush2.bf16.msra.mxu1 %v4726_v27  ;;  %vm7421_vm9 = vmmov %vm7418_vm3 }
 0x2ba   : > { %v2569_v41 = vmax.f32 %v2537_v18, 0.0  ;;  %v2499_v45 = vadd.f32 %v2387_v14, %v5972_v28  ;;  %v7249_v28 = vrot.slane %v6169_v6, 1  ;;  %3494 = vmatprep.subr.bf16.mxu1 %v7290_v63 }
 0x2bb   : > { %v2391_v30 = vpop.f32.mrf.mxu1  ;;  %v2631_v0 = vld [vmem:[#allocation2 + $0x10] sm:$0xff] }
 0x2bc   : > { %2601 = vst.msk [vmem:[#allocation2 + $0x20] sm:$0xff] %vm7417_vm5, %v2569_v41  ;;  %v2538_v62 = vadd.f32 %v6138_v33, %v2499_v45  ;;  %v2392_v3 = vadd.f32 %v2391_v30, %v5959_v15  ;;  %v2663_v9 = vrot.slane %v2631_v0, 7  ;;  %v2759_v50 = vrot.slane %v2631_v0, 1  ;;  %v4728_v15 = vld [vmem:[%s7191_s5 + $0x100] sm:$0xff]  }
 0x2bd   : > { %v2393_v8 = vpop.f32.mrf.mxu1  ;;  %3495 = vmatpush2.bf16.msra.mxu1 %v4728_v15 }
 0x2be   : > { %v2570_v53 = vmax.f32 %v2538_v62, 0.0  ;;  %v2500_v18 = vadd.f32 %v2392_v3, %v5982_v13  ;;  %v2818_v39 = vsel %vm7418_vm3, %v2758_v5, %v2759_v50  ;;  %v6213_v14 = vsel %vm7419_vm7, %v2662_v10, %v2663_v9  ;;  %vm7424_vm3 = vmmov %vm7417_vm5 }
 0x2bf   : > { %v2394_v46 = vpop.f32.mrf.mxu1  ;;  %v2632_v41 = vld [vmem:[#allocation2 + $0x18] sm:$0xff]  ;;  %v2822_v45 = vsel %vm5084_vm4, %v2818_v39, 0.0  ;;  %v2819_v10 = vsel %vm7421_vm9, %v7249_v28, %v2758_v5  ;;  %vm7423_vm4 = vmmov %vm7419_vm7 }
 0x2c0   : > { %2602 = vst.msk [vmem:[#allocation2 + $0x28] sm:$0xff] %vm7420_vm8, %v2570_v53  ;;  %v2539_v13 = vadd.f32 %v6138_v33, %v2500_v18  ;;  %v2395_v27 = vadd.f32 %v2394_v46, %v5966_v23  ;;  %v2664_v30 = vrot.slane %v2632_v41, 7  ;;  %v4575_v3 = vpack.i.bf16 %v2632_v41, %v2631_v0  ;;  %vm7425_vm7 = vmmov %vm7421_vm9 }
 0x2c1   : > { %v2396_v62 = vpop.f32.mrf.mxu1  ;;  %v6228_v8 = vpack.c.bf16 %v2822_v45, %v2819_v10  ;;  %v2760_v18 = vrot.slane %v2632_v41, 1  ;;  %vm7426_vm8 = vmmov %vm7423_vm4 }
 0x2c2   : > { %v2571_v26 = vmax.f32 %v2539_v13, 0.0  ;;  %v2501_v39 = vadd.f32 %v2395_v27, %v5987_v51  ;;  %v6233_v53 = vsel %vm7423_vm4, %v2663_v9, %v2664_v30  ;;  %4576 = vrot.lane.b32.xlu1 %v4575_v3, %s4804_s16  ;;  %vm7427_vm9 = vmmov %vm7425_vm7 }
 0x2c3   : > { %7422 = vst [vmem:[#allocation48_spill] sm:$0xff] %v6228_v8  ;;  %4286 = vmatprep.mubr.msk.bf16.mxu0 %vm7417_vm5, %v6228_v8  ;;  %v2399_v23 = vpop.f32.mrf.mxu1  ;;  %v2633_v5 = vld [vmem:[#allocation2 + $0x20] sm:$0xff]  ;;  %v2817_v3 = vsel %vm7427_vm9, %v2759_v50, %v2760_v18  ;;  %vm7428_vm4 = vmmov %vm7424_vm3 }
 0x2c4   : > { %2603 = vst.msk [vmem:[#allocation2 + $0x30] sm:$0xff] %vm7424_vm3, %v2571_v26  ;;  %v2540_v0 = vadd.f32 %v6138_v33, %v2501_v39  ;;  %v2400_v46 = vadd.f32 %v2399_v23, %v5970_v38  ;;  %v2665_v51 = vrot.slane %v2633_v5, 7  ;;  %v2761_v45 = vrot.slane %v2633_v5, 1  ;;  %vm7429_vm5 = vmmov %vm7425_vm7 }
 0x2c5   : > { %v2401_v13 = vpop.f32.mrf.mxu1 }
 0x2c6   : > { %v2572_v9 = vmax.f32 %v2540_v0, 0.0  ;;  %v2502_v15 = vadd.f32 %v2400_v46, %v5994_v22  ;;  %v2816_v41 = vsel %vm7425_vm7, %v2760_v18, %v2761_v45  ;;  %v6246_v27 = vsel %vm7426_vm8, %v2664_v30, %v2665_v51  ;;  %vm7431_vm7 = vmmov %vm7424_vm3 }
 0x2c7   : > { %v2402_v10 = vpop.f32.mrf.mxu1  ;;  %v2634_v62 = vld [vmem:[#allocation2 + $0x28] sm:$0xff]  ;;  %v2824_v38 = vsel %vm5114_vm6, %v2816_v41, 0.0  ;;  %vm7430_vm6 = vmmov %vm7426_vm8 }
 0x2c8   : > { %2604 = vst.msk [vmem:[#allocation2 + $0x38] sm:$0xff] %vm7428_vm4, %v2572_v9  ;;  %v2541_v26 = vadd.f32 %v6138_v33, %v2502_v15  ;;  %v2403_v22 = vadd.f32 %v2402_v10, %v5980_v12  ;;  %v2666_v39 = vrot.slane %v2634_v62, 7  ;;  %v2762_v23 = vrot.slane %v2634_v62, 1  ;;  %vm7432_vm8 = vmmov %vm7429_vm5 }
 0x2c9   : > { %v2404_v0 = vpop.f32.mrf.mxu1  ;;  %v4580_v46 = vpack.i.bf16 %v2634_v62, %v2633_v5  ;;  %v6255_v30 = vpack.c.bf16 %v2824_v38, %v2817_v3  ;;  %vm7433_vm9 = vmmov %vm7430_vm6 }
 0x2ca   : > { %v2573_v13 = vmax.f32 %v2541_v26, 0.0  ;;  %v2503_v28 = vadd.f32 %v2403_v22, %v6001_v20  ;;  %v2815_v50 = vsel %vm7429_vm5, %v2761_v45, %v2762_v23  ;;  %v6262_v42 = vsel %vm7430_vm6, %v2665_v51, %v2666_v39  ;;  %vm7434_vm4 = vmmov %vm7424_vm3 }
 0x2cb   : > { %4581 = vrot.lane.b32.xlu0 %v4580_v46, %s4804_s16  ;;  %4337 = vmatprep.mubr.msk.bf16.mxu1 %vm7424_vm3, %v6255_v30  ;;  %v2407_v12 = vpop.f32.mrf.mxu1  ;;  %v2635_v18 = vld [vmem:[#allocation2 + $0x30] sm:$0xff] }
 0x2cc   : > { %2605 = vst.msk [vmem:[#allocation2 + $0x40] sm:$0xff] %vm7431_vm7, %v2573_v13  ;;  %v2542_v5 = vadd.f32 %v6138_v33, %v2503_v28  ;;  %v2408_v20 = vadd.f32 %v2407_v12, %v5985_v19  ;;  %v2667_v9 = vrot.slane %v2635_v18, 7  ;;  %v2763_v15 = vrot.slane %v2635_v18, 1  ;;  %vm7438_vm7 = vmmov %vm7433_vm9 }
 0x2cd   : > { %v2409_v45 = vpop.f32.mrf.mxu1 }
 0x2ce   : > { %v2574_v41 = vmax.f32 %v2542_v5, 0.0  ;;  %v2504_v51 = vadd.f32 %v2408_v20, %v6009_v54  ;;  %v2814_v10 = vsel %vm7432_vm8, %v2762_v23, %v2763_v15  ;;  %v6275_v62 = vsel %vm7433_vm9, %v2666_v39, %v2667_v9  ;;  %vm7439_vm8 = vmmov %vm7434_vm4 }
 0x2cf   : > { %v2410_v3 = vpop.f32.mrf.mxu1  ;;  %v2636_v38 = vld [vmem:[#allocation2 + $0x38] sm:$0xff]  ;;  %v2826_v28 = vsel %vm5285_vm10, %v2814_v10, 0.0  ;;  %vm7435_vm10 = vmmov %vm7430_vm6 }
 0x2d0   : > { %2606 = vst.msk [vmem:[#allocation2 + $0x48] sm:$0xff] %vm7434_vm4, %v2574_v41  ;;  %v2543_v19 = vadd.f32 %v6138_v33, %v2504_v51  ;;  %v2411_v26 = vadd.f32 %v2410_v3, %v5992_v17  ;;  %v2668_v22 = vrot.slane %v2636_v38, 7  ;;  %v2764_v54 = vrot.slane %v2636_v38, 1  ;;  %vm7436_vm6 = vmmov %vm7424_vm3 }
 0x2d1   : > { %v2412_v0 = vpop.f32.mrf.mxu1  ;;  %v4585_v46 = vpack.i.bf16 %v2636_v38, %v2635_v18  ;;  %v6282_v23 = vpack.c.bf16 %v2826_v28, %v2815_v50  ;;  %vm7437_vm3 = vmmov %vm7429_vm5 }
 0x2d2   : > { %v2575_v13 = vmax.f32 %v2543_v19, 0.0  ;;  %v2505_v39 = vadd.f32 %v2411_v26, %v6016_v4  ;;  %v2813_v12 = vsel %vm7429_vm5, %v2763_v15, %v2764_v54  ;;  %v6289_v55 = vsel %vm7435_vm10, %v2667_v9, %v2668_v22  ;;  %vm7440_vm9 = vmmov %vm7437_vm3 }
 0x2d3   : > { %4586 = vrot.lane.b32.xlu1 %v4585_v46, %s4804_s16  ;;  %v2415_v5 = vpop.f32.mrf.mxu1  ;;  %v2637_v17 = vld [vmem:[#allocation2 + $0x40] sm:$0xff]  ;;  %vm7442_vm5 = vmmov %vm7437_vm3 }
 0x2d4   : > { %2607 = vst.msk [vmem:[#allocation2 + $0x50] sm:$0xff] %vm7436_vm6, %v2575_v13  ;;  %v2544_v18 = vadd.f32 %v6138_v33, %v2505_v39  ;;  %v2416_v50 = vadd.f32 %v2415_v5, %v5999_v49  ;;  %v2669_v20 = vrot.slane %v2637_v17, 7  ;;  %v2765_v45 = vrot.slane %v2637_v17, 1  ;;  %vm7443_vm10 = vmmov %vm7438_vm7 }
 0x2d5   : > { %v2417_v4 = vpop.f32.mrf.mxu1  ;;  %vm7444_vm6 = vmmov %vm7434_vm4 }
 0x2d6   : > { %v2576_v41 = vmax.f32 %v2544_v18, 0.0  ;;  %v2506_v15 = vadd.f32 %v2416_v50, %v6022_v21  ;;  %v2812_v9 = vsel %vm7437_vm3, %v2764_v54, %v2765_v45  ;;  %v6300_v51 = vsel %vm7438_vm7, %v2668_v22, %v2669_v20 }
 0x2d7   : > { %v2418_v10 = vpop.f32.mrf.mxu1  ;;  %v2638_v3 = vld [vmem:[#allocation2 + $0x48] sm:$0xff]  ;;  %v2828_v38 = vsel %vm5345_vm12, %v2812_v9, 0.0  ;;  %vm7441_vm12 = vmmov %vm7438_vm7 }
 0x2d8   : > { %2608 = vst.msk [vmem:[#allocation2 + $0x58] sm:$0xff] %vm7439_vm8, %v2576_v41  ;;  %v2545_v49 = vadd.f32 %v6138_v33, %v2506_v15  ;;  %v2419_v28 = vadd.f32 %v2418_v10, %v6007_v61  ;;  %v2670_v19 = vrot.slane %v2638_v3, 7  ;;  %v2766_v21 = vrot.slane %v2638_v3, 1  ;;  %vm7447_vm8 = vmmov %vm7437_vm3 }
 0x2d9   : > { %v2420_v26 = vpop.f32.mrf.mxu1  ;;  %v4590_v0 = vpack.i.bf16 %v2638_v3, %v2637_v17  ;;  %v6307_v54 = vpack.c.bf16 %v2828_v38, %v2813_v12 }
 0x2da   : > { %v2577_v46 = vmax.f32 %v2545_v49, 0.0  ;;  %v2507_v22 = vadd.f32 %v2419_v28, %v6026_v47  ;;  %v2811_v13 = vsel %vm7440_vm9, %v2765_v45, %v2766_v21  ;;  %v6314_v52 = vsel %vm7441_vm12, %v2669_v20, %v2670_v19  ;;  %vm7448_vm9 = vmmov %vm7443_vm10 }
 0x2db   : > { %4591 = vrot.lane.b32.xlu0 %v4590_v0, %s4804_s16  ;;  %v2423_v39 = vpop.f32.mrf.mxu1  ;;  %v2639_v61 = vld [vmem:[#allocation2 + $0x50] sm:$0xff]  ;;  %vm7449_vm12 = vmmov %vm7434_vm4 }
 0x2dc   : > { %2609 = vst.msk [vmem:[#allocation2 + $0x60] sm:$0xff] %vm7434_vm4, %v2577_v46  ;;  %v2546_v5 = vadd.f32 %v6138_v33, %v2507_v22  ;;  %v2424_v12 = vadd.f32 %v2423_v39, %v6014_v11  ;;  %v2671_v17 = vrot.slane %v2639_v61, 7  ;;  %v2767_v18 = vrot.slane %v2639_v61, 1 }
 0x2dd   : > { %v2425_v47 = vpop.f32.mrf.mxu1 }
 0x2de   : > { %v2578_v50 = vmax.f32 %v2546_v5, 0.0  ;;  %v2508_v45 = vadd.f32 %v2424_v12, %v6033_v7  ;;  %v2810_v20 = vsel %vm7442_vm5, %v2766_v21, %v2767_v18  ;;  %v6325_v4 = vsel %vm7443_vm10, %v2670_v19, %v2671_v17  ;;  %vm7452_vm5 = vmmov %vm7444_vm6 }
 0x2df   : > { %v2426_v41 = vpop.f32.mrf.mxu1  ;;  %v2640_v15 = vld [vmem:[#allocation2 + $0x58] sm:$0xff]  ;;  %v2830_v9 = vsel %vm5395_vm14, %v2810_v20, 0.0  ;;  %vm7445_vm14 = vmmov %vm7438_vm7 }
 0x2e0   : > { %2610 = vst.msk [vmem:[#allocation2 + $0x68] sm:$0xff] %vm7444_vm6, %v2578_v50  ;;  %v2547_v11 = vadd.f32 %v6138_v33, %v2508_v45  ;;  %v2427_v10 = vadd.f32 %v2426_v41, %v6020_v31  ;;  %v2672_v3 = vrot.slane %v2640_v15, 7  ;;  %v2768_v7 = vrot.slane %v2640_v15, 1  ;;  %vm7446_vm7 = vmmov %vm7434_vm4 }
 0x2e1   : > { %v2428_v38 = vpop.f32.mrf.mxu1  ;;  %v4595_v49 = vpack.i.bf16 %v2640_v15, %v2639_v61  ;;  %v6332_v28 = vpack.c.bf16 %v2830_v9, %v2811_v13  ;;  %vm7450_vm4 = vmmov %vm7437_vm3 }
 0x2e2   : > { %v2579_v21 = vmax.f32 %v2547_v11, 0.0  ;;  %v2509_v19 = vadd.f32 %v2427_v10, %v6038_v57  ;;  %v2809_v26 = vsel %vm7437_vm3, %v2767_v18, %v2768_v7  ;;  %v6339_v60 = vsel %vm7445_vm14, %v2671_v17, %v2672_v3  ;;  %vm7453_vm10 = vmmov %vm7437_vm3 }
 0x2e3   : > { %4596 = vrot.lane.b32.xlu1 %v4595_v49, %s4804_s16  ;;  %v2431_v0 = vpop.f32.mrf.mxu1  ;;  %v2641_v31 = vld [vmem:[#allocation2 + $0x60] sm:$0xff]  ;;  %vm7455_vm3 = vmmov %vm7452_vm5 }
 0x2e4   : > { %2611 = vst.msk [vmem:[#allocation2 + $0x70] sm:$0xff] %vm7446_vm7, %v2579_v21  ;;  %v2548_v46 = vadd.f32 %v6138_v33, %v2509_v19  ;;  %v2432_v22 = vadd.f32 %v2431_v0, %v6024_v37  ;;  %v2673_v13 = vrot.slane %v2641_v31, 7  ;;  %v2769_v39 = vrot.slane %v2641_v31, 1  ;;  %vm7456_vm14 = vmmov %vm7450_vm4 }
 0x2e5   : > { %v2433_v57 = vpop.f32.mrf.mxu1  ;;  %vm7458_vm7 = vmmov %vm7455_vm3 }
 0x2e6   : > { %v2580_v61 = vmax.f32 %v2548_v46, 0.0  ;;  %v2510_v5 = vadd.f32 %v2432_v22, %v6045_v24  ;;  %v2808_v12 = vsel %vm7447_vm8, %v2768_v7, %v2769_v39  ;;  %v6350_v17 = vsel %vm7448_vm9, %v2672_v3, %v2673_v13  ;;  %vm7459_vm8 = vmmov %vm7450_vm4 }
 0x2e7   : > { %v2434_v18 = vpop.f32.mrf.mxu1  ;;  %v2642_v47 = vld [vmem:[#allocation2 + $0x68] sm:$0xff]  ;;  %v2832_v50 = vsel %vm5445_vm0, %v2808_v12, 0.0  ;;  %vm7451_vm0 = vmmov %vm7448_vm9 }
 0x2e8   : > { %2612 = vst.msk [vmem:[#allocation2 + $0x78] sm:$0xff] %vm7449_vm12, %v2580_v61  ;;  %v2549_v37 = vadd.f32 %v6138_v33, %v2510_v5  ;;  %v2435_v45 = vadd.f32 %v2434_v18, %v6031_v36  ;;  %v2674_v20 = vrot.slane %v2642_v47, 7  ;;  %v2770_v24 = vrot.slane %v2642_v47, 1  ;;  %vm7454_vm6 = vmmov %vm7451_vm0 }
 0x2e9   : > { %v2436_v41 = vpop.f32.mrf.mxu1  ;;  %v4600_v15 = vpack.i.bf16 %v2642_v47, %v2641_v31  ;;  %v6357_v9 = vpack.c.bf16 %v2832_v50, %v2809_v26  ;;  %vm7460_vm9 = vmmov %vm7451_vm0 }
 0x2ea   : > { %v2581_v11 = vmax.f32 %v2549_v37, 0.0  ;;  %v2511_v10 = vadd.f32 %v2435_v45, %v6050_v29  ;;  %v2807_v3 = vsel %vm7450_vm4, %v2769_v39, %v2770_v24  ;;  %v6364_v1 = vsel %vm7451_vm0, %v2673_v13, %v2674_v20  ;;  %vm7462_vm12 = vmmov %vm7455_vm3 }
 0x2eb   : > { %4601 = vrot.lane.b32.xlu0 %v4600_v15, %s4804_s16  ;;  %v2439_v7 = vpop.f32.mrf.mxu1  ;;  %v2643_v36 = vld [vmem:[#allocation2 + $0x70] sm:$0xff] }
 0x2ec   : > { %2613 = vst.msk [vmem:[#allocation2 + $0x80] sm:$0xff] %vm7452_vm5, %v2581_v11  ;;  %v2550_v38 = vadd.f32 %v6138_v33, %v2511_v10  ;;  %v2440_v49 = vadd.f32 %v2439_v7, %v6036_v44  ;;  %v2675_v21 = vrot.slane %v2643_v36, 7  ;;  %v2771_v19 = vrot.slane %v2643_v36, 1  ;;  %vm7466_vm5 = vmmov %vm7450_vm4 }
 0x2ed   : > { %v2441_v29 = vpop.f32.mrf.mxu1 }
 0x2ee   : > { %v2582_v26 = vmax.f32 %v2550_v38, 0.0  ;;  %v2512_v0 = vadd.f32 %v2440_v49, %v6054_v34  ;;  %v2806_v31 = vsel %vm7453_vm10, %v2770_v24, %v2771_v19  ;;  %v6375_v46 = vsel %vm7454_vm6, %v2674_v20, %v2675_v21 }
 0x2ef   : > { %v2442_v22 = vpop.f32.mrf.mxu1  ;;  %v2644_v13 = vld [vmem:[#allocation2 + $0x78] sm:$0xff]  ;;  %v2834_v39 = vsel %vm5495_vm2, %v2806_v31, 0.0  ;;  %vm7457_vm2 = vmmov %vm7451_vm0 }
 0x2f0   : > { %2614 = vst.msk [vmem:[#allocation2 + $0x88] sm:$0xff] %vm7455_vm3, %v2582_v26  ;;  %v2551_v44 = vadd.f32 %v6138_v33, %v2512_v0  ;;  %v2443_v57 = vadd.f32 %v2442_v22, %v6043_v43  ;;  %v2676_v61 = vrot.slane %v2644_v13, 7  ;;  %v2772_v34 = vrot.slane %v2644_v13, 1 }
 0x2f1   : > { %v2444_v5 = vpop.f32.mrf.mxu1  ;;  %v4605_v12 = vpack.i.bf16 %v2644_v13, %v2643_v36  ;;  %v6382_v18 = vpack.c.bf16 %v2834_v39, %v2807_v3 }
 0x2f2   : > { %v2583_v47 = vmax.f32 %v2551_v44, 0.0  ;;  %v2513_v50 = vadd.f32 %v2443_v57, %v6061_v48  ;;  %v2805_v37 = vsel %vm7456_vm14, %v2771_v19, %v2772_v34  ;;  %v6389_v2 = vsel %vm7457_vm2, %v2675_v21, %v2676_v61  ;;  %vm7473_vm14 = vmmov %vm7450_vm4 }
 0x2f3   : > { %4606 = vrot.lane.b32.xlu1 %v4605_v12, %s4804_s16  ;;  %v2447_v45 = vpop.f32.mrf.mxu1  ;;  %v2645_v43 = vld [vmem:[#allocation2 + $0x80] sm:$0xff] }
 0x2f4   : > { %2615 = vst.msk [vmem:[#allocation2 + $0x90] sm:$0xff] %vm7458_vm7, %v2583_v47  ;;  %v2552_v20 = vadd.f32 %v6138_v33, %v2513_v50  ;;  %v2448_v24 = vadd.f32 %v2447_v45, %v6048_v16  ;;  %v2677_v41 = vrot.slane %v2645_v43, 7  ;;  %v2773_v15 = vrot.slane %v2645_v43, 1  ;;  %v7465_v50 = vld [vmem:[#allocation34_spill] sm:$0xff] }
 0x2f5   : > { %v2449_v48 = vpop.f32.mrf.mxu1 }
 0x2f6   : > { %v2584_v11 = vmax.f32 %v2552_v20, 0.0  ;;  %v2514_v10 = vadd.f32 %v2448_v24, %v6066_v59  ;;  %v2804_v3 = vsel %vm7459_vm8, %v2772_v34, %v2773_v15  ;;  %v6400_v7 = vsel %vm7460_vm9, %v2676_v61, %v2677_v41  ;;  %v7471_v48 = vld [vmem:[#allocation31_spill] sm:$0xff]  ;;  %vm7478_vm8 = vmmov %vm7450_vm4 }
 0x2f7   : > { %v2450_v36 = vpop.f32.mrf.mxu1  ;;  %v2646_v38 = vld [vmem:[#allocation2 + $0x88] sm:$0xff]  ;;  %v2836_v21 = vsel %vm5545_vm1, %v2804_v3, 0.0  ;;  %vm7463_vm1 = vmmov %vm7451_vm0 }
 0x2f8   : > { %2616 = vst.msk [vmem:[#allocation2 + $0x98] sm:$0xff] %vm7462_vm12, %v2584_v11  ;;  %v2553_v16 = vadd.f32 %v6138_v33, %v2514_v10  ;;  %v2451_v19 = vadd.f32 %v2450_v36, %v6052_v32  ;;  %v2678_v29 = vrot.slane %v2646_v38, 7  ;;  %v2774_v59 = vrot.slane %v2646_v38, 1  ;;  %vm7464_vm0 = vmmov %vm7455_vm3 }
 0x2f9   : > { %v2452_v26 = vpop.f32.mrf.mxu1  ;;  %v4610_v0 = vpack.i.bf16 %v2646_v38, %v2645_v43  ;;  %v6407_v31 = vpack.c.bf16 %v2836_v21, %v2805_v37  ;;  %vm7467_vm10 = vmmov %vm7463_vm1 }
 0x2fa   : > { %v2585_v22 = vmax.f32 %v2553_v16, 0.0  ;;  %v2515_v13 = vadd.f32 %v2451_v19, %v6073_v40  ;;  %v2803_v39 = vsel %vm7450_vm4, %v2773_v15, %v2774_v59  ;;  %v6414_v44 = vsel %vm7463_vm1, %v2677_v41, %v2678_v29  ;;  %v7468_v41 = vld [vmem:[#allocation15_spill] sm:$0xff]  ;;  %vm7470_vm3 = vmmov %vm7464_vm0  ;;  %v7472_v16 = vld [vmem:[#allocation36_spill] sm:$0xff] }
 0x2fb   : > { %4611 = vrot.lane.b32.xlu0 %v4610_v0, %s4804_s16  ;;  %v2455_v57 = vpop.f32.mrf.mxu1  ;;  %v2647_v32 = vld [vmem:[#allocation2 + $0x90] sm:$0xff]  ;;  %vm7469_vm6 = vnez %v7468_v41  ;;  %vm7474_vm2 = vmmov %vm7463_vm1  ;;  %v7483_v41 = vld [vmem:[#allocation33_spill] sm:$0xff] }
 0x2fc   : > { %2617 = vst.msk [vmem:[#allocation2 + $0xa0] sm:$0xff] %vm7464_vm0, %v2585_v22  ;;  %v2554_v61 = vadd.f32 %v6138_v33, %v2515_v13  ;;  %v2456_v34 = vadd.f32 %v2455_v57, %v6059_v58  ;;  %v2679_v5 = vrot.slane %v2647_v32, 7  ;;  %v2775_v12 = vrot.slane %v2647_v32, 1  ;;  %vm7475_vm7 = vmmov %vm7464_vm0  ;;  %v7476_v13 = vld [vmem:[#allocation32_spill] sm:$0xff] }
 0x2fd   : > { %v2457_v40 = vpop.f32.mrf.mxu1  ;;  %vm7479_vm9 = vmmov %vm7463_vm1 }
 0x2fe   : > { %v2586_v47 = vmax.f32 %v2554_v61, 0.0  ;;  %v2516_v37 = vadd.f32 %v2456_v34, %v7465_v50  ;;  %v2802_v45 = vsel %vm7466_vm5, %v2774_v59, %v2775_v12  ;;  %v6425_v43 = vsel %vm7467_vm10, %v2678_v29, %v2679_v5  ;;  %v7477_v40 = vld [vmem:[#allocation38_spill] sm:$0xff]  ;;  %vm7482_vm4 = vmmov %vm7464_vm0 }
 0x2ff   : > { %v2458_v20 = vpop.f32.mrf.mxu1  ;;  %v2648_v24 = vld [vmem:[#allocation2 + $0x98] sm:$0xff]  ;;  %v2838_v15 = vsel %vm7469_vm6, %v2802_v45, 0.0  ;;  %vm7485_vm1 = vmmov %vm7466_vm5 }
 0x300   : > { %2618 = vst.msk [vmem:[#allocation2 + $0xa8] sm:$0xff] %vm7470_vm3, %v2586_v47  ;;  %v2555_v58 = vadd.f32 %v6138_v33, %v2516_v37  ;;  %v2459_v11 = vadd.f32 %v2458_v20, %v7471_v48  ;;  %v2680_v10 = vrot.slane %v2648_v24, 7  ;;  %v2776_v3 = vrot.slane %v2648_v24, 1  ;;  %v7480_v45 = vld [vmem:[#allocation17_spill] sm:$0xff]  ;;  %vm7486_vm0 = vmmov %vm7474_vm2 }
 0x301   : > { %v2460_v36 = vpop.f32.mrf.mxu1  ;;  %v4615_v38 = vpack.i.bf16 %v2648_v24, %v2647_v32  ;;  %v6432_v49 = vpack.c.bf16 %v2838_v15, %v2803_v39  ;;  %vm7481_vm12 = vnez %v7480_v45  ;;  %vm7487_vm5 = vmmov %vm7470_vm3  ;;  %v7492_v45 = vld [vmem:[#allocation19_spill] sm:$0xff] }
 0x302   : > { %v2587_v21 = vmax.f32 %v2555_v58, 0.0  ;;  %v2517_v19 = vadd.f32 %v2459_v11, %v7472_v16  ;;  %v2801_v29 = vsel %vm7473_vm14, %v2775_v12, %v2776_v3  ;;  %v6439_v59 = vsel %vm7474_vm2, %v2679_v5, %v2680_v10  ;;  %vm7490_vm10 = vmmov %vm7485_vm1 }
 0x303   : > { %4616 = vrot.lane.b32.xlu1 %v4615_v38, %s4804_s16  ;;  %v2463_v26 = vpop.f32.mrf.mxu1  ;;  %v2649_v0 = vld [vmem:[#allocation2 + $0xa0] sm:$0xff]  ;;  %vm7491_vm6 = vmmov %vm7486_vm0  ;;  %vm7493_vm3 = vnez %v7492_v45 }
 0x304   : > { %2619 = vst.msk [vmem:[#allocation2 + $0xb0] sm:$0xff] %vm7475_vm7, %v2587_v21  ;;  %v2556_v22 = vadd.f32 %v6138_v33, %v2517_v19  ;;  %v2464_v39 = vadd.f32 %v2463_v26, %v7476_v13  ;;  %v2681_v57 = vrot.slane %v2649_v0, 7  ;;  %v2777_v32 = vrot.slane %v2649_v0, 1  ;;  %vm7494_vm14 = vmmov %vm7482_vm4 }
 0x305   : > { %v2465_v61 = vpop.f32.mrf.mxu1  ;;  %vm7497_vm2 = vmmov %vm7485_vm1 }
 0x306   : > { %v2588_v34 = vmax.f32 %v2556_v22, 0.0  ;;  %v2518_v12 = vadd.f32 %v2464_v39, %v7477_v40  ;;  %v2800_v5 = vsel %vm7478_vm8, %v2776_v3, %v2777_v32  ;;  %v6450_v47 = vsel %vm7479_vm9, %v2680_v10, %v2681_v57  ;;  %v7484_v10 = vld [vmem:[#allocation40_spill] sm:$0xff]  ;;  %vm7498_vm7 = vmmov %vm7486_vm0 }
 0x307   : > { %v2466_v50 = vpop.f32.mrf.mxu1  ;;  %v2650_v37 = vld [vmem:[#allocation2 + $0xa8] sm:$0xff]  ;;  %v2840_v20 = vsel %vm7481_vm12, %v2800_v5, 0.0  ;;  %vm7499_vm8 = vmmov %vm7482_vm4 }
 0x308   : > { %2620 = vst.msk [vmem:[#allocation2 + $0xb8] sm:$0xff] %vm7482_vm4, %v2588_v34  ;;  %v2557_v24 = vadd.f32 %v6138_v33, %v2518_v12  ;;  %v2467_v15 = vadd.f32 %v2466_v50, %v7483_v41  ;;  %v2682_v58 = vrot.slane %v2650_v37, 7  ;;  %v2778_v48 = vrot.slane %v2650_v37, 1  ;;  %v7489_v12 = vld [vmem:[#allocation42_spill] sm:$0xff]  ;;  %v7495_v41 = vld [vmem:[#allocation37_spill] sm:$0xff]  ;;  %vm7502_vm9 = vmmov %vm7485_vm1 }
 0x309   : > { %v2468_v11 = vpop.f32.mrf.mxu1  ;;  %v4620_v36 = vpack.i.bf16 %v2650_v37, %v2649_v0  ;;  %v6457_v3 = vpack.c.bf16 %v2840_v20, %v2801_v29  ;;  %v7488_v29 = vld [vmem:[#allocation35_spill] sm:$0xff]  ;;  %vm7503_vm12 = vmmov %vm7486_vm0 }
 0x30a   : > { %v2589_v38 = vmax.f32 %v2557_v24, 0.0  ;;  %v2519_v21 = vadd.f32 %v2467_v15, %v7484_v10  ;;  %v2799_v16 = vsel %vm7485_vm1, %v2777_v32, %v2778_v48  ;;  %v6464_v19 = vsel %vm7486_vm0, %v2681_v57, %v2682_v58  ;;  %vm7506_vm1 = vmmov %vm7487_vm5 }
 0x30b   : > { %4621 = vrot.lane.b32.xlu0 %v4620_v36, %s4804_s16  ;;  %v2471_v26 = vpop.f32.mrf.mxu1  ;;  %v2651_v22 = vld [vmem:[#allocation2 + $0xb0] sm:$0xff]  ;;  %vm7509_vm0 = vmmov %vm7497_vm2 }
 0x30c   : > { %2621 = vst.msk [vmem:[#allocation2 + $0xc0] sm:$0xff] %vm7487_vm5, %v2589_v38  ;;  %v2558_v0 = vadd.f32 %v6138_v33, %v2519_v21  ;;  %v2472_v13 = vadd.f32 %v2471_v26, %v7488_v29  ;;  %v2683_v39 = vrot.slane %v2651_v22, 7  ;;  %v2779_v61 = vrot.slane %v2651_v22, 1  ;;  %vm7510_vm5 = vmmov %vm7491_vm6 }
 0x30d   : > { %v2473_v34 = vpop.f32.mrf.mxu1 }
 0x30e   : > { %v2590_v40 = vmax.f32 %v2558_v0, 0.0  ;;  %v2520_v32 = vadd.f32 %v2472_v13, %v7489_v12  ;;  %v2798_v57 = vsel %vm7490_vm10, %v2778_v48, %v2779_v61  ;;  %v6475_v5 = vsel %vm7491_vm6, %v2682_v58, %v2683_v39  ;;  %v7496_v58 = vld [vmem:[#allocation44_spill] sm:$0xff]  ;;  %vm7511_vm10 = vmmov %vm7506_vm1 }
 0x30f   : > { %v2474_v50 = vpop.f32.mrf.mxu1  ;;  %v2652_v37 = vld [vmem:[#allocation2 + $0xb8] sm:$0xff]  ;;  %v2842_v20 = vsel %vm7493_vm3, %v2798_v57, 0.0  ;;  %vm7513_vm6 = vmmov %vm7509_vm0 }
 0x310   : > { %2622 = vst.msk [vmem:[#allocation2 + $0xc8] sm:$0xff] %vm7494_vm14, %v2590_v40  ;;  %v2559_v24 = vadd.f32 %v6138_v33, %v2520_v32  ;;  %v2475_v15 = vadd.f32 %v2474_v50, %v7495_v41  ;;  %v2684_v11 = vrot.slane %v2652_v37, 7  ;;  %v2780_v36 = vrot.slane %v2652_v37, 1  ;;  %v7504_v41 = vld [vmem:[#allocation21_spill] sm:$0xff]  ;;  %vm7514_vm3 = vmmov %vm7510_vm5 }
 0x311   : > { %v2476_v38 = vpop.f32.mrf.mxu1  ;;  %v4625_v10 = vpack.i.bf16 %v2652_v37, %v2651_v22  ;;  %v6482_v48 = vpack.c.bf16 %v2842_v20, %v2799_v16  ;;  %v7500_v16 = vld [vmem:[#allocation39_spill] sm:$0xff]  ;;  %v7501_v37 = vld [vmem:[#allocation46_spill] sm:$0xff]  ;;  %vm7505_vm4 = vnez %v7504_v41 }
 0x312   : > { %v2591_v21 = vmax.f32 %v2559_v24, 0.0  ;;  %v2521_v26 = vadd.f32 %v2475_v15, %v7496_v58  ;;  %v2797_v0 = vsel %vm7497_vm2, %v2779_v61, %v2780_v36  ;;  %v6489_v29 = vsel %vm7498_vm7, %v2683_v39, %v2684_v11  ;;  %vm7517_vm2 = vmmov %vm7506_vm1 }
 0x313   : > { %4626 = vrot.lane.b32.xlu1 %v4625_v10, %s4804_s16  ;;  %v2479_v13 = vpop.f32.mrf.mxu1  ;;  %v2653_v34 = vld [vmem:[#allocation2 + $0xc0] sm:$0xff]  ;;  %v7507_v10 = vld [vmem:[#allocation41_spill] sm:$0xff]  ;;  %vm7519_vm7 = vmmov %vm7506_vm1 }
 0x314   : > { %2623 = vst.msk [vmem:[#allocation2 + $0xd0] sm:$0xff] %vm7499_vm8, %v2591_v21  ;;  %v2560_v22 = vadd.f32 %v6138_v33, %v2521_v26  ;;  %v2480_v40 = vadd.f32 %v2479_v13, %v7500_v16  ;;  %v2685_v12 = vrot.slane %v2653_v34, 7  ;;  %v2781_v32 = vrot.slane %v2653_v34, 1  ;;  %vm7520_vm8 = vmmov %vm7509_vm0 }
 0x315   : > { %v2481_v57 = vpop.f32.mrf.mxu1 }
 0x316   : > { %v2592_v50 = vmax.f32 %v2560_v22, 0.0  ;;  %v2522_v61 = vadd.f32 %v2480_v40, %v7501_v37  ;;  %v2796_v39 = vsel %vm7502_vm9, %v2780_v36, %v2781_v32  ;;  %v6500_v45 = vsel %vm7503_vm12, %v2684_v11, %v2685_v12  ;;  %v7508_v11 = vld [vmem:[#allocation47_spill] sm:$0xff]  ;;  %vm7521_vm9 = vmmov %vm7514_vm3 }
 0x317   : > { %v2482_v20 = vpop.f32.mrf.mxu1  ;;  %v2654_v24 = vld [vmem:[#allocation2 + $0xc8] sm:$0xff]  ;;  %v2844_v15 = vsel %vm7505_vm4, %v2796_v39, 0.0  ;;  %vm7522_vm12 = vmmov %vm7506_vm1 }
 0x318   : > { %2624 = vst.msk [vmem:[#allocation2 + $0xd8] sm:$0xff] %vm7506_vm1, %v2592_v50  ;;  %v2561_v38 = vadd.f32 %v6138_v33, %v2522_v61  ;;  %v2483_v21 = vadd.f32 %v2482_v20, %v7507_v10  ;;  %v2686_v58 = vrot.slane %v2654_v24, 7  ;;  %v2782_v26 = vrot.slane %v2654_v24, 1  ;;  %vm7523_vm4 = vmmov %vm7509_vm0 }
 0x319   : > { %v2484_v13 = vpop.f32.mrf.mxu1  ;;  %v4630_v22 = vpack.i.bf16 %v2654_v24, %v2653_v34  ;;  %v6507_v36 = vpack.c.bf16 %v2844_v15, %v2797_v0  ;;  %v7512_v0 = vld [vmem:[#allocation43_spill] sm:$0xff]  ;;  %vm7524_vm1 = vmmov %vm7514_vm3 }
 0x31a   : > { %v2593_v16 = vmax.f32 %v2561_v38, 0.0  ;;  %v2523_v40 = vadd.f32 %v2483_v21, %v7508_v11  ;;  %v2795_v57 = vsel %vm7509_vm0, %v2781_v32, %v2782_v26  ;;  %v6514_v37 = vsel %vm7510_vm5, %v2685_v12, %v2686_v58  ;;  %v7515_v13 = vld [vmem:[#allocation23_spill] sm:$0xff]  ;;  %v7518_v11 = vld [vmem:[#allocation45_spill] sm:$0xff]  ;;  %vm7527_vm5 = vmmov %vm7523_vm4 }
 0x31b   : > { %4631 = vrot.lane.b32.xlu0 %v4630_v22, %s4804_s16  ;;  %v2487_v50 = vpop.f32.mrf.mxu1  ;;  %v2655_v61 = vld [vmem:[#allocation2 + $0xd0] sm:$0xff]  ;;  %vm7516_vm14 = vnez %v7515_v13 }
 0x31c   : > { %2625 = vst.msk [vmem:[#allocation2 + $0xe0] sm:$0xff] %vm7511_vm10, %v2593_v16  ;;  %v2562_v34 = vadd.f32 %v6138_v33, %v2523_v40  ;;  %v2488_v39 = vadd.f32 %v2487_v50, %v7512_v0  ;;  %v2687_v20 = vrot.slane %v2655_v61, 7  ;;  %v2783_v24 = vrot.slane %v2655_v61, 1  ;;  %vm7528_vm10 = vmmov %vm7524_vm1 }
 0x31d   : > { %v2489_v41 = vpop.f32.mrf.mxu1 }
 0x31e   : > { %v2594_v15 = vmax.f32 %v2562_v34, 0.0  ;;  %v2563_v32 = vadd.f32 %v6138_v33, %v2488_v39  ;;  %v2794_v12 = vsel %vm7513_vm6, %v2782_v26, %v2783_v24  ;;  %v6525_v38 = vsel %vm7514_vm3, %v2686_v58, %v2687_v20  ;;  %vm7529_vm6 = vmmov %vm7523_vm4 }
 0x31f   : > { %v2490_v10 = vpop.f32.mrf.mxu1  ;;  %v2656_v21 = vld [vmem:[#allocation2 + $0xd8] sm:$0xff]  ;;  %v2846_v22 = vsel %vm7516_vm14, %v2794_v12, 0.0  ;;  %vm7530_vm3 = vmmov %vm7524_vm1 }
 0x320   : > { %2626 = vst.msk [vmem:[#allocation2 + $0xe8] sm:$0xff] %vm7517_vm2, %v2594_v15  ;;  %v2595_v16 = vmax.f32 %v2563_v32, 0.0  ;;  %v2491_v40 = vadd.f32 %v2490_v10, %v7518_v11  ;;  %v2688_v50 = vrot.slane %v2656_v21, 7  ;;  %v2784_v34 = vrot.slane %v2656_v21, 1  ;;  %vm7534_vm2 = vmmov %vm7524_vm1 }
 0x321   : > { %v2492_v0 = vpop.f32.mrf.mxu1  ;;  %v4635_v39 = vpack.i.bf16 %v2656_v21, %v2655_v61  ;;  %v6531_v41 = vpack.c.bf16 %v2846_v22, %v2795_v57 }
 0x322   : > { %2627 = vst.msk [vmem:[#allocation2 + $0xf0] sm:$0xff] %vm7519_vm7, %v2595_v16  ;;  %v2564_v58 = vadd.f32 %v6138_v33, %v2491_v40  ;;  %v2793_v26 = vsel %vm7520_vm8, %v2783_v24, %v2784_v34  ;;  %v6539_v12 = vsel %vm7521_vm9, %v2687_v20, %v2688_v50  ;;  %v7525_v24 = vld [vmem:[#allocation25_spill] sm:$0xff]  ;;  %vm7535_vm7 = vmmov %vm7524_vm1 }
 0x323   : > { %4636 = vrot.lane.b32.xlu1 %v4635_v39, %s4804_s16  ;;  %v2657_v15 = vld [vmem:[#allocation2 + $0xe0] sm:$0xff]  ;;  %vm7526_vm0 = vnez %v7525_v24  ;;  %vm7536_vm8 = vmmov %vm7523_vm4 }
 0x324   : > { %v2596_v32 = vmax.f32 %v2564_v58, 0.0  ;;  %v2689_v10 = vrot.slane %v2657_v15, 7  ;;  %v2785_v13 = vrot.slane %v2657_v15, 1  ;;  %vm7538_vm9 = vmmov %vm7523_vm4 }
 0x326   : > { %2628 = vst.msk [vmem:[#allocation2 + $0xf8] sm:$0xff] %vm7522_vm12, %v2596_v32  ;;  %v2792_v57 = vsel %vm7523_vm4, %v2784_v34, %v2785_v13  ;;  %v6547_v33 = vsel %vm7524_vm1, %v2688_v50, %v2689_v10  ;;  %vm7542_vm4 = vcmask 523264  }
 0x327   : > { %v2658_v61 = vld [vmem:[#allocation2 + $0xe8] sm:$0xff]  ;;  %v2848_v20 = vsel %vm7526_vm0, %v2792_v57, 0.0  ;;  %vm7543_vm1 = vmmov %vm7542_vm4 }
 0x328   : > { %v2690_v21 = vrot.slane %v2658_v61, 7  ;;  %v2786_v22 = vrot.slane %v2658_v61, 1  ;;  %v4640_v16 = vpack.i.bf16 %v2658_v61, %v2657_v15  ;;  %v6551_v11 = vpack.c.bf16 %v2848_v20, %v2793_v26  ;;  %v7531_v61 = vld [vmem:[#allocation27_spill] sm:$0xff] }
 0x329   : > { %v2659_v40 = vld [vmem:[#allocation2 + $0xf0] sm:$0xff]  ;;  %vm7532_vm14 = vnez %v7531_v61 }
 0x32a   : > { %v4572_v0 = vpop.permute.xlu0 %4571  ;;  %4641 = vrot.lane.b32.xlu0 %v4640_v16, %s4804_s16  ;;  %v2691_v39 = vrot.slane %v2659_v40, 7  ;;  %v2787_v58 = vrot.slane %v2659_v40, 1  ;;  %v2791_v34 = vsel %vm7527_vm5, %v2785_v13, %v2786_v22  ;;  %v6558_v50 = vsel %vm7528_vm10, %v2689_v10, %v2690_v21  ;;  %vm7547_vm5 = vmmov %vm7543_vm1  ;;  %v7551_v61 = vld [vmem:[#allocation8_spill] sm:$0xff] }
 0x32b   : > { %v4574_v15 = vunpack.i.h.bf16 %v4572_v0  ;;  %v4573_v8 = vunpack.i.l.bf16 %v4572_v0  ;;  %v7533_v10 = vrot.slane %v6169_v6, 7  ;;  %v7539_v0 = vld [vmem:[#allocation6_spill] sm:$0xff]  ;;  %vm7548_vm10 = vmmov %vm7543_vm1 }
 0x32c   : > { %v2790_v32 = vsel %vm7529_vm6, %v2786_v22, %v2787_v58  ;;  %v6564_v26 = vsel %vm7530_vm3, %v2690_v21, %v2691_v39  ;;  %vm7540_vm12 = vnez %v7539_v0  ;;  %vm7549_vm6 = vmmov %vm7543_vm1 }
 0x32d   : > { %v2660_v57 = vld [vmem:[#allocation2 + $0xf8] sm:$0xff]  ;;  %v2850_v24 = vsel %vm7532_vm14, %v2790_v32, 0.0  ;;  %vm7550_vm3 = vmmov %vm7543_vm1  ;;  %vm7552_vm14 = vnez %v7551_v61 }
 0x32e   : > { %v2692_v20 = vrot.slane %v2660_v57, 7  ;;  %v4645_v16 = vpack.i.bf16 %v2660_v57, %v2659_v40  ;;  %v6568_v25 = vpack.c.bf16 %v2850_v24, %v2791_v34  ;;  %v2788_v13 = vrot.slane %v2660_v57, 1 }
 0x32f   : > { %v7537_v40 = vrot.slane %v6169_v6, 1 }
 0x330   : > { %v2724_v22 = vsel %vm7534_vm2, %v2692_v20, %v7533_v10  ;;  %4646 = vrot.lane.b32.xlu1 %v4645_v16, %s4804_s16  ;;  %v6577_v21 = vsel %vm7535_vm7, %v2691_v39, %v2692_v20  ;;  %v2789_v32 = vsel %vm7536_vm8, %v2787_v58, %v2788_v13  ;;  %v2982_v39 = vsel %vm7543_vm1, %v6197_v35, %v4574_v15  ;;  %v4727_v58 = vld [vmem:[%s7191_s5 + $0x98] sm:$0xff]   ;;  %v4729_v35 = vld [vmem:[%s7191_s5 + $0x90] sm:$0xff]   ;;  %vm7553_vm2 = vmmov %vm7543_vm1  ;;  %s7117_s16 = scalar_lea.vmem [#allocation3], %s4081_s8 }
 0x331   : > { %v2820_v34 = vsel %vm7538_vm9, %v2788_v13, %v7537_v40  ;;  %v2725_v57 = vsel %vm7540_vm12, %v2724_v22, 0.0  ;;  %vm7554_vm7 = vmmov %vm7543_vm1  ;;  %s4015_s13 = sshll.u32 %s7117_s16, 4  ;;  %s7141_s13 = int_to_ptr.vmem [resolvable:$true] %s4015_s13 }
 0x332   : > { %v2852_v24 = vsel %vm5861_vm11, %v2820_v34, 0.0  ;;  %v2981_v16 = vsel %vm7542_vm4, %v2725_v57, %v4573_v8  ;;  %vm7544_vm11 = vmmov %vm7543_vm1  ;;  %v7545_v8 = vld [vmem:[#allocation7_spill] sm:$0xff]  ;;  %s4740_s19 = scalar_lea.vmem %s7141_s13, 2048  ;;  %p4747_p0 = scmp.lt.s32.totalorder %s7141_s13, %s4745_s20 }
 0x333   : > { %v6595_v20 = vpack.c.bf16 %v2852_v24, %v2789_v32  ;;  %v6597_v6 = vpack.c.bf16 %v2982_v39, %v2981_v16  ;;  %vm7546_vm0 = vnez %v7545_v8  ;;  %v4730_v34 = vld [vmem:[%s7191_s5 + $0x88] sm:$0xff]   ;;  %v2729_v24 = vsel %vm7552_vm14, %v6246_v27, 0.0  ;;  %vm7555_vm8 = vmmov %vm7543_vm1  ;;  %p4741_p11 = scmp.ne.s32.totalorder %s7141_s13, %s4740_s19  ;;  %p4748_p1 = scmp.lt.s32.totalorder %s4746_s21, %s4740_s19 }
 0x334   : > { %v4577_v56 = vpop.permute.xlu1 %4576  ;;  %v2727_v15 = vsel %vm7546_vm0, %v6213_v14, 0.0  ;;  %vm7556_vm9 = vmmov %vm7543_vm1 }
 0x335   : > { %3244 = vmatmul.mubr.bf16.vlgmr.msra.gmra.mxu0 %v6597_v6  ;;  %v4579_v13 = vunpack.i.h.bf16 %v4577_v56  ;;  %v4578_v10 = vunpack.i.l.bf16 %v4577_v56  ;;  %v4732_v56 = vld [vmem:[%s7191_s5 + $0x78] sm:$0xff]   ;;  %vm7559_vm4 = vmmov %vm7543_vm1  ;;  %p4742_p12 = pnand %p4741_p11, %p4886_p5  ;;  %p4749_p2 = por %p4748_p1, %p4747_p0 }
 0x336   : > { %3690 = vmatpush1.bf16.msra.mxu0 %v4727_v58  ;;  %4287 = vmatprep.mubr.msk.bf16.mxu0 %vm7544_vm11, %v6255_v30  ;;  %vm7560_vm11 = vmmov %vm7543_vm1 }
 0x337   : > { %3691 = vmatprep.subr.bf16.mxu0 %v7290_v63  ;;  %v2983_v22 = vsel %vm7547_vm5, %v2727_v15, %v4578_v10  ;;  %v2984_v32 = vsel %vm7548_vm10, %v6233_v53, %v4579_v13  ;;  %v4731_v53 = vld [vmem:[%s7191_s5 + $0x80] sm:$0xff]   ;;  %vm7561_vm0 = vmmov %vm7543_vm1  ;;  %p4743_p13 = pneg %p4742_p12 }
 0x338   : > { %v6612_v40 = vpack.c.bf16 %v2984_v32, %v2983_v22  ;;  %vm7564_vm10 = vmmov %vm7561_vm0 }
 0x339   : > { %vm7567_vm14 = vmmov %vm7561_vm0  ;;  %p4750_p3 = pnand %p4749_p2, %p4743_p13 }
 0x33a   : > { %3692 = vmatpush1.bf16.msra.mxu0 %v4729_v35  ;;  %3497 = vmatmul.mubr.bf16.vlgmr.msra.gmra.mxu1 %v6612_v40  ;;  %v7557_v35 = vld [vmem:[#allocation9_spill] sm:$0xff] }
 0x33b   : > { %3693 = vmatprep.subr.bf16.mxu0 %v7290_v63  ;;  %4338 = vmatprep.mubr.msk.bf16.mxu1 %vm7549_vm6, %v6282_v23  ;;  %vm7558_vm12 = vnez %v7557_v35  ;;  %vm7565_vm6 = vmmov %vm7561_vm0 }
 0x33c   : > { %v2731_v8 = vsel %vm7558_vm12, %v6275_v62, 0.0  ;;  %vm7573_vm12 = vmmov %vm7561_vm0 }
 0x33d   : > { %v4582_v14 = vpop.permute.xlu0 %4581  ;;  %3252 = vmatmul.mubr.bf16.gmra.mxu0 %v6612_v40 }
 0x33e   : > { %v4584_v0 = vunpack.i.h.bf16 %v4582_v14  ;;  %v4583_v57 = vunpack.i.l.bf16 %v4582_v14  ;;  %4288 = vmatprep.mubr.msk.bf16.mxu0 %vm7550_vm3, %v6282_v23  ;;  %3694 = vmatpush1.bf16.msra.mxu0 %v4730_v34  ;;  %v4734_v34 = vld [vmem:[%s7191_s5 + $0x68] sm:$0xff]   ;;  %vm7566_vm3 = vmmov %vm7561_vm0 }
 0x33f   : > { %3695 = vmatprep.subr.bf16.mxu0 %v7290_v63 }
 0x340   : > { %v2985_v16 = vsel %vm7553_vm2, %v2729_v24, %v4583_v57  ;;  %v2986_v39 = vsel %vm7554_vm7, %v6262_v42, %v4584_v0  ;;  %v4733_v42 = vld [vmem:[%s7191_s5 + $0x70] sm:$0xff]   ;;  %v4735_v0 = vld [vmem:[%s7191_s5 + $0x60] sm:$0xff]   ;;  %vm7570_vm7 = vmmov %vm7561_vm0 }
 0x341   : > { %v6634_v58 = vpack.c.bf16 %v2986_v39, %v2985_v16  ;;  %v7562_v57 = vld [vmem:[#allocation10_spill] sm:$0xff]  ;;  %v4736_v39 = vld [vmem:[%s7191_s5 + $0xb8] sm:$0xff]  }
 0x342   : > { %3696 = vmatpush1.bf16.msra.mxu0 %v4731_v53  ;;  %vm7563_vm5 = vnez %v7562_v57 }
 0x343   : > { %3505 = vmatmul.mubr.bf16.gmra.mxu1 %v6634_v58  ;;  %3697 = vmatprep.subr.bf16.mxu0 %v7290_v63  ;;  %v2733_v53 = vsel %vm7563_vm5, %v6300_v51, 0.0  ;;  %vm7578_vm5 = vmmov %vm7561_vm0 }
 0x344   : > { %4339 = vmatprep.mubr.msk.bf16.mxu1 %vm7555_vm8, %v6307_v54  ;;  %vm7571_vm8 = vmmov %vm7561_vm0 }
 0x345   : > { %v4587_v27 = vpop.permute.xlu1 %4586  ;;  %3260 = vmatmul.mubr.bf16.gmra.mxu0 %v6634_v58 }
 0x346   : > { %v4589_v13 = vunpack.i.h.bf16 %v4587_v27  ;;  %v4588_v10 = vunpack.i.l.bf16 %v4587_v27  ;;  %4289 = vmatprep.mubr.msk.bf16.mxu0 %vm7556_vm9, %v6307_v54  ;;  %3698 = vmatpush1.bf16.msra.mxu0 %v4732_v56  ;;  %v4737_v27 = vld [vmem:[%s7191_s5 + $0xb0] sm:$0xff]   ;;  %vm7572_vm9 = vmmov %vm7561_vm0 }
 0x347   : > { %3699 = vmatprep.subr.bf16.mxu0 %v7290_v63 }
 0x348   : > { %v2988_v15 = vsel %vm7559_vm4, %v6289_v55, %v4589_v13  ;;  %v2987_v22 = vsel %vm7543_vm1, %v2731_v8, %v4588_v10  ;;  %v7568_v13 = vld [vmem:[#allocation11_spill] sm:$0xff]  ;;  %vm7576_vm1 = vmmov %vm7561_vm0 }
 0x349   : > { %v6656_v32 = vpack.c.bf16 %v2988_v15, %v2987_v22  ;;  %vm7569_vm2 = vnez %v7568_v13  ;;  %v4738_v15 = vld [vmem:[%s7191_s5 + $0xa8] sm:$0xff]  }
 0x34a   : > { %3700 = vmatpush1.bf16.msra.mxu0 %v4733_v42  ;;  %v2735_v10 = vsel %vm7569_vm2, %v6325_v4, 0.0  ;;  %vm7584_vm2 = vmmov %vm7561_vm0 }
 0x34b   : > { %3513 = vmatmul.mubr.bf16.gmra.mxu1 %v6656_v32  ;;  %3701 = vmatprep.subr.bf16.mxu0 %v7290_v63 }
 0x34c   : > { %4340 = vmatprep.mubr.msk.bf16.mxu1 %vm7560_vm11, %v6332_v28  ;;  %vm7577_vm11 = vmmov %vm7561_vm0 }
 0x34d   : > { %v4592_v62 = vpop.permute.xlu0 %4591  ;;  %3268 = vmatmul.mubr.bf16.gmra.mxu0 %v6656_v32 }
 0x34e   : > { %v4594_v55 = vunpack.i.h.bf16 %v4592_v62  ;;  %v4593_v14 = vunpack.i.l.bf16 %v4592_v62  ;;  %4290 = vmatprep.mubr.msk.bf16.mxu0 %vm7561_vm0, %v6332_v28  ;;  %3702 = vmatpush1.bf16.msra.mxu0 %v4734_v34  ;;  %v4739_v34 = vld [vmem:[%s7191_s5 + $0xa0] sm:$0xff]   ;;  %v7574_v62 = vld [vmem:[#allocation12_spill] sm:$0xff] }
 0x34f   : > { %3703 = vmatprep.subr.bf16.mxu0 %v7290_v63  ;;  %vm7575_vm4 = vnez %v7574_v62 }
 0x350   : > { %v2990_v61 = vsel %vm7564_vm10, %v6314_v52, %v4594_v55  ;;  %v2989_v24 = vsel %vm7565_vm6, %v2733_v53, %v4593_v14  ;;  %v2737_v55 = vsel %vm7575_vm4, %v6350_v17, 0.0  ;;  %vm7581_vm6 = vmmov %vm7561_vm0 }
 0x351   : > { %v6678_v16 = vpack.c.bf16 %v2990_v61, %v2989_v24  ;;  %vm7590_vm4 = vmmov %vm7561_vm0 }
 0x352   : > { %3704 = vmatpush1.bf16.msra.mxu0 %v4735_v0 }
 0x353   : > { %3521 = vmatmul.mubr.bf16.gmra.mxu1 %v6678_v16  ;;  %3713 = vmatprep.subr.bf16.mxu0 %v7290_v63 }
 0x354   : > { %4341 = vmatprep.mubr.msk.bf16.mxu1 %vm7566_vm3, %v6357_v9  ;;  %vm7582_vm3 = vmmov %vm7561_vm0 }
 0x355   : > { %v4597_v51 = vpop.permute.xlu1 %4596  ;;  %3276 = vmatmul.mubr.bf16.gmra.mxu0 %v6678_v16 }
 0x356   : > { %v4599_v52 = vunpack.i.h.bf16 %v4597_v51  ;;  %v4598_v56 = vunpack.i.l.bf16 %v4597_v51  ;;  %4291 = vmatprep.mubr.msk.bf16.mxu0 %vm7567_vm14, %v6357_v9  ;;  %3714 = vmatpush2.bf16.msra.mxu0 %v4736_v39  ;;  %vm7583_vm14 = vmmov %vm7561_vm0 }
 0x357   : > { %3715 = vmatprep.subr.bf16.mxu0 %v7290_v63 }
 0x358   : > { %v2992_v42 = vsel %vm7570_vm7, %v6339_v60, %v4599_v52  ;;  %v2991_v35 = vsel %vm7571_vm8, %v2735_v10, %v4598_v56  ;;  %vm7587_vm8 = vmmov %vm7561_vm0 }
 0x359   : > { %v6700_v8 = vpack.c.bf16 %v2992_v42, %v2991_v35 }
 0x35a   : > { %3716 = vmatpush2.bf16.msra.mxu0 %v4737_v27 }
 0x35b   : > { %3529 = vmatmul.mubr.bf16.gmra.mxu1 %v6700_v8  ;;  %3717 = vmatprep.subr.bf16.mxu0 %v7290_v63 }
 0x35c   : > { %4342 = vmatprep.mubr.msk.bf16.mxu1 %vm7572_vm9, %v6382_v18  ;;  %vm7588_vm9 = vmmov %vm7561_vm0 }
 0x35d   : > { %v4602_v4 = vpop.permute.xlu0 %4601  ;;  %3284 = vmatmul.mubr.bf16.gmra.mxu0 %v6700_v8 }
 0x35e   : > { %v4604_v60 = vunpack.i.h.bf16 %v4602_v4  ;;  %v4603_v22 = vunpack.i.l.bf16 %v4602_v4  ;;  %4292 = vmatprep.mubr.msk.bf16.mxu0 %vm7573_vm12, %v6382_v18  ;;  %3718 = vmatpush2.bf16.msra.mxu0 %v4738_v15  ;;  %vm7589_vm12 = vmmov %vm7561_vm0 }
 0x35f   : > { %3719 = vmatprep.subr.bf16.mxu0 %v7290_v63  ;;  %v7579_v63 = vld [vmem:[#allocation14_spill] sm:$0xff] }
 0x360   : > { %v2994_v14 = vsel %vm7576_vm1, %v6364_v1, %v4604_v60  ;;  %v2993_v0 = vsel %vm7577_vm11, %v2737_v55, %v4603_v22  ;;  %vm7580_vm10 = vnez %v7579_v63  ;;  %vm7593_vm11 = vmmov %vm7561_vm0 }
 0x361   : > { %v6722_v57 = vpack.c.bf16 %v2994_v14, %v2993_v0  ;;  %v2739_v1 = vsel %vm7580_vm10, %v6375_v46, 0.0  ;;  %v7585_v46 = vld [vmem:[#allocation16_spill] sm:$0xff]  ;;  %vm7595_vm10 = vmmov %vm7561_vm0 }
 0x362   : > { %3720 = vmatpush2.bf16.msra.mxu0 %v4739_v34  ;;  %vm7586_vm7 = vnez %v7585_v46 }
 0x363   : > { %3537 = vmatmul.mubr.bf16.gmra.mxu1 %v6722_v57 }
 0x364   : > { %4343 = vmatprep.mubr.msk.bf16.mxu1 %vm7561_vm0, %v6407_v31 }
 0x365   : > { %v4607_v53 = vpop.permute.xlu1 %4606  ;;  %3292 = vmatmul.mubr.bf16.gmra.mxu0 %v6722_v57 }
 0x366   : > { %v4609_v61 = vunpack.i.h.bf16 %v4607_v53  ;;  %v4608_v17 = vunpack.i.l.bf16 %v4607_v53  ;;  %4293 = vmatprep.mubr.msk.bf16.mxu0 %vm7578_vm5, %v6407_v31  ;;  %vm7594_vm5 = vmmov %vm7561_vm0 }
 0x368   : > { %v2996_v24 = vsel %vm7581_vm6, %v6389_v2, %v4609_v61  ;;  %v2995_v39 = vsel %vm7582_vm3, %v2739_v1, %v4608_v17  ;;  %v2741_v2 = vsel %vm7586_vm7, %v6400_v7, 0.0  ;;  %v7591_v7 = vld [vmem:[#allocation18_spill] sm:$0xff]  ;;  %vm7598_vm3 = vmmov %vm7561_vm0 }
 0x369   : > { %v6736_v51 = vpack.c.bf16 %v2996_v24, %v2995_v39  ;;  %vm7592_vm1 = vnez %v7591_v7  ;;  %vm7601_vm7 = vmmov %vm7561_vm0 }
 0x36b   : > { %3545 = vmatmul.mubr.bf16.gmra.mxu1 %v6736_v51 }
 0x36c   : > { %4344 = vmatprep.mubr.msk.bf16.mxu1 %vm7583_vm14, %v6432_v49  ;;  %vm7599_vm14 = vmmov %vm7561_vm0 }
 0x36d   : > { %v4612_v52 = vpop.permute.xlu0 %4611  ;;  %3300 = vmatmul.mubr.bf16.gmra.mxu0 %v6736_v51 }
 0x36e   : > { %v4614_v56 = vunpack.i.h.bf16 %v4612_v52  ;;  %v4613_v27 = vunpack.i.l.bf16 %v4612_v52  ;;  %4294 = vmatprep.mubr.msk.bf16.mxu0 %vm7584_vm2, %v6432_v49  ;;  %vm7600_vm2 = vmmov %vm7561_vm0 }
 0x370   : > { %v2998_v13 = vsel %vm7587_vm8, %v6414_v44, %v4614_v56  ;;  %v2997_v10 = vsel %vm7588_vm9, %v2741_v2, %v4613_v27  ;;  %v2743_v44 = vsel %vm7592_vm1, %v6425_v43, 0.0  ;;  %v7596_v43 = vld [vmem:[#allocation20_spill] sm:$0xff]  ;;  %vm7604_vm9 = vmmov %vm7561_vm0 }
 0x371   : > { %v6750_v42 = vpack.c.bf16 %v2998_v13, %v2997_v10  ;;  %vm7597_vm6 = vnez %v7596_v43  ;;  %vm7607_vm1 = vmmov %vm7561_vm0 }
 0x373   : > { %3553 = vmatmul.mubr.bf16.gmra.mxu1 %v6750_v42 }
 0x374   : > { %4345 = vmatprep.mubr.msk.bf16.mxu1 %vm7589_vm12, %v6457_v3  ;;  %vm7605_vm12 = vmmov %vm7561_vm0 }
 0x375   : > { %v4617_v35 = vpop.permute.xlu1 %4616  ;;  %3308 = vmatmul.mubr.bf16.gmra.mxu0 %v6750_v42 }
 0x376   : > { %v4619_v15 = vunpack.i.h.bf16 %v4617_v35  ;;  %v4618_v4 = vunpack.i.l.bf16 %v4617_v35  ;;  %4295 = vmatprep.mubr.msk.bf16.mxu0 %vm7590_vm4, %v6457_v3  ;;  %vm7606_vm4 = vmmov %vm7561_vm0 }
 0x378   : > { %v3000_v60 = vsel %vm7593_vm11, %v6439_v59, %v4619_v15  ;;  %v2999_v22 = vsel %vm7561_vm0, %v2743_v44, %v4618_v4  ;;  %v2745_v59 = vsel %vm7597_vm6, %v6450_v47, 0.0  ;;  %v7602_v47 = vld [vmem:[#allocation22_spill] sm:$0xff]  ;;  %vm7612_vm6 = vmmov %vm7561_vm0 }
 0x379   : > { %v6764_v34 = vpack.c.bf16 %v3000_v60, %v2999_v22  ;;  %vm7603_vm8 = vnez %v7602_v47 }
 0x37b   : > { %3561 = vmatmul.mubr.bf16.gmra.mxu1 %v6764_v34 }
 0x37c   : > { %4346 = vmatprep.mubr.msk.bf16.mxu1 %vm7594_vm5, %v6482_v48  ;;  %vm7610_vm5 = vmmov %vm7561_vm0 }
 0x37d   : > { %v4622_v62 = vpop.permute.xlu0 %4621  ;;  %3316 = vmatmul.mubr.bf16.gmra.mxu0 %v6764_v34 }
 0x37e   : > { %v4624_v55 = vunpack.i.h.bf16 %v4622_v62  ;;  %v4623_v14 = vunpack.i.l.bf16 %v4622_v62  ;;  %4296 = vmatprep.mubr.msk.bf16.mxu0 %vm7595_vm10, %v6482_v48  ;;  %vm7611_vm10 = vmmov %vm7561_vm0 }
 0x380   : > { %v3002_v0 = vsel %vm7598_vm3, %v6464_v19, %v4624_v55  ;;  %v3001_v53 = vsel %vm7599_vm14, %v2745_v59, %v4623_v14  ;;  %v2747_v19 = vsel %vm7603_vm8, %v6475_v5, 0.0  ;;  %v7608_v5 = vld [vmem:[#allocation24_spill] sm:$0xff]  ;;  %vm7615_vm14 = vmmov %vm7561_vm0 }
 0x381   : > { %v6778_v61 = vpack.c.bf16 %v3002_v0, %v3001_v53  ;;  %vm7609_vm11 = vnez %v7608_v5  ;;  %vm7619_vm8 = vmmov %vm7561_vm0 }
 0x383   : > { %3569 = vmatmul.mubr.bf16.gmra.mxu1 %v6778_v61 }
 0x384   : > { %4347 = vmatprep.mubr.msk.bf16.mxu1 %vm7600_vm2, %v6507_v36  ;;  %vm7616_vm2 = vmmov %vm7561_vm0 }
 0x385   : > { %v4627_v17 = vpop.permute.xlu1 %4626  ;;  %3324 = vmatmul.mubr.bf16.gmra.mxu0 %v6778_v61 }
 0x386   : > { %v4629_v63 = vunpack.i.h.bf16 %v4627_v17  ;;  %v4628_v1 = vunpack.i.l.bf16 %v4627_v17  ;;  %4297 = vmatprep.mubr.msk.bf16.mxu0 %vm7601_vm7, %v6507_v36  ;;  %vm7617_vm7 = vmmov %vm7561_vm0 }
 0x388   : > { %v3004_v24 = vsel %vm7604_vm9, %v6489_v29, %v4629_v63  ;;  %v3003_v39 = vsel %vm7605_vm12, %v2747_v19, %v4628_v1  ;;  %v2749_v29 = vsel %vm7609_vm11, %v6500_v45, 0.0  ;;  %v7613_v45 = vld [vmem:[#allocation26_spill] sm:$0xff]  ;;  %vm7620_vm9 = vmmov %vm7561_vm0  ;;  %v2755_v1 = vsel %vm5889_vm15, %v6564_v26, 0.0  ;;  %v7626_v19 = vld [vmem:[#allocation48_spill] sm:$0xff] }
 0x389   : > { %v6792_v52 = vpack.c.bf16 %v3004_v24, %v3003_v39  ;;  %vm7614_vm3 = vnez %v7613_v45  ;;  %vm7621_vm12 = vmmov %vm7561_vm0 }
 0x38a   : > { %vm7627_vm11 = vmmov %vm7561_vm0 }
 0x38b   : > { %3577 = vmatmul.mubr.bf16.gmra.mxu1 %v6792_v52  ;;  %vm7628_vm15 = vmmov %vm7561_vm0 }
 0x38c   : > { %4348 = vmatprep.mubr.msk.bf16.mxu1 %vm7606_vm4, %v6531_v41  ;;  %vm7624_vm4 = vmmov %vm7561_vm0 }
 0x38d   : > { %v4632_v56 = vpop.permute.xlu0 %4631  ;;  %3332 = vmatmul.mubr.bf16.gmra.mxu0 %v6792_v52 }
 0x38e   : > { %v4634_v27 = vunpack.i.h.bf16 %v4632_v56  ;;  %v4633_v46 = vunpack.i.l.bf16 %v4632_v56  ;;  %4298 = vmatprep.mubr.msk.bf16.mxu0 %vm7607_vm1, %v6531_v41  ;;  %vm7625_vm1 = vmmov %vm7561_vm0 }
 0x390   : > { %v3006_v2 = vsel %vm7561_vm0, %v6514_v37, %v4634_v27  ;;  %v3005_v13 = vsel %vm7610_vm5, %v2749_v29, %v4633_v46  ;;  %v2751_v37 = vsel %vm7614_vm3, %v6525_v38, 0.0  ;;  %v2753_v38 = vsel %vm5852_vm13, %v6547_v33, 0.0  ;;  %vm7623_vm13 = vmmov %vm7561_vm0 }
 0x391   : > { %v6806_v10 = vpack.c.bf16 %v3006_v2, %v3005_v13  ;;  %vm7629_vm5 = vmmov %vm7561_vm0 }
 0x392   : > { %vm7632_vm3 = vmmov %vm7561_vm0 }
 0x393   : > { %3585 = vmatmul.mubr.bf16.gmra.mxu1 %v6806_v10 }
 0x394   : > { %4349 = vmatprep.mubr.msk.bf16.mxu1 %vm7611_vm10, %v6551_v11  ;;  %vm7630_vm10 = vmmov %vm7561_vm0 }
 0x395   : > { %v4637_v35 = vpop.permute.xlu1 %4636  ;;  %3340 = vmatmul.mubr.bf16.gmra.mxu0 %v6806_v10 }
 0x396   : > { %v4639_v15 = vunpack.i.h.bf16 %v4637_v35  ;;  %v4638_v4 = vunpack.i.l.bf16 %v4637_v35  ;;  %4299 = vmatprep.mubr.msk.bf16.mxu0 %vm7612_vm6, %v6551_v11  ;;  %vm7631_vm6 = vmmov %vm7561_vm0 }
 0x398   : > { %v3008_v7 = vsel %vm7615_vm14, %v6539_v12, %v4639_v15  ;;  %v3007_v44 = vsel %vm7616_vm2, %v2751_v37, %v4638_v4  ;;  %vm7633_vm14 = vmmov %vm7561_vm0 }
 0x399   : > { %v6820_v60 = vpack.c.bf16 %v3008_v7, %v3007_v44  ;;  %vm7634_vm2 = vmmov %vm7561_vm0 }
 0x39b   : > { %3593 = vmatmul.mubr.bf16.gmra.mxu1 %v6820_v60 }
 0x39c   : > { %4350 = vmatprep.mubr.msk.bf16.mxu1 %vm7617_vm7, %v6568_v25  ;;  %v4642_v22 = vpop.permute.xlu0 %4641  ;;  %vm7635_vm7 = vmmov %vm7561_vm0 }
 0x39d   : > { %v4644_v62 = vunpack.i.h.bf16 %v4642_v22  ;;  %v4643_v55 = vunpack.i.l.bf16 %v4642_v22  ;;  %3348 = vmatmul.mubr.bf16.gmra.mxu0 %v6820_v60 }
 0x39e   : > { %4300 = vmatprep.mubr.msk.bf16.mxu0 %vm7619_vm8, %v6568_v25  ;;  %vm7636_vm8 = vmmov %vm7561_vm0 }
 0x39f   : > { %v3010_v12 = vsel %vm7620_vm9, %v6558_v50, %v4644_v62  ;;  %v3009_v43 = vsel %vm7621_vm12, %v2753_v38, %v4643_v55  ;;  %vm7637_vm9 = vmmov %vm7561_vm0 }
 0x3a0   : > { %v6834_v59 = vpack.c.bf16 %v3010_v12, %v3009_v43  ;;  %vm7638_vm12 = vmmov %vm7561_vm0 }
 0x3a2   : > { %v4647_v0 = vpop.permute.xlu1 %4646 }
 0x3a3   : > { %v4649_v53 = vunpack.i.h.bf16 %v4647_v0  ;;  %v4648_v17 = vunpack.i.l.bf16 %v4647_v0  ;;  %3601 = vmatmul.mubr.bf16.gmra.mxu1 %v6834_v59 }
 0x3a4   : > { %4351 = vmatprep.mubr.msk.bf16.mxu1 %vm7623_vm13, %v6595_v20  ;;  %vm7639_vm13 = vmmov %vm7561_vm0 }
 0x3a5   : > { %v3012_v33 = vsel %vm7624_vm4, %v6577_v21, %v4649_v53  ;;  %v3011_v50 = vsel %vm7625_vm1, %v2755_v1, %v4648_v17  ;;  %3356 = vmatmul.mubr.bf16.gmra.mxu0 %v6834_v59  ;;  %vm7640_vm4 = vmmov %vm7561_vm0 }
 0x3a6   : > { %v6846_v47 = vpack.c.bf16 %v3012_v33, %v3011_v50  ;;  %4364 = vmatprep.mubr.msk.bf16.mxu0 %vm7627_vm11, %v7626_v19  ;;  %vm7641_vm1 = vmmov %vm7561_vm0 }
 0x3ab   : > { %3609 = vmatmul.mubr.bf16.gmra.mxu1 %v6846_v47 }
 0x3ad   : > { %3722 = vmatmul.mubr.bf16.vlgmr.msra.gmra.mxu0 %v6597_v6 }
 0x3ae   : > { %4365 = vmatprep.mubr.msk.bf16.mxu0 %vm7628_vm15, %v6255_v30 }
 0x3b5   : > { %3730 = vmatmul.mubr.bf16.gmra.mxu0 %v6612_v40 }
 0x3b6   : > { %4366 = vmatprep.mubr.msk.bf16.mxu0 %vm7561_vm0, %v6282_v23 }
 0x3bd   : > { %3738 = vmatmul.mubr.bf16.gmra.mxu0 %v6634_v58 }
 0x3be   : > { %4367 = vmatprep.mubr.msk.bf16.mxu0 %vm7629_vm5, %v6307_v54 }
 0x3c5   : > { %3746 = vmatmul.mubr.bf16.gmra.mxu0 %v6656_v32 }
 0x3c6   : > { %4368 = vmatprep.mubr.msk.bf16.mxu0 %vm7630_vm10, %v6332_v28 }
 0x3cd   : > { %3754 = vmatmul.mubr.bf16.gmra.mxu0 %v6678_v16 }
 0x3ce   : > { %4369 = vmatprep.mubr.msk.bf16.mxu0 %vm7631_vm6, %v6357_v9 }
 0x3d5   : > { %3762 = vmatmul.mubr.bf16.gmra.mxu0 %v6700_v8 }
 0x3d6   : > { %4370 = vmatprep.mubr.msk.bf16.mxu0 %vm7632_vm3, %v6382_v18 }
 0x3dd   : > { %3770 = vmatmul.mubr.bf16.gmra.mxu0 %v6722_v57 }
 0x3de   : > { %4371 = vmatprep.mubr.msk.bf16.mxu0 %vm7633_vm14, %v6407_v31 }
 0x3e5   : > { %3778 = vmatmul.mubr.bf16.gmra.mxu0 %v6736_v51 }
 0x3e6   : > { %4372 = vmatprep.mubr.msk.bf16.mxu0 %vm7634_vm2, %v6432_v49 }
 0x3ed   : > { %3786 = vmatmul.mubr.bf16.gmra.mxu0 %v6750_v42 }
 0x3ee   : > { %4373 = vmatprep.mubr.msk.bf16.mxu0 %vm7635_vm7, %v6457_v3 }
 0x3f5   : > { %v6878_v30 = vpop.f32.mrf.mxu0  ;;  %3794 = vmatmul.mubr.bf16.gmra.mxu0 %v6764_v34 }
 0x3f6   : > { %4374 = vmatprep.mubr.msk.bf16.mxu0 %vm7636_vm8, %v6482_v48 }
 0x3f7   : > { %v3247_v23 = vpop.f32.mrf.mxu0 }
 0x3f9   : > { %v6883_v54 = vpop.f32.mrf.mxu0 }
 0x3fa   : > { %v6885_v28 = vpop.f32.mrf.mxu1 }
 0x3fb   : > { %v3250_v9 = vpop.f32.mrf.mxu0 }
 0x3fc   : > { %v3500_v18 = vpop.f32.mrf.mxu1 }
 0x3fd   : > { %v6887_v31 = vpop.f32.mrf.mxu0  ;;  %3802 = vmatmul.mubr.bf16.gmra.mxu0 %v6778_v61 }
 0x3fe   : > { %4375 = vmatprep.mubr.msk.bf16.mxu0 %vm7637_vm9, %v6507_v36  ;;  %v6892_v49 = vpop.f32.mrf.mxu1 }
 0x3ff   : > { %v3255_v3 = vpop.f32.mrf.mxu0 }
 0x400   : > { %v3503_v26 = vpop.f32.mrf.mxu1 }
 0x401   : > { %v6894_v21 = vpop.f32.mrf.mxu0 }
 0x403   : > { %v6896_v48 = vpop.f32.mrf.mxu1  ;;  %v3258_v6 = vpop.f32.mrf.mxu0 }
 0x405   : > { %v3508_v40 = vpop.f32.mrf.mxu1  ;;  %v6898_v58 = vpop.f32.mrf.mxu0  ;;  %3810 = vmatmul.mubr.bf16.gmra.mxu0 %v6792_v52 }
 0x406   : > { %4376 = vmatprep.mubr.msk.bf16.mxu0 %vm7638_vm12, %v6531_v41 }
 0x407   : > { %v6903_v32 = vpop.f32.mrf.mxu1  ;;  %v3263_v36 = vpop.f32.mrf.mxu0 }
 0x409   : > { %v3511_v16 = vpop.f32.mrf.mxu1  ;;  %v6905_v8 = vpop.f32.mrf.mxu0 }
 0x40b   : > { %v6907_v57 = vpop.f32.mrf.mxu1  ;;  %v3266_v51 = vpop.f32.mrf.mxu0 }
 0x40d   : > { %v3516_v42 = vpop.f32.mrf.mxu1  ;;  %v6909_v34 = vpop.f32.mrf.mxu0  ;;  %3818 = vmatmul.mubr.bf16.gmra.mxu0 %v6806_v10 }
 0x40e   : > { %4377 = vmatprep.mubr.msk.bf16.mxu0 %vm7639_vm13, %v6551_v11 }
 0x40f   : > { %v6914_v61 = vpop.f32.mrf.mxu1  ;;  %v3271_v41 = vpop.f32.mrf.mxu0 }
 0x411   : > { %v3519_v24 = vpop.f32.mrf.mxu1  ;;  %v6916_v39 = vpop.f32.mrf.mxu0 }
 0x413   : > { %v6918_v52 = vpop.f32.mrf.mxu1  ;;  %v3274_v56 = vpop.f32.mrf.mxu0 }
 0x415   : > { %v3524_v27 = vpop.f32.mrf.mxu1  ;;  %v6920_v46 = vpop.f32.mrf.mxu0  ;;  %3826 = vmatmul.mubr.bf16.gmra.mxu0 %v6820_v60 }
 0x416   : > { %4378 = vmatprep.mubr.msk.bf16.mxu0 %vm7640_vm4, %v6568_v25 }
 0x417   : > { %v6925_v5 = vpop.f32.mrf.mxu1  ;;  %v3279_v11 = vpop.f32.mrf.mxu0 }
 0x419   : > { %v3527_v29 = vpop.f32.mrf.mxu1  ;;  %v6927_v2 = vpop.f32.mrf.mxu0 }
 0x41b   : > { %v6929_v13 = vpop.f32.mrf.mxu1  ;;  %v3282_v10 = vpop.f32.mrf.mxu0 }
 0x41d   : > { %v3532_v35 = vpop.f32.mrf.mxu1  ;;  %v6931_v15 = vpop.f32.mrf.mxu0  ;;  %3834 = vmatmul.mubr.bf16.gmra.mxu0 %v6834_v59 }
 0x41e   : > { %4379 = vmatprep.mubr.msk.bf16.mxu0 %vm7641_vm1, %v6595_v20 }
 0x41f   : > { %v6936_v4 = vpop.f32.mrf.mxu1  ;;  %v3287_v25 = vpop.f32.mrf.mxu0 }
 0x421   : > { %v3535_v45 = vpop.f32.mrf.mxu1  ;;  %v6938_v37 = vpop.f32.mrf.mxu0 }
 0x423   : > { %v6940_v7 = vpop.f32.mrf.mxu1  ;;  %v3290_v44 = vpop.f32.mrf.mxu0 }
 0x425   : > { %v3540_v60 = vpop.f32.mrf.mxu1  ;;  %v6942_v22 = vpop.f32.mrf.mxu0  ;;  %3842 = vmatmul.mubr.bf16.gmra.mxu0 %v6846_v47 }
 0x427   : > { %v6945_v62 = vpop.f32.mrf.mxu1  ;;  %v3295_v55 = vpop.f32.mrf.mxu0 }
 0x429   : > { %v3543_v14 = vpop.f32.mrf.mxu1  ;;  %v6947_v38 = vpop.f32.mrf.mxu0 }
 0x42b   : > { %v6949_v20 = vpop.f32.mrf.mxu1  ;;  %v3298_v12 = vpop.f32.mrf.mxu0 }
 0x42d   : > { %v3548_v43 = vpop.f32.mrf.mxu1  ;;  %v6951_v59 = vpop.f32.mrf.mxu0 }
 0x42f   : > { %v6953_v0 = vpop.f32.mrf.mxu1  ;;  %v3303_v53 = vpop.f32.mrf.mxu0 }
 0x431   : > { %v3551_v17 = vpop.f32.mrf.mxu1  ;;  %v6955_v63 = vpop.f32.mrf.mxu0 }
 0x433   : > { %v6957_v1 = vpop.f32.mrf.mxu1  ;;  %v3306_v33 = vpop.f32.mrf.mxu0 }
 0x435   : > { %v3556_v50 = vpop.f32.mrf.mxu1  ;;  %v6959_v47 = vpop.f32.mrf.mxu0 }
 0x437   : > { %v6961_v19 = vpop.f32.mrf.mxu1  ;;  %v3311_v23 = vpop.f32.mrf.mxu0 }
 0x439   : > { %v3559_v9 = vpop.f32.mrf.mxu1  ;;  %v6963_v18 = vpop.f32.mrf.mxu0 }
 0x43b   : > { %v6965_v3 = vpop.f32.mrf.mxu1  ;;  %v3314_v26 = vpop.f32.mrf.mxu0 }
 0x43d   : > { %v3564_v6 = vpop.f32.mrf.mxu1  ;;  %v6967_v40 = vpop.f32.mrf.mxu0 }
 0x43f   : > { %v6969_v36 = vpop.f32.mrf.mxu1  ;;  %v3319_v16 = vpop.f32.mrf.mxu0 }
 0x441   : > { %v3567_v51 = vpop.f32.mrf.mxu1  ;;  %v6971_v42 = vpop.f32.mrf.mxu0 }
 0x443   : > { %v6973_v41 = vpop.f32.mrf.mxu1  ;;  %v3322_v24 = vpop.f32.mrf.mxu0 }
 0x445   : > { %v3572_v56 = vpop.f32.mrf.mxu1  ;;  %v6975_v27 = vpop.f32.mrf.mxu0 }
 0x447   : > { %v6977_v11 = vpop.f32.mrf.mxu1  ;;  %v3327_v29 = vpop.f32.mrf.mxu0 }
 0x449   : > { %v3575_v10 = vpop.f32.mrf.mxu1  ;;  %v6979_v35 = vpop.f32.mrf.mxu0 }
 0x44b   : > { %v6981_v25 = vpop.f32.mrf.mxu1  ;;  %v3330_v45 = vpop.f32.mrf.mxu0 }
 0x44d   : > { %v3580_v44 = vpop.f32.mrf.mxu1  ;;  %v6983_v60 = vpop.f32.mrf.mxu0 }
 0x44f   : > { %v6985_v55 = vpop.f32.mrf.mxu1  ;;  %v3335_v14 = vpop.f32.mrf.mxu0 }
 0x451   : > { %v3583_v12 = vpop.f32.mrf.mxu1  ;;  %v6987_v43 = vpop.f32.mrf.mxu0 }
 0x453   : > { %v6989_v53 = vpop.f32.mrf.mxu1  ;;  %v3338_v17 = vpop.f32.mrf.mxu0 }
 0x455   : > { %v3588_v33 = vpop.f32.mrf.mxu1  ;;  %v6991_v50 = vpop.f32.mrf.mxu0 }
 0x456   : > { %7642 = vst [vmem:[#allocation13_spill] sm:$0xff] %v6991_v50 }
 0x457   : > { %v6993_v23 = vpop.f32.mrf.mxu1  ;;  %v3343_v9 = vpop.f32.mrf.mxu0 }
 0x459   : > { %v3591_v26 = vpop.f32.mrf.mxu1  ;;  %v6995_v6 = vpop.f32.mrf.mxu0 }
 0x45a   : > { %7643 = vst [vmem:[#allocation34_spill] sm:$0xff] %v6995_v6 }
 0x45b   : > { %v6997_v16 = vpop.f32.mrf.mxu1  ;;  %v3346_v51 = vpop.f32.mrf.mxu0 }
 0x45d   : > { %v3596_v24 = vpop.f32.mrf.mxu1  ;;  %v6999_v56 = vpop.f32.mrf.mxu0 }
 0x45e   : > { %7644 = vst [vmem:[#allocation15_spill] sm:$0xff] %v6999_v56 }
 0x45f   : > { %v7001_v29 = vpop.f32.mrf.mxu1  ;;  %v3351_v10 = vpop.f32.mrf.mxu0 }
 0x461   : > { %v3599_v45 = vpop.f32.mrf.mxu1  ;;  %v7003_v44 = vpop.f32.mrf.mxu0 }
 0x462   : > { %7645 = vst [vmem:[#allocation31_spill] sm:$0xff] %v7003_v44  ;;  %v7018_v45 = vld [vmem:[%s7192_s6] ss:$0 sm:$0xff] }
 0x463   : > { %v7005_v14 = vpop.f32.mrf.mxu1  ;;  %v3354_v12 = vpop.f32.mrf.mxu0 }
 0x464   : > { %7646 = vst [vmem:[#allocation36_spill] sm:$0xff] %v7005_v14 }
 0x465   : > { %v3604_v17 = vpop.f32.mrf.mxu1  ;;  %v7007_v33 = vpop.f32.mrf.mxu0 }
 0x466   : > { %7647 = vst [vmem:[#allocation32_spill] sm:$0xff] %v7007_v33 }
 0x467   : > { %v7009_v9 = vpop.f32.mrf.mxu1  ;;  %v3359_v26 = vpop.f32.mrf.mxu0 }
 0x468   : > { %7648 = vst [vmem:[#allocation38_spill] sm:$0xff] %v7009_v9 }
 0x469   : > { %v3607_v6 = vpop.f32.mrf.mxu1  ;;  %v7011_v51 = vpop.f32.mrf.mxu0 }
 0x46a   : > { %7649 = vst [vmem:[#allocation17_spill] sm:$0xff] %v7011_v51 }
 0x46b   : > { %v7013_v24 = vpop.f32.mrf.mxu1  ;;  %v3362_v56 = vpop.f32.mrf.mxu0 }
 0x46c   : > { %7650 = vst [vmem:[#allocation33_spill] sm:$0xff] %v7013_v24 }
 0x46d   : > { %v3612_v50 = vpop.f32.mrf.mxu1  ;;  %v3723_v10 = vpop.f32.mrf.mxu0 }
 0x46e   : > { %v3850_v12 = vadd.f32 %v3723_v10, %v6885_v28 }
 0x46f   : > { %v7021_v17 = vpop.f32.mrf.mxu1  ;;  %v3725_v33 = vpop.f32.mrf.mxu0 }
 0x470   : > { %7651 = vst [vmem:[#allocation40_spill] sm:$0xff] %v7021_v17  ;;  %v3889_v26 = vadd.f32 %v7018_v45, %v3850_v12 }
 0x471   : > { %v3615_v6 = vpop.f32.mrf.mxu1  ;;  %v3726_v44 = vpop.f32.mrf.mxu0 }
 0x472   : > { %v3851_v51 = vadd.f32 %v3726_v44, %v6892_v49  ;;  %3921 = vxpose.xlu0.b32.start [1/16] (narrow) %v3889_v26, 64 }
 0x473   : > { %v3728_v56 = vpop.f32.mrf.mxu0 }
 0x474   : > { %v3890_v50 = vadd.f32 %v7018_v45, %v3851_v51 }
 0x475   : > { %v3731_v24 = vpop.f32.mrf.mxu0 }
 0x476   : > { %v3732_v9 = vadd.f32 %v3731_v24, %v6878_v30  ;;  %3922 = vxpose.xlu0.b32.cont [2/16] (narrow) %v3890_v50, 64 }
 0x477   : > { %v3733_v14 = vpop.f32.mrf.mxu0 }
 0x478   : > { %v3852_v28 = vadd.f32 %v3732_v9, %v6896_v48 }
 0x479   : > { %v3734_v10 = vpop.f32.mrf.mxu0 }
 0x47a   : > { %v3735_v33 = vadd.f32 %v3734_v10, %v6883_v54  ;;  %v3891_v12 = vadd.f32 %v7018_v45, %v3852_v28 }
 0x47b   : > { %v3736_v6 = vpop.f32.mrf.mxu0 }
 0x47c   : > { %v3853_v17 = vadd.f32 %v3735_v33, %v6903_v32  ;;  %3923 = vxpose.xlu0.b32.cont [3/16] (narrow) %v3891_v12, 64 }
 0x47d   : > { %v3739_v49 = vpop.f32.mrf.mxu0 }
 0x47e   : > { %v3740_v44 = vadd.f32 %v3739_v49, %v6887_v31  ;;  %v3892_v51 = vadd.f32 %v7018_v45, %v3853_v17 }
 0x47f   : > { %v3741_v26 = vpop.f32.mrf.mxu0 }
 0x480   : > { %v3854_v30 = vadd.f32 %v3740_v44, %v6907_v57  ;;  %3924 = vxpose.xlu0.b32.cont [4/16] (narrow) %v3892_v51, 64 }
 0x481   : > { %v3742_v14 = vpop.f32.mrf.mxu0 }
 0x482   : > { %v3743_v48 = vadd.f32 %v3742_v14, %v6894_v21  ;;  %v3893_v54 = vadd.f32 %v7018_v45, %v3854_v30 }
 0x483   : > { %v3744_v9 = vpop.f32.mrf.mxu0 }
 0x484   : > { %v3855_v24 = vadd.f32 %v3743_v48, %v6914_v61  ;;  %3925 = vxpose.xlu0.b32.cont [5/16] (narrow) %v3893_v54, 64 }
 0x485   : > { %v3747_v32 = vpop.f32.mrf.mxu0 }
 0x486   : > { %v3748_v56 = vadd.f32 %v3747_v32, %v6898_v58  ;;  %v3894_v31 = vadd.f32 %v7018_v45, %v3855_v24 }
 0x487   : > { %v3749_v50 = vpop.f32.mrf.mxu0 }
 0x488   : > { %v3856_v17 = vadd.f32 %v3748_v56, %v6918_v52  ;;  %3926 = vxpose.xlu0.b32.cont [6/16] (narrow) %v3894_v31, 64 }
 0x489   : > { %v3750_v57 = vpop.f32.mrf.mxu0 }
 0x48a   : > { %v3751_v28 = vadd.f32 %v3750_v57, %v6905_v8  ;;  %v3895_v21 = vadd.f32 %v7018_v45, %v3856_v17 }
 0x48b   : > { %v3752_v10 = vpop.f32.mrf.mxu0 }
 0x48c   : > { %v3857_v33 = vadd.f32 %v3751_v28, %v6925_v5  ;;  %3927 = vxpose.xlu0.b32.cont [7/16] (narrow) %v3895_v21, 64 }
 0x48d   : > { %v3755_v61 = vpop.f32.mrf.mxu0 }
 0x48e   : > { %v3756_v12 = vadd.f32 %v3755_v61, %v6909_v34  ;;  %v3896_v58 = vadd.f32 %v7018_v45, %v3857_v33 }
 0x48f   : > { %v3757_v6 = vpop.f32.mrf.mxu0 }
 0x490   : > { %v3858_v49 = vadd.f32 %v3756_v12, %v6929_v13  ;;  %3928 = vxpose.xlu0.b32.cont [8/16] (narrow) %v3896_v58, 64 }
 0x491   : > { %v3758_v52 = vpop.f32.mrf.mxu0 }
 0x492   : > { %v3759_v44 = vadd.f32 %v3758_v52, %v6916_v39  ;;  %v3897_v8 = vadd.f32 %v7018_v45, %v3858_v49 }
 0x493   : > { %v3760_v51 = vpop.f32.mrf.mxu0 }
 0x494   : > { %v3859_v26 = vadd.f32 %v3759_v44, %v6936_v4  ;;  %3929 = vxpose.xlu0.b32.cont [9/16] (narrow) %v3897_v8, 64 }
 0x495   : > { %v3763_v5 = vpop.f32.mrf.mxu0 }
 0x496   : > { %v3764_v30 = vadd.f32 %v3763_v5, %v6920_v46  ;;  %v3898_v34 = vadd.f32 %v7018_v45, %v3859_v26 }
 0x497   : > { %v3765_v14 = vpop.f32.mrf.mxu0 }
 0x498   : > { %v3860_v48 = vadd.f32 %v3764_v30, %v6940_v7  ;;  %3930 = vxpose.xlu0.b32.cont [10/16] (narrow) %v3898_v34, 64 }
 0x499   : > { %v3766_v13 = vpop.f32.mrf.mxu0 }
 0x49a   : > { %v3767_v54 = vadd.f32 %v3766_v13, %v6927_v2  ;;  %v3899_v39 = vadd.f32 %v7018_v45, %v3860_v48 }
 0x49b   : > { %v3768_v9 = vpop.f32.mrf.mxu0 }
 0x49c   : > { %v3861_v24 = vadd.f32 %v3767_v54, %v6945_v62  ;;  %3931 = vxpose.xlu0.b32.cont [11/16] (narrow) %v3899_v39, 64 }
 0x49d   : > { %v3771_v4 = vpop.f32.mrf.mxu0 }
 0x49e   : > { %v3772_v32 = vadd.f32 %v3771_v4, %v6931_v15  ;;  %v3900_v46 = vadd.f32 %v7018_v45, %v3861_v24 }
 0x49f   : > { %v3773_v56 = vpop.f32.mrf.mxu0 }
 0x4a0   : > { %v3862_v31 = vadd.f32 %v3772_v32, %v6949_v20  ;;  %3932 = vxpose.xlu0.b32.cont [12/16] (narrow) %v3900_v46, 64 }
 0x4a1   : > { %v3774_v7 = vpop.f32.mrf.mxu0 }
 0x4a2   : > { %v3775_v50 = vadd.f32 %v3774_v7, %v6938_v37  ;;  %v3901_v2 = vadd.f32 %v7018_v45, %v3862_v31 }
 0x4a3   : > { %v3776_v17 = vpop.f32.mrf.mxu0 }
 0x4a4   : > { %v3863_v57 = vadd.f32 %v3775_v50, %v6953_v0  ;;  %3933 = vxpose.xlu0.b32.cont [13/16] (narrow) %v3901_v2, 64 }
 0x4a5   : > { %v3779_v62 = vpop.f32.mrf.mxu0 }
 0x4a6   : > { %v3780_v28 = vadd.f32 %v3779_v62, %v6942_v22  ;;  %v3902_v15 = vadd.f32 %v7018_v45, %v3863_v57 }
 0x4a7   : > { %v3781_v21 = vpop.f32.mrf.mxu0 }
 0x4a8   : > { %v3864_v10 = vadd.f32 %v3780_v28, %v6957_v1  ;;  %3934 = vxpose.xlu0.b32.cont [14/16] (narrow) %v3902_v15, 64  ;;  %v7652_v15 = vld [vmem:[#allocation13_spill] sm:$0xff] }
 0x4a9   : > { %v3782_v20 = vpop.f32.mrf.mxu0 }
 0x4aa   : > { %v3783_v33 = vadd.f32 %v3782_v20, %v6947_v38  ;;  %v3903_v37 = vadd.f32 %v7018_v45, %v3864_v10  ;;  %v7653_v20 = vld [vmem:[#allocation36_spill] sm:$0xff] }
 0x4ab   : > { %v3784_v61 = vpop.f32.mrf.mxu0 }
 0x4ac   : > { %v3865_v12 = vadd.f32 %v3783_v33, %v6961_v19  ;;  %3935 = vxpose.xlu0.b32.cont [15/16] (narrow) %v3903_v37, 64  ;;  %v7654_v37 = vld [vmem:[#allocation34_spill] sm:$0xff] }
 0x4ad   : > { %v3787_v0 = vpop.f32.mrf.mxu0 }
 0x4ae   : > { %v3788_v58 = vadd.f32 %v3787_v0, %v6951_v59  ;;  %v3904_v22 = vadd.f32 %v7018_v45, %v3865_v12  ;;  %v7655_v0 = vld [vmem:[#allocation38_spill] sm:$0xff] }
 0x4af   : > { %v3789_v6 = vpop.f32.mrf.mxu0 }
 0x4b0   : > { %v3866_v49 = vadd.f32 %v3788_v58, %v6965_v3  ;;  %3936 = vxpose.xlu0.b32.end [16/16] (narrow) %v3904_v22, 64  ;;  %v7656_v22 = vld [vmem:[#allocation15_spill] sm:$0xff] }
 0x4b1   : > { %v3790_v1 = vpop.f32.mrf.mxu0 }
 0x4b2   : > { %v3791_v52 = vadd.f32 %v3790_v1, %v6955_v63  ;;  %v3905_v38 = vadd.f32 %v7018_v45, %v3866_v49 }
 0x4b3   : > { %v3792_v44 = vpop.f32.mrf.mxu0 }
 0x4b4   : > { %v3867_v8 = vadd.f32 %v3791_v52, %v6969_v36  ;;  %3953 = vxpose.xlu1.b32.start [1/16] (narrow) %v3905_v38, 64  ;;  %v7657_v52 = vld [vmem:[#allocation33_spill] sm:$0xff] }
 0x4b5   : > { %v3795_v19 = vpop.f32.mrf.mxu0 }
 0x4b6   : > { %v3796_v51 = vadd.f32 %v3795_v19, %v6959_v47  ;;  %v3906_v59 = vadd.f32 %v7018_v45, %v3867_v8  ;;  %v7658_v8 = vld [vmem:[#allocation31_spill] sm:$0xff] }
 0x4b7   : > { %v3797_v26 = vpop.f32.mrf.mxu0 }
 0x4b8   : > { %v3868_v5 = vadd.f32 %v3796_v51, %v6973_v41  ;;  %3954 = vxpose.xlu1.b32.cont [2/16] (narrow) %v3906_v59, 64  ;;  %v7659_v26 = vld [vmem:[#allocation40_spill] sm:$0xff] }
 0x4b9   : > { %v3798_v3 = vpop.f32.mrf.mxu0 }
 0x4ba   : > { %v3799_v30 = vadd.f32 %v3798_v3, %v6963_v18  ;;  %v3907_v63 = vadd.f32 %v7018_v45, %v3868_v5 }
 0x4bb   : > { %v3800_v34 = vpop.f32.mrf.mxu0 }
 0x4bc   : > { %v3869_v14 = vadd.f32 %v3799_v30, %v6977_v11  ;;  %3955 = vxpose.xlu1.b32.cont [3/16] (narrow) %v3907_v63, 64  ;;  %v7660_v30 = vld [vmem:[#allocation32_spill] sm:$0xff] }
 0x4bd   : > { %v3803_v36 = vpop.f32.mrf.mxu0 }
 0x4be   : > { %v3804_v48 = vadd.f32 %v3803_v36, %v6967_v40  ;;  %v3908_v47 = vadd.f32 %v7018_v45, %v3869_v14 }
 0x4bf   : > { %v3805_v13 = vpop.f32.mrf.mxu0 }
 0x4c0   : > { %v3870_v54 = vadd.f32 %v3804_v48, %v6981_v25  ;;  %3956 = vxpose.xlu1.b32.cont [4/16] (narrow) %v3908_v47, 64  ;;  %v7661_v47 = vld [vmem:[#allocation17_spill] sm:$0xff] }
 0x4c1   : > { %v3806_v41 = vpop.f32.mrf.mxu0 }
 0x4c2   : > { %v3807_v39 = vadd.f32 %v3806_v41, %v6971_v42  ;;  %v3909_v18 = vadd.f32 %v7018_v45, %v3870_v54 }
 0x4c3   : > { %v3808_v9 = vpop.f32.mrf.mxu0 }
 0x4c4   : > { %v3871_v24 = vadd.f32 %v3807_v39, %v6985_v55  ;;  %3957 = vxpose.xlu1.b32.cont [5/16] (narrow) %v3909_v18, 64 }
 0x4c5   : > { %v3811_v11 = vpop.f32.mrf.mxu0 }
 0x4c6   : > { %v3812_v4 = vadd.f32 %v3811_v11, %v6975_v27  ;;  %v3910_v40 = vadd.f32 %v7018_v45, %v3871_v24 }
 0x4c7   : > { %v3813_v32 = vpop.f32.mrf.mxu0 }
 0x4c8   : > { %v3872_v46 = vadd.f32 %v3812_v4, %v6989_v53  ;;  %3958 = vxpose.xlu1.b32.cont [6/16] (narrow) %v3910_v40, 64 }
 0x4c9   : > { %v3814_v25 = vpop.f32.mrf.mxu0 }
 0x4ca   : > { %v3815_v56 = vadd.f32 %v3814_v25, %v6979_v35  ;;  %v3911_v42 = vadd.f32 %v7018_v45, %v3872_v46 }
 0x4cb   : > { %v3816_v31 = vpop.f32.mrf.mxu0 }
 0x4cc   : > { %v3873_v7 = vadd.f32 %v3815_v56, %v6993_v23  ;;  %3959 = vxpose.xlu1.b32.cont [7/16] (narrow) %v3911_v42, 64 }
 0x4cd   : > { %v3819_v55 = vpop.f32.mrf.mxu0 }
 0x4ce   : > { %v3820_v50 = vadd.f32 %v3819_v55, %v6983_v60  ;;  %v3912_v27 = vadd.f32 %v7018_v45, %v3873_v7 }
 0x4cf   : > { %v3821_v2 = vpop.f32.mrf.mxu0 }
 0x4d0   : > { %v3874_v17 = vadd.f32 %v3820_v50, %v6997_v16  ;;  %3960 = vxpose.xlu1.b32.cont [8/16] (narrow) %v3912_v27, 64 }
 0x4d1   : > { %v3822_v53 = vpop.f32.mrf.mxu0 }
 0x4d2   : > { %v3823_v57 = vadd.f32 %v3822_v53, %v6987_v43  ;;  %v3913_v35 = vadd.f32 %v7018_v45, %v3874_v17 }
 0x4d3   : > { %v3824_v62 = vpop.f32.mrf.mxu0 }
 0x4d4   : > { %v3875_v28 = vadd.f32 %v3823_v57, %v7001_v29  ;;  %3961 = vxpose.xlu1.b32.cont [9/16] (narrow) %v3913_v35, 64 }
 0x4d5   : > { %v3827_v23 = vpop.f32.mrf.mxu0 }
 0x4d6   : > { %v3828_v21 = vadd.f32 %v3827_v23, %v7652_v15  ;;  %v3914_v60 = vadd.f32 %v7018_v45, %v3875_v28 }
 0x4d7   : > { %v3829_v10 = vpop.f32.mrf.mxu0 }
 0x4d8   : > { %v3876_v33 = vadd.f32 %v3828_v21, %v7653_v20  ;;  %3962 = vxpose.xlu1.b32.cont [10/16] (narrow) %v3914_v60, 64 }
 0x4d9   : > { %v3830_v16 = vpop.f32.mrf.mxu0 }
 0x4da   : > { %v3831_v61 = vadd.f32 %v3830_v16, %v7654_v37  ;;  %v3915_v43 = vadd.f32 %v7018_v45, %v3876_v33 }
 0x4db   : > { %v3832_v12 = vpop.f32.mrf.mxu0 }
 0x4dc   : > { %v3877_v58 = vadd.f32 %v3831_v61, %v7655_v0  ;;  %3963 = vxpose.xlu1.b32.cont [11/16] (narrow) %v3915_v43, 64 }
 0x4dd   : > { %v3835_v29 = vpop.f32.mrf.mxu0 }
 0x4de   : > { %v3836_v6 = vadd.f32 %v3835_v29, %v7656_v22  ;;  %v3916_v49 = vadd.f32 %v7018_v45, %v3877_v58 }
 0x4df   : > { %v3837_v1 = vpop.f32.mrf.mxu0 }
 0x4e0   : > { %v3878_v38 = vadd.f32 %v3836_v6, %v7657_v52  ;;  %3964 = vxpose.xlu1.b32.cont [12/16] (narrow) %v3916_v49, 64 }
 0x4e1   : > { %v3838_v44 = vpop.f32.mrf.mxu0 }
 0x4e2   : > { %v3839_v19 = vadd.f32 %v3838_v44, %v7658_v8  ;;  %v3917_v51 = vadd.f32 %v7018_v45, %v3878_v38 }
 0x4e3   : > { %v3840_v59 = vpop.f32.mrf.mxu0 }
 0x4e4   : > { %v3879_v5 = vadd.f32 %v3839_v19, %v7659_v26  ;;  %3965 = vxpose.xlu1.b32.cont [13/16] (narrow) %v3917_v51, 64 }
 0x4e5   : > { %v3843_v3 = vpop.f32.mrf.mxu0 }
 0x4e6   : > { %v3844_v63 = vadd.f32 %v3843_v3, %v7660_v30  ;;  %v3918_v34 = vadd.f32 %v7018_v45, %v3879_v5 }
 0x4e7   : > { %v3845_v14 = vpop.f32.mrf.mxu0 }
 0x4e8   : > { %3966 = vxpose.xlu1.b32.cont [14/16] (narrow) %v3918_v34, 64  ;;  %v3919_v48 = vadd.f32 %v7018_v45, %v3844_v63 }
 0x4e9   : > { %v3846_v36 = vpop.f32.mrf.mxu0 }
 0x4ea   : > { %v3847_v13 = vadd.f32 %v3846_v36, %v7661_v47 }
 0x4eb   : > { %v3848_v54 = vpop.f32.mrf.mxu0 }
 0x4ec   : > { %3967 = vxpose.xlu1.b32.cont [15/16] (narrow) %v3919_v48, 64  ;;  %v3920_v41 = vadd.f32 %v7018_v45, %v3847_v13 }
 0x4f0   : > { %3968 = vxpose.xlu1.b32.end [16/16] (narrow) %v3920_v41, 64  ;;  %v3937_v39 = vpop.trf.xlu0 }
 0x4f1   : > { %3985 = vst [vmem:[%s7117_s16] sm:$0xff] %v3937_v39 }
 0x4f4   : > { %v3938_v18 = vpop.trf.xlu0 }
 0x4f5   : > { %3987 = vst [vmem:[%s7117_s16 + $0x10] sm:$0xff] %v3938_v18 }
 0x4f8   : > { %v3939_v9 = vpop.trf.xlu0 }
 0x4f9   : > { %3989 = vst [vmem:[%s7117_s16 + $0x20] sm:$0xff] %v3939_v9 }
 0x4fc   : > { %v3940_v45 = vpop.trf.xlu0 }
 0x4fd   : > { %3991 = vst [vmem:[%s7117_s16 + $0x30] sm:$0xff] %v3940_v45 }
 0x500   : > { %v3941_v24 = vpop.trf.xlu0 }
 0x501   : > { %3993 = vst [vmem:[%s7117_s16 + $0x40] sm:$0xff] %v3941_v24 }
 0x504   : > { %v3942_v11 = vpop.trf.xlu0 }
 0x505   : > { %3995 = vst [vmem:[%s7117_s16 + $0x50] sm:$0xff] %v3942_v11 }
 0x508   : > { %v3943_v4 = vpop.trf.xlu0 }
 0x509   : > { %3997 = vst [vmem:[%s7117_s16 + $0x60] sm:$0xff] %v3943_v4 }
 0x50c   : > { %v3944_v40 = vpop.trf.xlu0 }
 0x50d   : > { %3999 = vst [vmem:[%s7117_s16 + $0x70] sm:$0xff] %v3944_v40 }
 0x530   : > { %v3969_v32 = vpop.trf.xlu1 }
 0x531   : > { %3986 = vst [vmem:[%s7117_s16 + $0x8] sm:$0xff] %v3969_v32 }
 0x534   : > { %v3970_v46 = vpop.trf.xlu1 }
 0x535   : > { %3988 = vst [vmem:[%s7117_s16 + $0x18] sm:$0xff] %v3970_v46 }
 0x538   : > { %v3971_v25 = vpop.trf.xlu1 }
 0x539   : > { %3990 = vst [vmem:[%s7117_s16 + $0x28] sm:$0xff] %v3971_v25 }
 0x53c   : > { %v3972_v56 = vpop.trf.xlu1 }
 0x53d   : > { %3992 = vst [vmem:[%s7117_s16 + $0x38] sm:$0xff] %v3972_v56 }
 0x540   : > { %v3973_v42 = vpop.trf.xlu1 }
 0x541   : > { %3994 = vst [vmem:[%s7117_s16 + $0x48] sm:$0xff] %v3973_v42 }
 0x544   : > { %v3974_v31 = vpop.trf.xlu1 }
 0x545   : > { %3996 = vst [vmem:[%s7117_s16 + $0x58] sm:$0xff] %v3974_v31 }
 0x548   : > { %v3975_v7 = vpop.trf.xlu1 }
 0x549   : > { %3998 = vst [vmem:[%s7117_s16 + $0x68] sm:$0xff] %v3975_v7 }
 0x54c   : > { %v3976_v55 = vpop.trf.xlu1 }
 0x54d   : > { %4000 = vst [vmem:[%s7117_s16 + $0x78] sm:$0xff] %v3976_v55 }
 0x54e   : > { %4753 = shalt.err (!%p4750_p3)
}
 0x54f   : > { %s4754_s22 = scalar_lea.hbm %s7139_s17, 2048  ;;  %s4758_s8 = scalar_lea.hbm %s7193_s7, 4096 }
 0x550   : > { %p4755_p4 = scmp.ne.s32.totalorder %s7139_s17, %s4754_s22  ;;  %p4759_p9 = scmp.lt.s32.totalorder %s7139_s17, %s7193_s7 }
 0x551   : > { %p4760_p10 = scmp.lt.s32.totalorder %s4758_s8, %s4754_s22 }
 0x552   : > { %p4756_p7 = pnand %p4755_p4, %p4886_p5 }
 0x553   : > { %p4761_p11 = por %p4760_p10, %p4759_p9 }
 0x554   : > { %p4757_p8 = pneg %p4756_p7 }
 0x556   : > { %p4762_p12 = pnand %p4761_p11, %p4757_p8 }
 0x558   : > { %4765 = shalt.err (!%p4762_p12)
}
 0x559   : > { %s4806_s14 = smov 256   ;;  %s4807_s15 = smov 16  }
 0x55a   : > { %4446 = dma.vmem_to_hbm [thread:$0]  (%p4886_p5), %s7141_s13, 2048, %s7139_s17, %s7146_s18, %s4806_s14, %s4806_s14, %s4807_s15  }
 0x55b PF: > { %p4452_p13 = scmp.ge.s32.totalorder %s4800_s27, 2  ;;  %s4030_s19 = sand.u32 1, %s4788_s24  }
 0x55c   : > { %s4031_s28 = scalar_lea.sflag [#allocation4], %s4030_s19 }
 0x55d   : > { %p4449_p0 = pnand %p4452_p13, %p4890_p6 }
 0x55f   : > { %p4450_p1 = pneg %p4449_p0 }
 0x561   : > { %4783 = dma.done.wait (%p4450_p1), %s4031_s28, 2048  }
 0x562   : > { %4785 = vsyncadd (%p4450_p1), %s4031_s28, 4294965248  ;;  %p17_p2 = scmp.ge.s32.totalorder %s4873_s30, 4   ;;  %s7662_s24 = smov %s4792_s25 }
 0x563   : > { %s7663_s25 = smov %s4796_s26  ;;  %s7664_s26 = smov %s4884_s10 }
 0x564   : > { %s7665_s27 = smov %s4873_s30  ;;  %19 = sbr.rel (!%p17_p2) target bundleno = 3 (0x3), region = 87 }
 0x569   :  { %4036 = vsyncpa [#allocation4], 1 }
 0x56a   :  { %4038 = vsyncpa [#allocation4 + $0x1], 1 }

</bundles_post_ra>
